<compile_context>
chip_gen: v7x
topology: tpu7x:2x2x1
jax: 0.10.0
libtpu: 0.0.40
codegen_flags: <defaults>
</compile_context>

<pallas_src>
import functools

import numpy as np
import jax
import jax.numpy as jnp
from jax.experimental import pallas as pl
from jax.experimental.pallas import tpu as pltpu

_VMEM_SPEC = pl.BlockSpec(memory_space=pltpu.MemorySpace.VMEM)


# ---------------------------------------------------------------------------
# The single fused kernel
# ---------------------------------------------------------------------------

def _audio_net_kernel(
    x_ref,
    s1_ref, m1_ref, q1_ref, p1_ref, g1_ref, g1t_ref, ga1_ref, be1_ref,
    s2_ref, m2_ref, g2_ref, g2t_ref, ga2_ref, be2_ref,
    q2_ref, p2_ref,
    s3_ref, m3_ref, g3_ref, g3t_ref, ga3_ref, be3_ref,
    s4_ref, m4_ref, g4_ref, g4t_ref, ga4_ref, be4_ref,
    s5_ref, m5_ref, bias5_ref,
    out_ref,
    *, batch, h_last, wo_last, c_last, slope,
):
    f32 = jnp.float32

    def leaky(v):
        return jnp.where(v >= 0, v, v * slope)

    def conv(x, s_ref, m_ref):
        # y = sum_i  S_i @ x @ B_i     (all MXU)
        acc = None
        for i in range(s_ref.shape[0]):
            t = jnp.dot(s_ref[i], x, preferred_element_type=f32)
            t = jnp.dot(t, m_ref[i], preferred_element_type=f32)
            acc = t if acc is None else acc + t
        return acc

    def avg_pool(x, q_ref, p_ref):
        # P already carries the 1/(kh*kw) factor; shared across the kh row taps.
        xp = jnp.dot(x, p_ref[...], preferred_element_type=f32)
        acc = None
        for i in range(q_ref.shape[0]):
            t = jnp.dot(q_ref[i], xp, preferred_element_type=f32)
            acc = t if acc is None else acc + t
        return acc

    def batch_norm(x, g_ref, gt_ref, gamma_ref, beta_ref):
        # Training-mode BN over the whole (N*H, W*C) slab, single pass.
        g = g_ref[...]                      # (W*C, C) channel indicator
        n_ch = g.shape[1]
        count = x.shape[0] * (x.shape[1] // n_ch)          # N*H*W (python int)
        s = jnp.sum(x, axis=0, keepdims=True)              # (1, W*C)
        ss = jnp.sum(x * x, axis=0, keepdims=True)
        mean = jnp.dot(s, g, preferred_element_type=f32) * (1.0 / count)   # (1, C)
        ex2 = jnp.dot(ss, g, preferred_element_type=f32) * (1.0 / count)
        var = ex2 - mean * mean                            # biased, like PyTorch
        a = gamma_ref[...] * jax.lax.rsqrt(var + 1e-5)     # (1, C)
        b = beta_ref[...] - mean * a
        a_w = jnp.dot(a, gt_ref[...], preferred_element_type=f32)   # (1, W*C)
        b_w = jnp.dot(b, gt_ref[...], preferred_element_type=f32)
        return x * a_w + b_w

    x = x_ref[...]                                             # (N*72, 56)
    x = conv(x, s1_ref, m1_ref)                                # Conv2d(1,3,5,(2,1),1)   -> (N*35, 162)
    x = avg_pool(x, q1_ref, p1_ref)                            # AvgPool2d((3,5),2)      -> (N*17, 75)
    x = leaky(batch_norm(x, g1_ref, g1t_ref, ga1_ref, be1_ref))  # BN(3)+LeakyReLU(0.2)
    x = conv(x, s2_ref, m2_ref)                                # Conv2d(3,5,(3,6),2,1)   -> (N*9, 55)
    x = batch_norm(x, g2_ref, g2t_ref, ga2_ref, be2_ref)       # BN(5)
    x = leaky(avg_pool(x, q2_ref, p2_ref))                     # AvgPool2d(3,2)+LeakyReLU -> (N*4, 25)
    x = conv(x, s3_ref, m3_ref)                                # Conv2d(5,8,3,1,1)       -> (N*4, 40)
    x = batch_norm(x, g3_ref, g3t_ref, ga3_ref, be3_ref)       # BN(8)
    x = conv(x, s4_ref, m4_ref)                                # Conv2d(8,16,3,1,1)      -> (N*4, 80)
    x = batch_norm(x, g4_ref, g4t_ref, ga4_ref, be4_ref)       # BN(16)
    x = conv(x, s5_ref, m5_ref) + bias5_ref[...]               # Conv2d(16,32,3,1,1)     -> (N*4, 160)

    # MaxPool2d((4,5),1) on a 4x5 map == global max per channel, then LeakyReLU.
    for n in range(batch):
        y = x[n * h_last:(n + 1) * h_last, :]                  # (4, wo_last*c_last)
        m = jnp.max(y, axis=0, keepdims=True)                  # (1, wo_last*c_last)
        r = m[:, 0:c_last]
        for w in range(1, wo_last):
            r = jnp.maximum(r, m[:, w * c_last:(w + 1) * c_last])
        out_ref[n:n + 1, :] = leaky(r)                         # (1, 32)


# ---------------------------------------------------------------------------
# One-time (numpy) lowering of the PyTorch-layout parameters to matmul operands
# ---------------------------------------------------------------------------

def _lower_conv(w, h_in, w_in, stride, padding, batch):
    """Conv2d -> (S: (kh, N*Ho, N*Hi) block-diag row selectors,
                  B: (kh, Wi*Cin, Wo*Cout) banded weights), plus (Ho, Wo)."""
    c_out, c_in, kh, kw = w.shape
    sh, sw = stride
    ph, pw = padding
    h_out = (h_in + 2 * ph - kh) // sh + 1
    w_out = (w_in + 2 * pw - kw) // sw + 1
    s = np.zeros((kh, h_out, h_in), np.float32)
    for i in range(kh):
        for ho in range(h_out):
            h = sh * ho + i - ph
            if 0 <= h < h_in:
                s[i, ho, h] = 1.0
    eye = np.eye(batch, dtype=np.float32)
    s_blk = np.stack([np.kron(eye, s[i]) for i in range(kh)])
    b = np.zeros((kh, w_in * c_in, w_out * c_out), np.float32)
    for i in range(kh):
        for wo in range(w_out):
            for j in range(kw):
                wi = sw * wo + j - pw
                if 0 <= wi < w_in:
                    b[i, wi * c_in:(wi + 1) * c_in, wo * c_out:(wo + 1) * c_out] = w[:, :, i, j].T
    return s_blk, b, h_out, w_out


def _lower_pool(c, h_in, w_in, ksize, stride, batch):
    """AvgPool2d -> (S: (kh, N*Ho, N*Hi) selectors, P: (Wi*C, Wo*C) with 1/(kh*kw))."""
    kh, kw = ksize
    sh, sw = stride
    h_out = (h_in - kh) // sh + 1
    w_out = (w_in - kw) // sw + 1
    s = np.zeros((kh, h_out, h_in), np.float32)
    for i in range(kh):
        for ho in range(h_out):
            s[i, ho, sh * ho + i] = 1.0
    eye = np.eye(batch, dtype=np.float32)
    s_blk = np.stack([np.kron(eye, s[i]) for i in range(kh)])
    p = np.zeros((w_in * c, w_out * c), np.float32)
    inv = 1.0 / (kh * kw)
    for wo in range(w_out):
        for j in range(kw):
            wi = sw * wo + j
            for ch in range(c):
                p[wi * c + ch, wo * c + ch] = inv
    return s_blk, p, h_out, w_out


def _bn_indicator(c, w_out):
    g = np.zeros((w_out * c, c), np.float32)
    for w in range(w_out):
        for ch in range(c):
            g[w * c + ch, ch] = 1.0
    return g


def prepare_params(p, batch, in_hw=(72, 56)):
    """Lower PyTorch-layout params to the kernel operand list (in kernel order)."""
    h, w = int(in_hw[0]), int(in_hw[1])
    ops = []

    def vec(v):
        return np.asarray(v, np.float32).reshape(1, -1)

    # Conv2d(1,3,5,(2,1),1)  (bias b1 dropped: cancelled by BN1's batch-mean)
    s1, m1, h, w = _lower_conv(np.asarray(p["w1"], np.float32), h, w, (2, 1), (1, 1), batch)
    # AvgPool2d((3,5),2) + BN(3)
    q1, p1, h, w = _lower_pool(3, h, w, (3, 5), (2, 2), batch)
    g1 = _bn_indicator(3, w)
    ops += [s1, m1, q1, p1, g1, g1.T.copy(), vec(p["g1"]), vec(p["be1"])]

    # Conv2d(3,5,(3,6),2,1) + BN(5)   (bias b2 dropped)
    s2, m2, h, w = _lower_conv(np.asarray(p["w2"], np.float32), h, w, (2, 2), (1, 1), batch)
    g2 = _bn_indicator(5, w)
    ops += [s2, m2, g2, g2.T.copy(), vec(p["g2"]), vec(p["be2"])]

    # AvgPool2d(3,2)
    q2, p2, h, w = _lower_pool(5, h, w, (3, 3), (2, 2), batch)
    ops += [q2, p2]

    # Conv2d(5,8,3,1,1) + BN(8)       (bias b3 dropped)
    s3, m3, h, w = _lower_conv(np.asarray(p["w3"], np.float32), h, w, (1, 1), (1, 1), batch)
    g3 = _bn_indicator(8, w)
    ops += [s3, m3, g3, g3.T.copy(), vec(p["g3"]), vec(p["be3"])]

    # Conv2d(8,16,3,1,1) + BN(16)     (bias b4 dropped)
    s4, m4, h, w = _lower_conv(np.asarray(p["w4"], np.float32), h, w, (1, 1), (1, 1), batch)
    g4 = _bn_indicator(16, w)
    ops += [s4, m4, g4, g4.T.copy(), vec(p["g4"]), vec(p["be4"])]

    # Conv2d(16,32,3,1,1)             (bias b5 kept, pre-tiled lane-dense)
    s5, m5, h, w = _lower_conv(np.asarray(p["w5"], np.float32), h, w, (1, 1), (1, 1), batch)
    bias5 = np.tile(np.asarray(p["b5"], np.float32), w).reshape(1, w * 32)
    ops += [s5, m5, bias5]

    meta = dict(batch=batch, h_last=h, wo_last=w, c_last=32)
    return [jnp.asarray(o) for o in ops], meta


# ---------------------------------------------------------------------------
# Forward wrapper: a single pallas_call, everything VMEM-resident
# ---------------------------------------------------------------------------

def make_forward(meta):
    kern = functools.partial(
        _audio_net_kernel,
        batch=meta["batch"], h_last=meta["h_last"],
        wo_last=meta["wo_last"], c_last=meta["c_last"], slope=0.2)

    @jax.jit
    def forward(a, ops):
        n, c, hh, ww = a.shape
        assert c == 1
        x = a.reshape(n * hh, ww)   # NCHW with C=1 -> (N*H, W); layout-trivial
        return pl.pallas_call(
            kern,
            out_shape=jax.ShapeDtypeStruct((n, meta["c_last"]), jnp.float32),
            in_specs=[_VMEM_SPEC] * (1 + len(ops)),
            out_specs=_VMEM_SPEC,
        )(x, *ops)

    return forward


# ---------------------------------------------------------------------------
# Parameter init (mirrors a fresh PyTorch Audio_net)
# ---------------------------------------------------------------------------

def _conv_init(key, cout, cin, kh, kw):
    kw_, kb_ = jax.random.split(key)
    fan_in = cin * kh * kw
    bound = 1.0 / (fan_in ** 0.5)
    w = jax.random.uniform(kw_, (cout, cin, kh, kw), jnp.float32, -bound, bound)
    b = jax.random.uniform(kb_, (cout,), jnp.float32, -bound, bound)
    return w, b


def init_params(key):
    ks = jax.random.split(key, 5)
    p = {}
    p["w1"], p["b1"] = _conv_init(ks[0], 3, 1, 5, 5)
    p["w2"], p["b2"] = _conv_init(ks[1], 5, 3, 3, 6)
    p["w3"], p["b3"] = _conv_init(ks[2], 8, 5, 3, 3)
    p["w4"], p["b4"] = _conv_init(ks[3], 16, 8, 3, 3)
    p["w5"], p["b5"] = _conv_init(ks[4], 32, 16, 3, 3)
    # BatchNorm2d defaults (training-mode batch stats are used in the forward).
    for name, c in (("1", 3), ("2", 5), ("3", 8), ("4", 16)):
        p["g" + name] = jnp.ones((c,), jnp.float32)
        p["be" + name] = jnp.zeros((c,), jnp.float32)
    return p


if __name__ == "__main__":
    key = jax.random.PRNGKey(0)
    pkey, xkey = jax.random.split(key)
    params = init_params(pkey)
    # Smallest audio-spectrogram-like NCHW input that survives every conv/pool:
    a = jax.random.normal(xkey, (2, 1, 72, 56), jnp.float32)

    ops, meta = prepare_params(params, batch=a.shape[0], in_hw=a.shape[2:])
    forward = make_forward(meta)

    out = jax.block_until_ready(forward(a, ops))
    assert out.shape == (2, 32), out.shape
    assert bool(jnp.all(jnp.isfinite(out)))
    print("KERNEL_OK")
</pallas_src>

<mosaic_0001>
module attributes {stable_mosaic.version = 11 : i64} {
  func.func @_audio_net_kernel(%arg0: memref<144x56xf32, #tpu.memory_space<vmem>>, %arg1: memref<5x70x144xf32, #tpu.memory_space<vmem>>, %arg2: memref<5x56x162xf32, #tpu.memory_space<vmem>>, %arg3: memref<3x34x70xf32, #tpu.memory_space<vmem>>, %arg4: memref<162x75xf32, #tpu.memory_space<vmem>>, %arg5: memref<75x3xf32, #tpu.memory_space<vmem>>, %arg6: memref<3x75xf32, #tpu.memory_space<vmem>>, %arg7: memref<1x3xf32, #tpu.memory_space<vmem>>, %arg8: memref<1x3xf32, #tpu.memory_space<vmem>>, %arg9: memref<3x18x34xf32, #tpu.memory_space<vmem>>, %arg10: memref<3x75x55xf32, #tpu.memory_space<vmem>>, %arg11: memref<55x5xf32, #tpu.memory_space<vmem>>, %arg12: memref<5x55xf32, #tpu.memory_space<vmem>>, %arg13: memref<1x5xf32, #tpu.memory_space<vmem>>, %arg14: memref<1x5xf32, #tpu.memory_space<vmem>>, %arg15: memref<3x8x18xf32, #tpu.memory_space<vmem>>, %arg16: memref<55x25xf32, #tpu.memory_space<vmem>>, %arg17: memref<3x8x8xf32, #tpu.memory_space<vmem>>, %arg18: memref<3x25x40xf32, #tpu.memory_space<vmem>>, %arg19: memref<40x8xf32, #tpu.memory_space<vmem>>, %arg20: memref<8x40xf32, #tpu.memory_space<vmem>>, %arg21: memref<1x8xf32, #tpu.memory_space<vmem>>, %arg22: memref<1x8xf32, #tpu.memory_space<vmem>>, %arg23: memref<3x8x8xf32, #tpu.memory_space<vmem>>, %arg24: memref<3x40x80xf32, #tpu.memory_space<vmem>>, %arg25: memref<80x16xf32, #tpu.memory_space<vmem>>, %arg26: memref<16x80xf32, #tpu.memory_space<vmem>>, %arg27: memref<1x16xf32, #tpu.memory_space<vmem>>, %arg28: memref<1x16xf32, #tpu.memory_space<vmem>>, %arg29: memref<3x8x8xf32, #tpu.memory_space<vmem>>, %arg30: memref<3x80x160xf32, #tpu.memory_space<vmem>>, %arg31: memref<1x160xf32, #tpu.memory_space<vmem>>, %arg32: memref<2x32xf32, #tpu.memory_space<vmem>>) attributes {dimension_semantics = [], scalar_prefetch = 0 : i64, scratch_operands = 0 : i64, tpu.core_type = #tpu.core_type<tc>} {
    %c0 = arith.constant 0 : index
    %c0_0 = arith.constant 0 : index
    %0 = vector.load %arg0[%c0, %c0_0] : memref<144x56xf32, #tpu.memory_space<vmem>>, vector<144x56xf32>
    %c0_1 = arith.constant 0 : index
    %c0_2 = arith.constant 0 : index
    %c0_3 = arith.constant 0 : index
    %1 = vector.load %arg1[%c0_1, %c0_2, %c0_3] : memref<5x70x144xf32, #tpu.memory_space<vmem>>, vector<1x70x144xf32>
    %2 = vector.shape_cast %1 : vector<1x70x144xf32> to vector<70x144xf32>
    %cst = arith.constant dense<0.000000e+00> : vector<70x56xf32>
    %3 = tpu.matmul %2, %0, %cst {dimension_numbers = #tpu.dot_dimension_numbers<[1], [0], [0], [1], [0, 0, 1, 1], [], []>} : vector<70x144xf32>, vector<144x56xf32>, vector<70x56xf32> -> vector<70x56xf32>
    %c0_4 = arith.constant 0 : index
    %c0_5 = arith.constant 0 : index
    %c0_6 = arith.constant 0 : index
    %4 = vector.load %arg2[%c0_4, %c0_5, %c0_6] : memref<5x56x162xf32, #tpu.memory_space<vmem>>, vector<1x56x162xf32>
    %5 = vector.shape_cast %4 : vector<1x56x162xf32> to vector<56x162xf32>
    %cst_7 = arith.constant dense<0.000000e+00> : vector<70x162xf32>
    %6 = tpu.matmul %3, %5, %cst_7 {dimension_numbers = #tpu.dot_dimension_numbers<[1], [0], [0], [1], [0, 0, 1, 1], [], []>} : vector<70x56xf32>, vector<56x162xf32>, vector<70x162xf32> -> vector<70x162xf32>
    %c1 = arith.constant 1 : index
    %c0_8 = arith.constant 0 : index
    %c0_9 = arith.constant 0 : index
    %7 = vector.load %arg1[%c1, %c0_8, %c0_9] : memref<5x70x144xf32, #tpu.memory_space<vmem>>, vector<1x70x144xf32>
    %8 = vector.shape_cast %7 : vector<1x70x144xf32> to vector<70x144xf32>
    %cst_10 = arith.constant dense<0.000000e+00> : vector<70x56xf32>
    %9 = tpu.matmul %8, %0, %cst_10 {dimension_numbers = #tpu.dot_dimension_numbers<[1], [0], [0], [1], [0, 0, 1, 1], [], []>} : vector<70x144xf32>, vector<144x56xf32>, vector<70x56xf32> -> vector<70x56xf32>
    %c1_11 = arith.constant 1 : index
    %c0_12 = arith.constant 0 : index
    %c0_13 = arith.constant 0 : index
    %10 = vector.load %arg2[%c1_11, %c0_12, %c0_13] : memref<5x56x162xf32, #tpu.memory_space<vmem>>, vector<1x56x162xf32>
    %11 = vector.shape_cast %10 : vector<1x56x162xf32> to vector<56x162xf32>
    %cst_14 = arith.constant dense<0.000000e+00> : vector<70x162xf32>
    %12 = tpu.matmul %9, %11, %cst_14 {dimension_numbers = #tpu.dot_dimension_numbers<[1], [0], [0], [1], [0, 0, 1, 1], [], []>} : vector<70x56xf32>, vector<56x162xf32>, vector<70x162xf32> -> vector<70x162xf32>
    %13 = arith.addf %6, %12 : vector<70x162xf32>
    %c2 = arith.constant 2 : index
    %c0_15 = arith.constant 0 : index
    %c0_16 = arith.constant 0 : index
    %14 = vector.load %arg1[%c2, %c0_15, %c0_16] : memref<5x70x144xf32, #tpu.memory_space<vmem>>, vector<1x70x144xf32>
    %15 = vector.shape_cast %14 : vector<1x70x144xf32> to vector<70x144xf32>
    %cst_17 = arith.constant dense<0.000000e+00> : vector<70x56xf32>
    %16 = tpu.matmul %15, %0, %cst_17 {dimension_numbers = #tpu.dot_dimension_numbers<[1], [0], [0], [1], [0, 0, 1, 1], [], []>} : vector<70x144xf32>, vector<144x56xf32>, vector<70x56xf32> -> vector<70x56xf32>
    %c2_18 = arith.constant 2 : index
    %c0_19 = arith.constant 0 : index
    %c0_20 = arith.constant 0 : index
    %17 = vector.load %arg2[%c2_18, %c0_19, %c0_20] : memref<5x56x162xf32, #tpu.memory_space<vmem>>, vector<1x56x162xf32>
    %18 = vector.shape_cast %17 : vector<1x56x162xf32> to vector<56x162xf32>
    %cst_21 = arith.constant dense<0.000000e+00> : vector<70x162xf32>
    %19 = tpu.matmul %16, %18, %cst_21 {dimension_numbers = #tpu.dot_dimension_numbers<[1], [0], [0], [1], [0, 0, 1, 1], [], []>} : vector<70x56xf32>, vector<56x162xf32>, vector<70x162xf32> -> vector<70x162xf32>
    %20 = arith.addf %13, %19 : vector<70x162xf32>
    %c3 = arith.constant 3 : index
    %c0_22 = arith.constant 0 : index
    %c0_23 = arith.constant 0 : index
    %21 = vector.load %arg1[%c3, %c0_22, %c0_23] : memref<5x70x144xf32, #tpu.memory_space<vmem>>, vector<1x70x144xf32>
    %22 = vector.shape_cast %21 : vector<1x70x144xf32> to vector<70x144xf32>
    %cst_24 = arith.constant dense<0.000000e+00> : vector<70x56xf32>
    %23 = tpu.matmul %22, %0, %cst_24 {dimension_numbers = #tpu.dot_dimension_numbers<[1], [0], [0], [1], [0, 0, 1, 1], [], []>} : vector<70x144xf32>, vector<144x56xf32>, vector<70x56xf32> -> vector<70x56xf32>
    %c3_25 = arith.constant 3 : index
    %c0_26 = arith.constant 0 : index
    %c0_27 = arith.constant 0 : index
    %24 = vector.load %arg2[%c3_25, %c0_26, %c0_27] : memref<5x56x162xf32, #tpu.memory_space<vmem>>, vector<1x56x162xf32>
    %25 = vector.shape_cast %24 : vector<1x56x162xf32> to vector<56x162xf32>
    %cst_28 = arith.constant dense<0.000000e+00> : vector<70x162xf32>
    %26 = tpu.matmul %23, %25, %cst_28 {dimension_numbers = #tpu.dot_dimension_numbers<[1], [0], [0], [1], [0, 0, 1, 1], [], []>} : vector<70x56xf32>, vector<56x162xf32>, vector<70x162xf32> -> vector<70x162xf32>
    %27 = arith.addf %20, %26 : vector<70x162xf32>
    %c4 = arith.constant 4 : index
    %c0_29 = arith.constant 0 : index
    %c0_30 = arith.constant 0 : index
    %28 = vector.load %arg1[%c4, %c0_29, %c0_30] : memref<5x70x144xf32, #tpu.memory_space<vmem>>, vector<1x70x144xf32>
    %29 = vector.shape_cast %28 : vector<1x70x144xf32> to vector<70x144xf32>
    %cst_31 = arith.constant dense<0.000000e+00> : vector<70x56xf32>
    %30 = tpu.matmul %29, %0, %cst_31 {dimension_numbers = #tpu.dot_dimension_numbers<[1], [0], [0], [1], [0, 0, 1, 1], [], []>} : vector<70x144xf32>, vector<144x56xf32>, vector<70x56xf32> -> vector<70x56xf32>
    %c4_32 = arith.constant 4 : index
    %c0_33 = arith.constant 0 : index
    %c0_34 = arith.constant 0 : index
    %31 = vector.load %arg2[%c4_32, %c0_33, %c0_34] : memref<5x56x162xf32, #tpu.memory_space<vmem>>, vector<1x56x162xf32>
    %32 = vector.shape_cast %31 : vector<1x56x162xf32> to vector<56x162xf32>
    %cst_35 = arith.constant dense<0.000000e+00> : vector<70x162xf32>
    %33 = tpu.matmul %30, %32, %cst_35 {dimension_numbers = #tpu.dot_dimension_numbers<[1], [0], [0], [1], [0, 0, 1, 1], [], []>} : vector<70x56xf32>, vector<56x162xf32>, vector<70x162xf32> -> vector<70x162xf32>
    %34 = arith.addf %27, %33 : vector<70x162xf32>
    %c0_36 = arith.constant 0 : index
    %c0_37 = arith.constant 0 : index
    %35 = vector.load %arg4[%c0_36, %c0_37] : memref<162x75xf32, #tpu.memory_space<vmem>>, vector<162x75xf32>
    %cst_38 = arith.constant dense<0.000000e+00> : vector<70x75xf32>
    %36 = tpu.matmul %34, %35, %cst_38 {dimension_numbers = #tpu.dot_dimension_numbers<[1], [0], [0], [1], [0, 0, 1, 1], [], []>} : vector<70x162xf32>, vector<162x75xf32>, vector<70x75xf32> -> vector<70x75xf32>
    %c0_39 = arith.constant 0 : index
    %c0_40 = arith.constant 0 : index
    %c0_41 = arith.constant 0 : index
    %37 = vector.load %arg3[%c0_39, %c0_40, %c0_41] : memref<3x34x70xf32, #tpu.memory_space<vmem>>, vector<1x34x70xf32>
    %38 = vector.shape_cast %37 : vector<1x34x70xf32> to vector<34x70xf32>
    %cst_42 = arith.constant dense<0.000000e+00> : vector<34x75xf32>
    %39 = tpu.matmul %38, %36, %cst_42 {dimension_numbers = #tpu.dot_dimension_numbers<[1], [0], [0], [1], [0, 0, 1, 1], [], []>} : vector<34x70xf32>, vector<70x75xf32>, vector<34x75xf32> -> vector<34x75xf32>
    %c1_43 = arith.constant 1 : index
    %c0_44 = arith.constant 0 : index
    %c0_45 = arith.constant 0 : index
    %40 = vector.load %arg3[%c1_43, %c0_44, %c0_45] : memref<3x34x70xf32, #tpu.memory_space<vmem>>, vector<1x34x70xf32>
    %41 = vector.shape_cast %40 : vector<1x34x70xf32> to vector<34x70xf32>
    %cst_46 = arith.constant dense<0.000000e+00> : vector<34x75xf32>
    %42 = tpu.matmul %41, %36, %cst_46 {dimension_numbers = #tpu.dot_dimension_numbers<[1], [0], [0], [1], [0, 0, 1, 1], [], []>} : vector<34x70xf32>, vector<70x75xf32>, vector<34x75xf32> -> vector<34x75xf32>
    %43 = arith.addf %39, %42 : vector<34x75xf32>
    %c2_47 = arith.constant 2 : index
    %c0_48 = arith.constant 0 : index
    %c0_49 = arith.constant 0 : index
    %44 = vector.load %arg3[%c2_47, %c0_48, %c0_49] : memref<3x34x70xf32, #tpu.memory_space<vmem>>, vector<1x34x70xf32>
    %45 = vector.shape_cast %44 : vector<1x34x70xf32> to vector<34x70xf32>
    %cst_50 = arith.constant dense<0.000000e+00> : vector<34x75xf32>
    %46 = tpu.matmul %45, %36, %cst_50 {dimension_numbers = #tpu.dot_dimension_numbers<[1], [0], [0], [1], [0, 0, 1, 1], [], []>} : vector<34x70xf32>, vector<70x75xf32>, vector<34x75xf32> -> vector<34x75xf32>
    %47 = arith.addf %43, %46 : vector<34x75xf32>
    %c0_51 = arith.constant 0 : index
    %c0_52 = arith.constant 0 : index
    %48 = vector.load %arg5[%c0_51, %c0_52] : memref<75x3xf32, #tpu.memory_space<vmem>>, vector<75x3xf32>
    %cst_53 = arith.constant dense<0.000000e+00> : vector<75xf32>
    %49 = vector.multi_reduction <add>, %47, %cst_53 [0] : vector<34x75xf32> to vector<75xf32>
    %50 = vector.shape_cast %49 : vector<75xf32> to vector<1x75xf32>
    %51 = arith.mulf %47, %47 : vector<34x75xf32>
    %cst_54 = arith.constant dense<0.000000e+00> : vector<75xf32>
    %52 = vector.multi_reduction <add>, %51, %cst_54 [0] : vector<34x75xf32> to vector<75xf32>
    %53 = vector.shape_cast %52 : vector<75xf32> to vector<1x75xf32>
    %cst_55 = arith.constant dense<0.000000e+00> : vector<1x3xf32>
    %54 = tpu.matmul %50, %48, %cst_55 {dimension_numbers = #tpu.dot_dimension_numbers<[1], [0], [0], [1], [0, 0, 1, 1], [], []>} : vector<1x75xf32>, vector<75x3xf32>, vector<1x3xf32> -> vector<1x3xf32>
    %cst_56 = arith.constant 0.00117647054 : f32
    %55 = vector.broadcast %cst_56 : f32 to vector<1x3xf32>
    %56 = arith.mulf %54, %55 : vector<1x3xf32>
    %cst_57 = arith.constant dense<0.000000e+00> : vector<1x3xf32>
    %57 = tpu.matmul %53, %48, %cst_57 {dimension_numbers = #tpu.dot_dimension_numbers<[1], [0], [0], [1], [0, 0, 1, 1], [], []>} : vector<1x75xf32>, vector<75x3xf32>, vector<1x3xf32> -> vector<1x3xf32>
    %cst_58 = arith.constant 0.00117647054 : f32
    %58 = vector.broadcast %cst_58 : f32 to vector<1x3xf32>
    %59 = arith.mulf %57, %58 : vector<1x3xf32>
    %60 = arith.mulf %56, %56 : vector<1x3xf32>
    %61 = arith.subf %59, %60 : vector<1x3xf32>
    %c0_59 = arith.constant 0 : index
    %c0_60 = arith.constant 0 : index
    %62 = vector.load %arg7[%c0_59, %c0_60] : memref<1x3xf32, #tpu.memory_space<vmem>>, vector<1x3xf32>
    %cst_61 = arith.constant 9.99999974E-6 : f32
    %63 = vector.broadcast %cst_61 : f32 to vector<1x3xf32>
    %64 = arith.addf %61, %63 : vector<1x3xf32>
    %65 = math.rsqrt %64 : vector<1x3xf32>
    %66 = arith.mulf %62, %65 : vector<1x3xf32>
    %c0_62 = arith.constant 0 : index
    %c0_63 = arith.constant 0 : index
    %67 = vector.load %arg8[%c0_62, %c0_63] : memref<1x3xf32, #tpu.memory_space<vmem>>, vector<1x3xf32>
    %68 = arith.mulf %56, %66 : vector<1x3xf32>
    %69 = arith.subf %67, %68 : vector<1x3xf32>
    %c0_64 = arith.constant 0 : index
    %c0_65 = arith.constant 0 : index
    %70 = vector.load %arg6[%c0_64, %c0_65] : memref<3x75xf32, #tpu.memory_space<vmem>>, vector<3x75xf32>
    %cst_66 = arith.constant dense<0.000000e+00> : vector<1x75xf32>
    %71 = tpu.matmul %66, %70, %cst_66 {dimension_numbers = #tpu.dot_dimension_numbers<[1], [0], [0], [1], [0, 0, 1, 1], [], []>} : vector<1x3xf32>, vector<3x75xf32>, vector<1x75xf32> -> vector<1x75xf32>
    %c0_67 = arith.constant 0 : index
    %c0_68 = arith.constant 0 : index
    %72 = vector.load %arg6[%c0_67, %c0_68] : memref<3x75xf32, #tpu.memory_space<vmem>>, vector<3x75xf32>
    %cst_69 = arith.constant dense<0.000000e+00> : vector<1x75xf32>
    %73 = tpu.matmul %69, %72, %cst_69 {dimension_numbers = #tpu.dot_dimension_numbers<[1], [0], [0], [1], [0, 0, 1, 1], [], []>} : vector<1x3xf32>, vector<3x75xf32>, vector<1x75xf32> -> vector<1x75xf32>
    %74 = vector.broadcast %71 : vector<1x75xf32> to vector<34x75xf32>
    %75 = arith.mulf %47, %74 : vector<34x75xf32>
    %76 = vector.broadcast %73 : vector<1x75xf32> to vector<34x75xf32>
    %77 = arith.addf %75, %76 : vector<34x75xf32>
    %cst_70 = arith.constant 0.000000e+00 : f32
    %78 = vector.broadcast %cst_70 : f32 to vector<34x75xf32>
    %79 = arith.cmpf oge, %77, %78 : vector<34x75xf32>
    %cst_71 = arith.constant 2.000000e-01 : f32
    %80 = vector.broadcast %cst_71 : f32 to vector<34x75xf32>
    %81 = arith.mulf %77, %80 : vector<34x75xf32>
    %82 = arith.select %79, %77, %81 : vector<34x75xi1>, vector<34x75xf32>
    %c0_72 = arith.constant 0 : index
    %c0_73 = arith.constant 0 : index
    %c0_74 = arith.constant 0 : index
    %83 = vector.load %arg9[%c0_72, %c0_73, %c0_74] : memref<3x18x34xf32, #tpu.memory_space<vmem>>, vector<1x18x34xf32>
    %84 = vector.shape_cast %83 : vector<1x18x34xf32> to vector<18x34xf32>
    %cst_75 = arith.constant dense<0.000000e+00> : vector<18x75xf32>
    %85 = tpu.matmul %84, %82, %cst_75 {dimension_numbers = #tpu.dot_dimension_numbers<[1], [0], [0], [1], [0, 0, 1, 1], [], []>} : vector<18x34xf32>, vector<34x75xf32>, vector<18x75xf32> -> vector<18x75xf32>
    %c0_76 = arith.constant 0 : index
    %c0_77 = arith.constant 0 : index
    %c0_78 = arith.constant 0 : index
    %86 = vector.load %arg10[%c0_76, %c0_77, %c0_78] : memref<3x75x55xf32, #tpu.memory_space<vmem>>, vector<1x75x55xf32>
    %87 = vector.shape_cast %86 : vector<1x75x55xf32> to vector<75x55xf32>
    %cst_79 = arith.constant dense<0.000000e+00> : vector<18x55xf32>
    %88 = tpu.matmul %85, %87, %cst_79 {dimension_numbers = #tpu.dot_dimension_numbers<[1], [0], [0], [1], [0, 0, 1, 1], [], []>} : vector<18x75xf32>, vector<75x55xf32>, vector<18x55xf32> -> vector<18x55xf32>
    %c1_80 = arith.constant 1 : index
    %c0_81 = arith.constant 0 : index
    %c0_82 = arith.constant 0 : index
    %89 = vector.load %arg9[%c1_80, %c0_81, %c0_82] : memref<3x18x34xf32, #tpu.memory_space<vmem>>, vector<1x18x34xf32>
    %90 = vector.shape_cast %89 : vector<1x18x34xf32> to vector<18x34xf32>
    %cst_83 = arith.constant dense<0.000000e+00> : vector<18x75xf32>
    %91 = tpu.matmul %90, %82, %cst_83 {dimension_numbers = #tpu.dot_dimension_numbers<[1], [0], [0], [1], [0, 0, 1, 1], [], []>} : vector<18x34xf32>, vector<34x75xf32>, vector<18x75xf32> -> vector<18x75xf32>
    %c1_84 = arith.constant 1 : index
    %c0_85 = arith.constant 0 : index
    %c0_86 = arith.constant 0 : index
    %92 = vector.load %arg10[%c1_84, %c0_85, %c0_86] : memref<3x75x55xf32, #tpu.memory_space<vmem>>, vector<1x75x55xf32>
    %93 = vector.shape_cast %92 : vector<1x75x55xf32> to vector<75x55xf32>
    %cst_87 = arith.constant dense<0.000000e+00> : vector<18x55xf32>
    %94 = tpu.matmul %91, %93, %cst_87 {dimension_numbers = #tpu.dot_dimension_numbers<[1], [0], [0], [1], [0, 0, 1, 1], [], []>} : vector<18x75xf32>, vector<75x55xf32>, vector<18x55xf32> -> vector<18x55xf32>
    %95 = arith.addf %88, %94 : vector<18x55xf32>
    %c2_88 = arith.constant 2 : index
    %c0_89 = arith.constant 0 : index
    %c0_90 = arith.constant 0 : index
    %96 = vector.load %arg9[%c2_88, %c0_89, %c0_90] : memref<3x18x34xf32, #tpu.memory_space<vmem>>, vector<1x18x34xf32>
    %97 = vector.shape_cast %96 : vector<1x18x34xf32> to vector<18x34xf32>
    %cst_91 = arith.constant dense<0.000000e+00> : vector<18x75xf32>
    %98 = tpu.matmul %97, %82, %cst_91 {dimension_numbers = #tpu.dot_dimension_numbers<[1], [0], [0], [1], [0, 0, 1, 1], [], []>} : vector<18x34xf32>, vector<34x75xf32>, vector<18x75xf32> -> vector<18x75xf32>
    %c2_92 = arith.constant 2 : index
    %c0_93 = arith.constant 0 : index
    %c0_94 = arith.constant 0 : index
    %99 = vector.load %arg10[%c2_92, %c0_93, %c0_94] : memref<3x75x55xf32, #tpu.memory_space<vmem>>, vector<1x75x55xf32>
    %100 = vector.shape_cast %99 : vector<1x75x55xf32> to vector<75x55xf32>
    %cst_95 = arith.constant dense<0.000000e+00> : vector<18x55xf32>
    %101 = tpu.matmul %98, %100, %cst_95 {dimension_numbers = #tpu.dot_dimension_numbers<[1], [0], [0], [1], [0, 0, 1, 1], [], []>} : vector<18x75xf32>, vector<75x55xf32>, vector<18x55xf32> -> vector<18x55xf32>
    %102 = arith.addf %95, %101 : vector<18x55xf32>
    %c0_96 = arith.constant 0 : index
    %c0_97 = arith.constant 0 : index
    %103 = vector.load %arg11[%c0_96, %c0_97] : memref<55x5xf32, #tpu.memory_space<vmem>>, vector<55x5xf32>
    %cst_98 = arith.constant dense<0.000000e+00> : vector<55xf32>
    %104 = vector.multi_reduction <add>, %102, %cst_98 [0] : vector<18x55xf32> to vector<55xf32>
    %105 = vector.shape_cast %104 : vector<55xf32> to vector<1x55xf32>
    %106 = arith.mulf %102, %102 : vector<18x55xf32>
    %cst_99 = arith.constant dense<0.000000e+00> : vector<55xf32>
    %107 = vector.multi_reduction <add>, %106, %cst_99 [0] : vector<18x55xf32> to vector<55xf32>
    %108 = vector.shape_cast %107 : vector<55xf32> to vector<1x55xf32>
    %cst_100 = arith.constant dense<0.000000e+00> : vector<1x5xf32>
    %109 = tpu.matmul %105, %103, %cst_100 {dimension_numbers = #tpu.dot_dimension_numbers<[1], [0], [0], [1], [0, 0, 1, 1], [], []>} : vector<1x55xf32>, vector<55x5xf32>, vector<1x5xf32> -> vector<1x5xf32>
    %cst_101 = arith.constant 0.00505050505 : f32
    %110 = vector.broadcast %cst_101 : f32 to vector<1x5xf32>
    %111 = arith.mulf %109, %110 : vector<1x5xf32>
    %cst_102 = arith.constant dense<0.000000e+00> : vector<1x5xf32>
    %112 = tpu.matmul %108, %103, %cst_102 {dimension_numbers = #tpu.dot_dimension_numbers<[1], [0], [0], [1], [0, 0, 1, 1], [], []>} : vector<1x55xf32>, vector<55x5xf32>, vector<1x5xf32> -> vector<1x5xf32>
    %cst_103 = arith.constant 0.00505050505 : f32
    %113 = vector.broadcast %cst_103 : f32 to vector<1x5xf32>
    %114 = arith.mulf %112, %113 : vector<1x5xf32>
    %115 = arith.mulf %111, %111 : vector<1x5xf32>
    %116 = arith.subf %114, %115 : vector<1x5xf32>
    %c0_104 = arith.constant 0 : index
    %c0_105 = arith.constant 0 : index
    %117 = vector.load %arg13[%c0_104, %c0_105] : memref<1x5xf32, #tpu.memory_space<vmem>>, vector<1x5xf32>
    %cst_106 = arith.constant 9.99999974E-6 : f32
    %118 = vector.broadcast %cst_106 : f32 to vector<1x5xf32>
    %119 = arith.addf %116, %118 : vector<1x5xf32>
    %120 = math.rsqrt %119 : vector<1x5xf32>
    %121 = arith.mulf %117, %120 : vector<1x5xf32>
    %c0_107 = arith.constant 0 : index
    %c0_108 = arith.constant 0 : index
    %122 = vector.load %arg14[%c0_107, %c0_108] : memref<1x5xf32, #tpu.memory_space<vmem>>, vector<1x5xf32>
    %123 = arith.mulf %111, %121 : vector<1x5xf32>
    %124 = arith.subf %122, %123 : vector<1x5xf32>
    %c0_109 = arith.constant 0 : index
    %c0_110 = arith.constant 0 : index
    %125 = vector.load %arg12[%c0_109, %c0_110] : memref<5x55xf32, #tpu.memory_space<vmem>>, vector<5x55xf32>
    %cst_111 = arith.constant dense<0.000000e+00> : vector<1x55xf32>
    %126 = tpu.matmul %121, %125, %cst_111 {dimension_numbers = #tpu.dot_dimension_numbers<[1], [0], [0], [1], [0, 0, 1, 1], [], []>} : vector<1x5xf32>, vector<5x55xf32>, vector<1x55xf32> -> vector<1x55xf32>
    %c0_112 = arith.constant 0 : index
    %c0_113 = arith.constant 0 : index
    %127 = vector.load %arg12[%c0_112, %c0_113] : memref<5x55xf32, #tpu.memory_space<vmem>>, vector<5x55xf32>
    %cst_114 = arith.constant dense<0.000000e+00> : vector<1x55xf32>
    %128 = tpu.matmul %124, %127, %cst_114 {dimension_numbers = #tpu.dot_dimension_numbers<[1], [0], [0], [1], [0, 0, 1, 1], [], []>} : vector<1x5xf32>, vector<5x55xf32>, vector<1x55xf32> -> vector<1x55xf32>
    %129 = vector.broadcast %126 : vector<1x55xf32> to vector<18x55xf32>
    %130 = arith.mulf %102, %129 : vector<18x55xf32>
    %131 = vector.broadcast %128 : vector<1x55xf32> to vector<18x55xf32>
    %132 = arith.addf %130, %131 : vector<18x55xf32>
    %c0_115 = arith.constant 0 : index
    %c0_116 = arith.constant 0 : index
    %133 = vector.load %arg16[%c0_115, %c0_116] : memref<55x25xf32, #tpu.memory_space<vmem>>, vector<55x25xf32>
    %cst_117 = arith.constant dense<0.000000e+00> : vector<18x25xf32>
    %134 = tpu.matmul %132, %133, %cst_117 {dimension_numbers = #tpu.dot_dimension_numbers<[1], [0], [0], [1], [0, 0, 1, 1], [], []>} : vector<18x55xf32>, vector<55x25xf32>, vector<18x25xf32> -> vector<18x25xf32>
    %c0_118 = arith.constant 0 : index
    %c0_119 = arith.constant 0 : index
    %c0_120 = arith.constant 0 : index
    %135 = vector.load %arg15[%c0_118, %c0_119, %c0_120] : memref<3x8x18xf32, #tpu.memory_space<vmem>>, vector<1x8x18xf32>
    %136 = vector.shape_cast %135 : vector<1x8x18xf32> to vector<8x18xf32>
    %cst_121 = arith.constant dense<0.000000e+00> : vector<8x25xf32>
    %137 = tpu.matmul %136, %134, %cst_121 {dimension_numbers = #tpu.dot_dimension_numbers<[1], [0], [0], [1], [0, 0, 1, 1], [], []>} : vector<8x18xf32>, vector<18x25xf32>, vector<8x25xf32> -> vector<8x25xf32>
    %c1_122 = arith.constant 1 : index
    %c0_123 = arith.constant 0 : index
    %c0_124 = arith.constant 0 : index
    %138 = vector.load %arg15[%c1_122, %c0_123, %c0_124] : memref<3x8x18xf32, #tpu.memory_space<vmem>>, vector<1x8x18xf32>
    %139 = vector.shape_cast %138 : vector<1x8x18xf32> to vector<8x18xf32>
    %cst_125 = arith.constant dense<0.000000e+00> : vector<8x25xf32>
    %140 = tpu.matmul %139, %134, %cst_125 {dimension_numbers = #tpu.dot_dimension_numbers<[1], [0], [0], [1], [0, 0, 1, 1], [], []>} : vector<8x18xf32>, vector<18x25xf32>, vector<8x25xf32> -> vector<8x25xf32>
    %141 = arith.addf %137, %140 : vector<8x25xf32>
    %c2_126 = arith.constant 2 : index
    %c0_127 = arith.constant 0 : index
    %c0_128 = arith.constant 0 : index
    %142 = vector.load %arg15[%c2_126, %c0_127, %c0_128] : memref<3x8x18xf32, #tpu.memory_space<vmem>>, vector<1x8x18xf32>
    %143 = vector.shape_cast %142 : vector<1x8x18xf32> to vector<8x18xf32>
    %cst_129 = arith.constant dense<0.000000e+00> : vector<8x25xf32>
    %144 = tpu.matmul %143, %134, %cst_129 {dimension_numbers = #tpu.dot_dimension_numbers<[1], [0], [0], [1], [0, 0, 1, 1], [], []>} : vector<8x18xf32>, vector<18x25xf32>, vector<8x25xf32> -> vector<8x25xf32>
    %145 = arith.addf %141, %144 : vector<8x25xf32>
    %cst_130 = arith.constant 0.000000e+00 : f32
    %146 = vector.broadcast %cst_130 : f32 to vector<8x25xf32>
    %147 = arith.cmpf oge, %145, %146 : vector<8x25xf32>
    %cst_131 = arith.constant 2.000000e-01 : f32
    %148 = vector.broadcast %cst_131 : f32 to vector<8x25xf32>
    %149 = arith.mulf %145, %148 : vector<8x25xf32>
    %150 = arith.select %147, %145, %149 : vector<8x25xi1>, vector<8x25xf32>
    %c0_132 = arith.constant 0 : index
    %c0_133 = arith.constant 0 : index
    %c0_134 = arith.constant 0 : index
    %151 = vector.load %arg17[%c0_132, %c0_133, %c0_134] : memref<3x8x8xf32, #tpu.memory_space<vmem>>, vector<1x8x8xf32>
    %152 = vector.shape_cast %151 : vector<1x8x8xf32> to vector<8x8xf32>
    %cst_135 = arith.constant dense<0.000000e+00> : vector<8x25xf32>
    %153 = tpu.matmul %152, %150, %cst_135 {dimension_numbers = #tpu.dot_dimension_numbers<[1], [0], [0], [1], [0, 0, 1, 1], [], []>} : vector<8x8xf32>, vector<8x25xf32>, vector<8x25xf32> -> vector<8x25xf32>
    %c0_136 = arith.constant 0 : index
    %c0_137 = arith.constant 0 : index
    %c0_138 = arith.constant 0 : index
    %154 = vector.load %arg18[%c0_136, %c0_137, %c0_138] : memref<3x25x40xf32, #tpu.memory_space<vmem>>, vector<1x25x40xf32>
    %155 = vector.shape_cast %154 : vector<1x25x40xf32> to vector<25x40xf32>
    %cst_139 = arith.constant dense<0.000000e+00> : vector<8x40xf32>
    %156 = tpu.matmul %153, %155, %cst_139 {dimension_numbers = #tpu.dot_dimension_numbers<[1], [0], [0], [1], [0, 0, 1, 1], [], []>} : vector<8x25xf32>, vector<25x40xf32>, vector<8x40xf32> -> vector<8x40xf32>
    %c1_140 = arith.constant 1 : index
    %c0_141 = arith.constant 0 : index
    %c0_142 = arith.constant 0 : index
    %157 = vector.load %arg17[%c1_140, %c0_141, %c0_142] : memref<3x8x8xf32, #tpu.memory_space<vmem>>, vector<1x8x8xf32>
    %158 = vector.shape_cast %157 : vector<1x8x8xf32> to vector<8x8xf32>
    %cst_143 = arith.constant dense<0.000000e+00> : vector<8x25xf32>
    %159 = tpu.matmul %158, %150, %cst_143 {dimension_numbers = #tpu.dot_dimension_numbers<[1], [0], [0], [1], [0, 0, 1, 1], [], []>} : vector<8x8xf32>, vector<8x25xf32>, vector<8x25xf32> -> vector<8x25xf32>
    %c1_144 = arith.constant 1 : index
    %c0_145 = arith.constant 0 : index
    %c0_146 = arith.constant 0 : index
    %160 = vector.load %arg18[%c1_144, %c0_145, %c0_146] : memref<3x25x40xf32, #tpu.memory_space<vmem>>, vector<1x25x40xf32>
    %161 = vector.shape_cast %160 : vector<1x25x40xf32> to vector<25x40xf32>
    %cst_147 = arith.constant dense<0.000000e+00> : vector<8x40xf32>
    %162 = tpu.matmul %159, %161, %cst_147 {dimension_numbers = #tpu.dot_dimension_numbers<[1], [0], [0], [1], [0, 0, 1, 1], [], []>} : vector<8x25xf32>, vector<25x40xf32>, vector<8x40xf32> -> vector<8x40xf32>
    %163 = arith.addf %156, %162 : vector<8x40xf32>
    %c2_148 = arith.constant 2 : index
    %c0_149 = arith.constant 0 : index
    %c0_150 = arith.constant 0 : index
    %164 = vector.load %arg17[%c2_148, %c0_149, %c0_150] : memref<3x8x8xf32, #tpu.memory_space<vmem>>, vector<1x8x8xf32>
    %165 = vector.shape_cast %164 : vector<1x8x8xf32> to vector<8x8xf32>
    %cst_151 = arith.constant dense<0.000000e+00> : vector<8x25xf32>
    %166 = tpu.matmul %165, %150, %cst_151 {dimension_numbers = #tpu.dot_dimension_numbers<[1], [0], [0], [1], [0, 0, 1, 1], [], []>} : vector<8x8xf32>, vector<8x25xf32>, vector<8x25xf32> -> vector<8x25xf32>
    %c2_152 = arith.constant 2 : index
    %c0_153 = arith.constant 0 : index
    %c0_154 = arith.constant 0 : index
    %167 = vector.load %arg18[%c2_152, %c0_153, %c0_154] : memref<3x25x40xf32, #tpu.memory_space<vmem>>, vector<1x25x40xf32>
    %168 = vector.shape_cast %167 : vector<1x25x40xf32> to vector<25x40xf32>
    %cst_155 = arith.constant dense<0.000000e+00> : vector<8x40xf32>
    %169 = tpu.matmul %166, %168, %cst_155 {dimension_numbers = #tpu.dot_dimension_numbers<[1], [0], [0], [1], [0, 0, 1, 1], [], []>} : vector<8x25xf32>, vector<25x40xf32>, vector<8x40xf32> -> vector<8x40xf32>
    %170 = arith.addf %163, %169 : vector<8x40xf32>
    %c0_156 = arith.constant 0 : index
    %c0_157 = arith.constant 0 : index
    %171 = vector.load %arg19[%c0_156, %c0_157] : memref<40x8xf32, #tpu.memory_space<vmem>>, vector<40x8xf32>
    %cst_158 = arith.constant dense<0.000000e+00> : vector<40xf32>
    %172 = vector.multi_reduction <add>, %170, %cst_158 [0] : vector<8x40xf32> to vector<40xf32>
    %173 = vector.shape_cast %172 : vector<40xf32> to vector<1x40xf32>
    %174 = arith.mulf %170, %170 : vector<8x40xf32>
    %cst_159 = arith.constant dense<0.000000e+00> : vector<40xf32>
    %175 = vector.multi_reduction <add>, %174, %cst_159 [0] : vector<8x40xf32> to vector<40xf32>
    %176 = vector.shape_cast %175 : vector<40xf32> to vector<1x40xf32>
    %cst_160 = arith.constant dense<0.000000e+00> : vector<1x8xf32>
    %177 = tpu.matmul %173, %171, %cst_160 {dimension_numbers = #tpu.dot_dimension_numbers<[1], [0], [0], [1], [0, 0, 1, 1], [], []>} : vector<1x40xf32>, vector<40x8xf32>, vector<1x8xf32> -> vector<1x8xf32>
    %cst_161 = arith.constant 2.500000e-02 : f32
    %178 = vector.broadcast %cst_161 : f32 to vector<1x8xf32>
    %179 = arith.mulf %177, %178 : vector<1x8xf32>
    %cst_162 = arith.constant dense<0.000000e+00> : vector<1x8xf32>
    %180 = tpu.matmul %176, %171, %cst_162 {dimension_numbers = #tpu.dot_dimension_numbers<[1], [0], [0], [1], [0, 0, 1, 1], [], []>} : vector<1x40xf32>, vector<40x8xf32>, vector<1x8xf32> -> vector<1x8xf32>
    %cst_163 = arith.constant 2.500000e-02 : f32
    %181 = vector.broadcast %cst_163 : f32 to vector<1x8xf32>
    %182 = arith.mulf %180, %181 : vector<1x8xf32>
    %183 = arith.mulf %179, %179 : vector<1x8xf32>
    %184 = arith.subf %182, %183 : vector<1x8xf32>
    %c0_164 = arith.constant 0 : index
    %c0_165 = arith.constant 0 : index
    %185 = vector.load %arg21[%c0_164, %c0_165] : memref<1x8xf32, #tpu.memory_space<vmem>>, vector<1x8xf32>
    %cst_166 = arith.constant 9.99999974E-6 : f32
    %186 = vector.broadcast %cst_166 : f32 to vector<1x8xf32>
    %187 = arith.addf %184, %186 : vector<1x8xf32>
    %188 = math.rsqrt %187 : vector<1x8xf32>
    %189 = arith.mulf %185, %188 : vector<1x8xf32>
    %c0_167 = arith.constant 0 : index
    %c0_168 = arith.constant 0 : index
    %190 = vector.load %arg22[%c0_167, %c0_168] : memref<1x8xf32, #tpu.memory_space<vmem>>, vector<1x8xf32>
    %191 = arith.mulf %179, %189 : vector<1x8xf32>
    %192 = arith.subf %190, %191 : vector<1x8xf32>
    %c0_169 = arith.constant 0 : index
    %c0_170 = arith.constant 0 : index
    %193 = vector.load %arg20[%c0_169, %c0_170] : memref<8x40xf32, #tpu.memory_space<vmem>>, vector<8x40xf32>
    %cst_171 = arith.constant dense<0.000000e+00> : vector<1x40xf32>
    %194 = tpu.matmul %189, %193, %cst_171 {dimension_numbers = #tpu.dot_dimension_numbers<[1], [0], [0], [1], [0, 0, 1, 1], [], []>} : vector<1x8xf32>, vector<8x40xf32>, vector<1x40xf32> -> vector<1x40xf32>
    %c0_172 = arith.constant 0 : index
    %c0_173 = arith.constant 0 : index
    %195 = vector.load %arg20[%c0_172, %c0_173] : memref<8x40xf32, #tpu.memory_space<vmem>>, vector<8x40xf32>
    %cst_174 = arith.constant dense<0.000000e+00> : vector<1x40xf32>
    %196 = tpu.matmul %192, %195, %cst_174 {dimension_numbers = #tpu.dot_dimension_numbers<[1], [0], [0], [1], [0, 0, 1, 1], [], []>} : vector<1x8xf32>, vector<8x40xf32>, vector<1x40xf32> -> vector<1x40xf32>
    %197 = vector.broadcast %194 : vector<1x40xf32> to vector<8x40xf32>
    %198 = arith.mulf %170, %197 : vector<8x40xf32>
    %199 = vector.broadcast %196 : vector<1x40xf32> to vector<8x40xf32>
    %200 = arith.addf %198, %199 : vector<8x40xf32>
    %c0_175 = arith.constant 0 : index
    %c0_176 = arith.constant 0 : index
    %c0_177 = arith.constant 0 : index
    %201 = vector.load %arg23[%c0_175, %c0_176, %c0_177] : memref<3x8x8xf32, #tpu.memory_space<vmem>>, vector<1x8x8xf32>
    %202 = vector.shape_cast %201 : vector<1x8x8xf32> to vector<8x8xf32>
    %cst_178 = arith.constant dense<0.000000e+00> : vector<8x40xf32>
    %203 = tpu.matmul %202, %200, %cst_178 {dimension_numbers = #tpu.dot_dimension_numbers<[1], [0], [0], [1], [0, 0, 1, 1], [], []>} : vector<8x8xf32>, vector<8x40xf32>, vector<8x40xf32> -> vector<8x40xf32>
    %c0_179 = arith.constant 0 : index
    %c0_180 = arith.constant 0 : index
    %c0_181 = arith.constant 0 : index
    %204 = vector.load %arg24[%c0_179, %c0_180, %c0_181] : memref<3x40x80xf32, #tpu.memory_space<vmem>>, vector<1x40x80xf32>
    %205 = vector.shape_cast %204 : vector<1x40x80xf32> to vector<40x80xf32>
    %cst_182 = arith.constant dense<0.000000e+00> : vector<8x80xf32>
    %206 = tpu.matmul %203, %205, %cst_182 {dimension_numbers = #tpu.dot_dimension_numbers<[1], [0], [0], [1], [0, 0, 1, 1], [], []>} : vector<8x40xf32>, vector<40x80xf32>, vector<8x80xf32> -> vector<8x80xf32>
    %c1_183 = arith.constant 1 : index
    %c0_184 = arith.constant 0 : index
    %c0_185 = arith.constant 0 : index
    %207 = vector.load %arg23[%c1_183, %c0_184, %c0_185] : memref<3x8x8xf32, #tpu.memory_space<vmem>>, vector<1x8x8xf32>
    %208 = vector.shape_cast %207 : vector<1x8x8xf32> to vector<8x8xf32>
    %cst_186 = arith.constant dense<0.000000e+00> : vector<8x40xf32>
    %209 = tpu.matmul %208, %200, %cst_186 {dimension_numbers = #tpu.dot_dimension_numbers<[1], [0], [0], [1], [0, 0, 1, 1], [], []>} : vector<8x8xf32>, vector<8x40xf32>, vector<8x40xf32> -> vector<8x40xf32>
    %c1_187 = arith.constant 1 : index
    %c0_188 = arith.constant 0 : index
    %c0_189 = arith.constant 0 : index
    %210 = vector.load %arg24[%c1_187, %c0_188, %c0_189] : memref<3x40x80xf32, #tpu.memory_space<vmem>>, vector<1x40x80xf32>
    %211 = vector.shape_cast %210 : vector<1x40x80xf32> to vector<40x80xf32>
    %cst_190 = arith.constant dense<0.000000e+00> : vector<8x80xf32>
    %212 = tpu.matmul %209, %211, %cst_190 {dimension_numbers = #tpu.dot_dimension_numbers<[1], [0], [0], [1], [0, 0, 1, 1], [], []>} : vector<8x40xf32>, vector<40x80xf32>, vector<8x80xf32> -> vector<8x80xf32>
    %213 = arith.addf %206, %212 : vector<8x80xf32>
    %c2_191 = arith.constant 2 : index
    %c0_192 = arith.constant 0 : index
    %c0_193 = arith.constant 0 : index
    %214 = vector.load %arg23[%c2_191, %c0_192, %c0_193] : memref<3x8x8xf32, #tpu.memory_space<vmem>>, vector<1x8x8xf32>
    %215 = vector.shape_cast %214 : vector<1x8x8xf32> to vector<8x8xf32>
    %cst_194 = arith.constant dense<0.000000e+00> : vector<8x40xf32>
    %216 = tpu.matmul %215, %200, %cst_194 {dimension_numbers = #tpu.dot_dimension_numbers<[1], [0], [0], [1], [0, 0, 1, 1], [], []>} : vector<8x8xf32>, vector<8x40xf32>, vector<8x40xf32> -> vector<8x40xf32>
    %c2_195 = arith.constant 2 : index
    %c0_196 = arith.constant 0 : index
    %c0_197 = arith.constant 0 : index
    %217 = vector.load %arg24[%c2_195, %c0_196, %c0_197] : memref<3x40x80xf32, #tpu.memory_space<vmem>>, vector<1x40x80xf32>
    %218 = vector.shape_cast %217 : vector<1x40x80xf32> to vector<40x80xf32>
    %cst_198 = arith.constant dense<0.000000e+00> : vector<8x80xf32>
    %219 = tpu.matmul %216, %218, %cst_198 {dimension_numbers = #tpu.dot_dimension_numbers<[1], [0], [0], [1], [0, 0, 1, 1], [], []>} : vector<8x40xf32>, vector<40x80xf32>, vector<8x80xf32> -> vector<8x80xf32>
    %220 = arith.addf %213, %219 : vector<8x80xf32>
    %c0_199 = arith.constant 0 : index
    %c0_200 = arith.constant 0 : index
    %221 = vector.load %arg25[%c0_199, %c0_200] : memref<80x16xf32, #tpu.memory_space<vmem>>, vector<80x16xf32>
    %cst_201 = arith.constant dense<0.000000e+00> : vector<80xf32>
    %222 = vector.multi_reduction <add>, %220, %cst_201 [0] : vector<8x80xf32> to vector<80xf32>
    %223 = vector.shape_cast %222 : vector<80xf32> to vector<1x80xf32>
    %224 = arith.mulf %220, %220 : vector<8x80xf32>
    %cst_202 = arith.constant dense<0.000000e+00> : vector<80xf32>
    %225 = vector.multi_reduction <add>, %224, %cst_202 [0] : vector<8x80xf32> to vector<80xf32>
    %226 = vector.shape_cast %225 : vector<80xf32> to vector<1x80xf32>
    %cst_203 = arith.constant dense<0.000000e+00> : vector<1x16xf32>
    %227 = tpu.matmul %223, %221, %cst_203 {dimension_numbers = #tpu.dot_dimension_numbers<[1], [0], [0], [1], [0, 0, 1, 1], [], []>} : vector<1x80xf32>, vector<80x16xf32>, vector<1x16xf32> -> vector<1x16xf32>
    %cst_204 = arith.constant 2.500000e-02 : f32
    %228 = vector.broadcast %cst_204 : f32 to vector<1x16xf32>
    %229 = arith.mulf %227, %228 : vector<1x16xf32>
    %cst_205 = arith.constant dense<0.000000e+00> : vector<1x16xf32>
    %230 = tpu.matmul %226, %221, %cst_205 {dimension_numbers = #tpu.dot_dimension_numbers<[1], [0], [0], [1], [0, 0, 1, 1], [], []>} : vector<1x80xf32>, vector<80x16xf32>, vector<1x16xf32> -> vector<1x16xf32>
    %cst_206 = arith.constant 2.500000e-02 : f32
    %231 = vector.broadcast %cst_206 : f32 to vector<1x16xf32>
    %232 = arith.mulf %230, %231 : vector<1x16xf32>
    %233 = arith.mulf %229, %229 : vector<1x16xf32>
    %234 = arith.subf %232, %233 : vector<1x16xf32>
    %c0_207 = arith.constant 0 : index
    %c0_208 = arith.constant 0 : index
    %235 = vector.load %arg27[%c0_207, %c0_208] : memref<1x16xf32, #tpu.memory_space<vmem>>, vector<1x16xf32>
    %cst_209 = arith.constant 9.99999974E-6 : f32
    %236 = vector.broadcast %cst_209 : f32 to vector<1x16xf32>
    %237 = arith.addf %234, %236 : vector<1x16xf32>
    %238 = math.rsqrt %237 : vector<1x16xf32>
    %239 = arith.mulf %235, %238 : vector<1x16xf32>
    %c0_210 = arith.constant 0 : index
    %c0_211 = arith.constant 0 : index
    %240 = vector.load %arg28[%c0_210, %c0_211] : memref<1x16xf32, #tpu.memory_space<vmem>>, vector<1x16xf32>
    %241 = arith.mulf %229, %239 : vector<1x16xf32>
    %242 = arith.subf %240, %241 : vector<1x16xf32>
    %c0_212 = arith.constant 0 : index
    %c0_213 = arith.constant 0 : index
    %243 = vector.load %arg26[%c0_212, %c0_213] : memref<16x80xf32, #tpu.memory_space<vmem>>, vector<16x80xf32>
    %cst_214 = arith.constant dense<0.000000e+00> : vector<1x80xf32>
    %244 = tpu.matmul %239, %243, %cst_214 {dimension_numbers = #tpu.dot_dimension_numbers<[1], [0], [0], [1], [0, 0, 1, 1], [], []>} : vector<1x16xf32>, vector<16x80xf32>, vector<1x80xf32> -> vector<1x80xf32>
    %c0_215 = arith.constant 0 : index
    %c0_216 = arith.constant 0 : index
    %245 = vector.load %arg26[%c0_215, %c0_216] : memref<16x80xf32, #tpu.memory_space<vmem>>, vector<16x80xf32>
    %cst_217 = arith.constant dense<0.000000e+00> : vector<1x80xf32>
    %246 = tpu.matmul %242, %245, %cst_217 {dimension_numbers = #tpu.dot_dimension_numbers<[1], [0], [0], [1], [0, 0, 1, 1], [], []>} : vector<1x16xf32>, vector<16x80xf32>, vector<1x80xf32> -> vector<1x80xf32>
    %247 = vector.broadcast %244 : vector<1x80xf32> to vector<8x80xf32>
    %248 = arith.mulf %220, %247 : vector<8x80xf32>
    %249 = vector.broadcast %246 : vector<1x80xf32> to vector<8x80xf32>
    %250 = arith.addf %248, %249 : vector<8x80xf32>
    %c0_218 = arith.constant 0 : index
    %c0_219 = arith.constant 0 : index
    %c0_220 = arith.constant 0 : index
    %251 = vector.load %arg29[%c0_218, %c0_219, %c0_220] : memref<3x8x8xf32, #tpu.memory_space<vmem>>, vector<1x8x8xf32>
    %252 = vector.shape_cast %251 : vector<1x8x8xf32> to vector<8x8xf32>
    %cst_221 = arith.constant dense<0.000000e+00> : vector<8x80xf32>
    %253 = tpu.matmul %252, %250, %cst_221 {dimension_numbers = #tpu.dot_dimension_numbers<[1], [0], [0], [1], [0, 0, 1, 1], [], []>} : vector<8x8xf32>, vector<8x80xf32>, vector<8x80xf32> -> vector<8x80xf32>
    %c0_222 = arith.constant 0 : index
    %c0_223 = arith.constant 0 : index
    %c0_224 = arith.constant 0 : index
    %254 = vector.load %arg30[%c0_222, %c0_223, %c0_224] : memref<3x80x160xf32, #tpu.memory_space<vmem>>, vector<1x80x160xf32>
    %255 = vector.shape_cast %254 : vector<1x80x160xf32> to vector<80x160xf32>
    %cst_225 = arith.constant dense<0.000000e+00> : vector<8x160xf32>
    %256 = tpu.matmul %253, %255, %cst_225 {dimension_numbers = #tpu.dot_dimension_numbers<[1], [0], [0], [1], [0, 0, 1, 1], [], []>} : vector<8x80xf32>, vector<80x160xf32>, vector<8x160xf32> -> vector<8x160xf32>
    %c1_226 = arith.constant 1 : index
    %c0_227 = arith.constant 0 : index
    %c0_228 = arith.constant 0 : index
    %257 = vector.load %arg29[%c1_226, %c0_227, %c0_228] : memref<3x8x8xf32, #tpu.memory_space<vmem>>, vector<1x8x8xf32>
    %258 = vector.shape_cast %257 : vector<1x8x8xf32> to vector<8x8xf32>
    %cst_229 = arith.constant dense<0.000000e+00> : vector<8x80xf32>
    %259 = tpu.matmul %258, %250, %cst_229 {dimension_numbers = #tpu.dot_dimension_numbers<[1], [0], [0], [1], [0, 0, 1, 1], [], []>} : vector<8x8xf32>, vector<8x80xf32>, vector<8x80xf32> -> vector<8x80xf32>
    %c1_230 = arith.constant 1 : index
    %c0_231 = arith.constant 0 : index
    %c0_232 = arith.constant 0 : index
    %260 = vector.load %arg30[%c1_230, %c0_231, %c0_232] : memref<3x80x160xf32, #tpu.memory_space<vmem>>, vector<1x80x160xf32>
    %261 = vector.shape_cast %260 : vector<1x80x160xf32> to vector<80x160xf32>
    %cst_233 = arith.constant dense<0.000000e+00> : vector<8x160xf32>
    %262 = tpu.matmul %259, %261, %cst_233 {dimension_numbers = #tpu.dot_dimension_numbers<[1], [0], [0], [1], [0, 0, 1, 1], [], []>} : vector<8x80xf32>, vector<80x160xf32>, vector<8x160xf32> -> vector<8x160xf32>
    %263 = arith.addf %256, %262 : vector<8x160xf32>
    %c2_234 = arith.constant 2 : index
    %c0_235 = arith.constant 0 : index
    %c0_236 = arith.constant 0 : index
    %264 = vector.load %arg29[%c2_234, %c0_235, %c0_236] : memref<3x8x8xf32, #tpu.memory_space<vmem>>, vector<1x8x8xf32>
    %265 = vector.shape_cast %264 : vector<1x8x8xf32> to vector<8x8xf32>
    %cst_237 = arith.constant dense<0.000000e+00> : vector<8x80xf32>
    %266 = tpu.matmul %265, %250, %cst_237 {dimension_numbers = #tpu.dot_dimension_numbers<[1], [0], [0], [1], [0, 0, 1, 1], [], []>} : vector<8x8xf32>, vector<8x80xf32>, vector<8x80xf32> -> vector<8x80xf32>
    %c2_238 = arith.constant 2 : index
    %c0_239 = arith.constant 0 : index
    %c0_240 = arith.constant 0 : index
    %267 = vector.load %arg30[%c2_238, %c0_239, %c0_240] : memref<3x80x160xf32, #tpu.memory_space<vmem>>, vector<1x80x160xf32>
    %268 = vector.shape_cast %267 : vector<1x80x160xf32> to vector<80x160xf32>
    %cst_241 = arith.constant dense<0.000000e+00> : vector<8x160xf32>
    %269 = tpu.matmul %266, %268, %cst_241 {dimension_numbers = #tpu.dot_dimension_numbers<[1], [0], [0], [1], [0, 0, 1, 1], [], []>} : vector<8x80xf32>, vector<80x160xf32>, vector<8x160xf32> -> vector<8x160xf32>
    %270 = arith.addf %263, %269 : vector<8x160xf32>
    %c0_242 = arith.constant 0 : index
    %c0_243 = arith.constant 0 : index
    %271 = vector.load %arg31[%c0_242, %c0_243] : memref<1x160xf32, #tpu.memory_space<vmem>>, vector<1x160xf32>
    %272 = vector.broadcast %271 : vector<1x160xf32> to vector<8x160xf32>
    %273 = arith.addf %270, %272 : vector<8x160xf32>
    %274 = vector.extract_strided_slice %273 {offsets = [0, 0], sizes = [4, 160], strides = [1, 1]} : vector<8x160xf32> to vector<4x160xf32>
    %cst_244 = arith.constant dense<0xFF800000> : vector<160xf32>
    %275 = vector.multi_reduction <maximumf>, %274, %cst_244 [0] : vector<4x160xf32> to vector<160xf32>
    %276 = vector.shape_cast %275 : vector<160xf32> to vector<1x160xf32>
    %277 = vector.extract_strided_slice %276 {offsets = [0, 0], sizes = [1, 32], strides = [1, 1]} : vector<1x160xf32> to vector<1x32xf32>
    %278 = vector.extract_strided_slice %276 {offsets = [0, 32], sizes = [1, 32], strides = [1, 1]} : vector<1x160xf32> to vector<1x32xf32>
    %279 = arith.maximumf %277, %278 : vector<1x32xf32>
    %280 = vector.extract_strided_slice %276 {offsets = [0, 64], sizes = [1, 32], strides = [1, 1]} : vector<1x160xf32> to vector<1x32xf32>
    %281 = arith.maximumf %279, %280 : vector<1x32xf32>
    %282 = vector.extract_strided_slice %276 {offsets = [0, 96], sizes = [1, 32], strides = [1, 1]} : vector<1x160xf32> to vector<1x32xf32>
    %283 = arith.maximumf %281, %282 : vector<1x32xf32>
    %284 = vector.extract_strided_slice %276 {offsets = [0, 128], sizes = [1, 32], strides = [1, 1]} : vector<1x160xf32> to vector<1x32xf32>
    %285 = arith.maximumf %283, %284 : vector<1x32xf32>
    %cst_245 = arith.constant 0.000000e+00 : f32
    %286 = vector.broadcast %cst_245 : f32 to vector<1x32xf32>
    %287 = arith.cmpf oge, %285, %286 : vector<1x32xf32>
    %cst_246 = arith.constant 2.000000e-01 : f32
    %288 = vector.broadcast %cst_246 : f32 to vector<1x32xf32>
    %289 = arith.mulf %285, %288 : vector<1x32xf32>
    %290 = arith.select %287, %285, %289 : vector<1x32xi1>, vector<1x32xf32>
    %c0_247 = arith.constant 0 : index
    %c0_248 = arith.constant 0 : index
    %291 = vector.load %arg32[%c0_247, %c0_248] : memref<2x32xf32, #tpu.memory_space<vmem>>, vector<1x32xf32>
    tpu.vector_store %arg32[%c0_247, %c0_248], %290 {strides = array<i32>} : memref<2x32xf32, #tpu.memory_space<vmem>>, vector<1x32xf32>,
    %292 = vector.extract_strided_slice %273 {offsets = [4, 0], sizes = [4, 160], strides = [1, 1]} : vector<8x160xf32> to vector<4x160xf32>
    %cst_249 = arith.constant dense<0xFF800000> : vector<160xf32>
    %293 = vector.multi_reduction <maximumf>, %292, %cst_249 [0] : vector<4x160xf32> to vector<160xf32>
    %294 = vector.shape_cast %293 : vector<160xf32> to vector<1x160xf32>
    %295 = vector.extract_strided_slice %294 {offsets = [0, 0], sizes = [1, 32], strides = [1, 1]} : vector<1x160xf32> to vector<1x32xf32>
    %296 = vector.extract_strided_slice %294 {offsets = [0, 32], sizes = [1, 32], strides = [1, 1]} : vector<1x160xf32> to vector<1x32xf32>
    %297 = arith.maximumf %295, %296 : vector<1x32xf32>
    %298 = vector.extract_strided_slice %294 {offsets = [0, 64], sizes = [1, 32], strides = [1, 1]} : vector<1x160xf32> to vector<1x32xf32>
    %299 = arith.maximumf %297, %298 : vector<1x32xf32>
    %300 = vector.extract_strided_slice %294 {offsets = [0, 96], sizes = [1, 32], strides = [1, 1]} : vector<1x160xf32> to vector<1x32xf32>
    %301 = arith.maximumf %299, %300 : vector<1x32xf32>
    %302 = vector.extract_strided_slice %294 {offsets = [0, 128], sizes = [1, 32], strides = [1, 1]} : vector<1x160xf32> to vector<1x32xf32>
    %303 = arith.maximumf %301, %302 : vector<1x32xf32>
    %cst_250 = arith.constant 0.000000e+00 : f32
    %304 = vector.broadcast %cst_250 : f32 to vector<1x32xf32>
    %305 = arith.cmpf oge, %303, %304 : vector<1x32xf32>
    %cst_251 = arith.constant 2.000000e-01 : f32
    %306 = vector.broadcast %cst_251 : f32 to vector<1x32xf32>
    %307 = arith.mulf %303, %306 : vector<1x32xf32>
    %308 = arith.select %305, %303, %307 : vector<1x32xi1>, vector<1x32xf32>
    %c1_252 = arith.constant 1 : index
    %c0_253 = arith.constant 0 : index
    %309 = vector.load %arg32[%c1_252, %c0_253] : memref<2x32xf32, #tpu.memory_space<vmem>>, vector<1x32xf32>
    tpu.vector_store %arg32[%c1_252, %c0_253], %308 {strides = array<i32>} : memref<2x32xf32, #tpu.memory_space<vmem>>, vector<1x32xf32>,
    return
  }
}

</mosaic_0001>

<bundles_post_ra>
// kernel: forward.1
= control target key start
LH: loop header
LB: loop body
LE: loop exit
PB: predicated region body
PF: predicated region fallthrough
CT: control target
= control target key end

     0   :  { %s8817_s6 = smov 1   ;;  %s8818_s10 = smov 2   ;;  %s10236_s0 = inlined_call_operand.smem [shape: u32[33], index: -1, kind: input, shape index: {}] }
   0x1   :  { %s8886_s5 = sld [smem:[%s10236_s0]]   ;;  %s8819_s14 = smov 3  }
   0x2   :  { %s8891_s9 = sld [smem:[%s10236_s0 + %s8817_s6]]   ;;  %s8820_s18 = smov 4  }
   0x3   :  { %s8896_s13 = sld [smem:[%s10236_s0 + %s8818_s10]]   ;;  %s8821_s22 = smov 5  }
   0x4   :  { %s8901_s17 = sld [smem:[%s10236_s0 + %s8819_s14]]   ;;  %s8822_s26 = smov 6  }
   0x5   :  { %s8906_s21 = sld [smem:[%s10236_s0 + %s8820_s18]]   ;;  %s8823_s30 = smov 7  }
   0x6   :  { %s8911_s25 = sld [smem:[%s10236_s0 + %s8821_s22]]   ;;  %s8824_s4 = smov 8  }
   0x7   :  { %10250 = sst [smem:[#allocation40_spill]] %s8886_s5  ;;  %s8825_s10 = smov 9  }
   0x8   :  { %10251 = sst [smem:[#allocation41_spill]] %s8891_s9  ;;  %s8826_s15 = smov 10  }
   0x9   :  { %10252 = sst [smem:[#allocation42_spill]] %s8896_s13  ;;  %s8827_s20 = smov 11  }
   0xa   :  { %s8916_s29 = sld [smem:[%s10236_s0 + %s8822_s26]]   ;;  %s8828_s26 = smov 12  }
   0xb   :  { %10253 = sst [smem:[#allocation43_spill]] %s8906_s21  ;;  %s8829_s1 = smov 13  }
   0xc   :  { %10254 = sst [smem:[#allocation44_spill]] %s8911_s25  ;;  %s8830_s7 = smov 14  }
   0xd   :  { %s8921_s3 = sld [smem:[%s10236_s0 + %s8823_s30]]   ;;  %s8832_s22 = smov 16  }
   0xe   :  { %s8926_s8 = sld [smem:[%s10236_s0 + %s8824_s4]]   ;;  %s8833_s28 = smov 17  }
   0xf   :  { %s8931_s14 = sld [smem:[%s10236_s0 + %s8825_s10]]  }
  0x10   :  { %s8936_s19 = sld [smem:[%s10236_s0 + %s8826_s15]]   ;;  %s8831_s15 = smov 15  }
  0x11   :  { %s8941_s24 = sld [smem:[%s10236_s0 + %s8827_s20]]  }
  0x12   :  { %s8946_s30 = sld [smem:[%s10236_s0 + %s8828_s26]]  }
  0x13   :  { %s8951_s6 = sld [smem:[%s10236_s0 + %s8829_s1]]  }
  0x14   :  { %s8956_s12 = sld [smem:[%s10236_s0 + %s8830_s7]]   ;;  %s8834_s7 = smov 18  }
  0x15   :  { %s8961_s20 = sld [smem:[%s10236_s0 + %s8831_s15]]   ;;  %s8835_s15 = smov 19  }
  0x16   :  { %10255 = sst [smem:[#allocation45_spill]] %s8936_s19 }
  0x17   :  { %10256 = sst [smem:[#allocation46_spill]] %s8941_s24 }
  0x18   :  { %s8966_s27 = sld [smem:[%s10236_s0 + %s8832_s22]]   ;;  %s8836_s22 = smov 20  }
  0x19   :  { %s8971_s4 = sld [smem:[%s10236_s0 + %s8833_s28]]   ;;  %s8837_s28 = smov 21  }
  0x1a   :  { %s8976_s24 = sld [smem:[%s10236_s0 + %s8834_s7]]   ;;  %s8838_s7 = smov 22  }
  0x1b   :  { %s8981_s19 = sld [smem:[%s10236_s0 + %s8835_s15]]   ;;  %s8839_s15 = smov 23  }
  0x1c   :  { %s8991_s25 = sld [smem:[%s10236_s0 + %s8837_s28]]   ;;  %s8841_s28 = smov 25  }
  0x1d   :  { %s8996_s21 = sld [smem:[%s10236_s0 + %s8838_s7]]   ;;  %s8842_s7 = smov 26  }
  0x1e   :  { %10257 = sst [smem:[#allocation47_spill]] %s8966_s27 }
  0x1f   :  { %s8986_s27 = sld [smem:[%s10236_s0 + %s8836_s22]]   ;;  %s8840_s22 = smov 24  }
  0x20   :  { %s9011_s13 = sld [smem:[%s10236_s0 + %s8841_s28]]   ;;  %s8845_s28 = smov 29  }
  0x21   :  { %10258 = sst [smem:[#allocation48_spill]] %s8981_s19 }
  0x22   :  { %s9001_s19 = sld [smem:[%s10236_s0 + %s8839_s15]]   ;;  %s8843_s15 = smov 27  }
  0x23   :  { %10260 = sst [smem:[#allocation50_spill]] %s8996_s21 }
  0x24   :  { %s9016_s9 = sld [smem:[%s10236_s0 + %s8842_s7]]   ;;  %s8846_s7 = smov 30  }
  0x25   :  { %10259 = sst [smem:[#allocation49_spill]] %s8986_s27 }
  0x26   :  { %s9006_s27 = sld [smem:[%s10236_s0 + %s8840_s22]]   ;;  %s8844_s22 = smov 28  }
  0x27   :  { %10262 = sst [smem:[#allocation52_spill]] %s9011_s13 }
  0x28   :  { %s9021_s5 = sld [smem:[%s10236_s0 + %s8843_s15]]   ;;  %s8847_s15 = smov 31  }
  0x29   :  { %s9031_s13 = sld [smem:[%s10236_s0 + %s8845_s28]]  }
  0x2a   :  { %10263 = sst [smem:[#allocation53_spill]] %s9016_s9 }
  0x2b   :  { %s9036_s9 = sld [smem:[%s10236_s0 + %s8846_s7]]  }
  0x2c   :  { %10261 = sst [smem:[#allocation51_spill]] %s9006_s27 }
  0x2d   :  { %s9026_s27 = sld [smem:[%s10236_s0 + %s8844_s22]]   ;;  %s8848_s22 = smov 32  }
  0x2e   :  { %s9041_s21 = sld [smem:[%s10236_s0 + %s8847_s15]]  }
  0x33   :  { %10264 = sst [smem:[#allocation54_spill]] %s9026_s27 }
  0x34   :  { %s9046_s27 = sld [smem:[%s10236_s0 + %s8848_s22]]  }
  0x35   :  { %70 = vsyncpa [#allocation3], 0 }
  0x36   :  { %71 = vsyncpa [#allocation6], 0 }
  0x37   :  { %72 = vsyncpa [#allocation9], 0 }
  0x38   :  { %73 = vsyncpa [#allocation12], 0 }
  0x39   :  { %74 = vsyncpa [#allocation15], 0 }
  0x3a   :  { %75 = vsyncpa [#allocation18], 0 }
  0x3b   :  { %76 = vsyncpa [#allocation21], 0 }
  0x3c   :  { %77 = vsyncpa [#allocation24], 0 }
  0x3d   :  { %78 = vsyncpa [#allocation27], 0 }
  0x3e   :  { %79 = vsyncpa [#allocation4], 0  ;;  %s8849_s28 = smov [#allocation5]   ;;  %s8850_s2 = smov [#allocation8]  }
  0x3f   :  { %s108_s1 = sshll.u32 %s8849_s28, 4  ;;  %s128_s7 = sshll.u32 %s8850_s2, 4  ;;  %s109_s1 = int_to_ptr.vmem [resolvable:$true] %s108_s1  ;;  %s129_s7 = int_to_ptr.vmem [resolvable:$true] %s128_s7 }
  0x40   :  { %s8401_s0 = scalar_lea.hbm %s8916_s29, 64 }
  0x41   :  { %p8402_p0 = scmp.ne.s32.totalorder %s8916_s29, %s8401_s0  ;;  %p8405_p1 = scmp.lt.u32.totalorder %s8401_s0, %s8916_s29 }
  0x43   :  { %p8407_p2 = pnand %p8405_p1, %p8402_p0 }
  0x45   :  { %8410 = shalt.err (!%p8407_p2)
}
  0x46   :  { %s8411_s10 = scalar_lea.vmem %s109_s1, 64  ;;  %p8416_p4 = scmp.lt.s32.totalorder %s109_s1, %s109_s1 }
  0x47   :  { %p8412_p3 = scmp.ne.s32.totalorder %s109_s1, %s8411_s10  ;;  %p8417_p5 = scmp.lt.s32.totalorder %s8411_s10, %s8411_s10 }
  0x49   :  { %p8418_p6 = por %p8417_p5, %p8416_p4 }
  0x4b   :  { %p8419_p7 = pnand %p8418_p6, %p8412_p3 }
  0x4d   :  { %8422 = shalt.err (!%p8419_p7)
}
  0x4e   :  { %111 = dma.hbm_to_vmem [thread:$0]  %s8916_s29, 64, %s109_s1, [#allocation6]  }
  0x4f   :  { %s8423_s11 = scalar_lea.hbm %s8926_s8, 16 }
  0x50   :  { %p8424_p8 = scmp.ne.s32.totalorder %s8926_s8, %s8423_s11  ;;  %p8427_p9 = scmp.lt.u32.totalorder %s8423_s11, %s8926_s8 }
  0x52   :  { %p8429_p10 = pnand %p8427_p9, %p8424_p8 }
  0x54   :  { %8432 = shalt.err (!%p8429_p10)
}
  0x55   :  { %s8433_s15 = scalar_lea.vmem %s129_s7, 16  ;;  %s8437_s16 = scalar_lea.vmem %s129_s7, 32 }
  0x56   :  { %p8434_p11 = scmp.ne.s32.totalorder %s129_s7, %s8433_s15  ;;  %p8438_p12 = scmp.lt.s32.totalorder %s129_s7, %s129_s7 }
  0x57   :  { %p8439_p13 = scmp.lt.s32.totalorder %s8437_s16, %s8433_s15 }
  0x59   :  { %p8440_p0 = por %p8439_p13, %p8438_p12 }
  0x5b   :  { %p8441_p1 = pnand %p8440_p0, %p8434_p11 }
  0x5d   :  { %8444 = shalt.err (!%p8441_p1)
}
  0x5e   :  { %131 = dma.hbm_to_vmem [thread:$0]  %s8926_s8, 16, %s129_s7, [#allocation9]  }
  0x5f   :  { %s8851_s18 = smov [#allocation11]   ;;  %s8852_s22 = smov [#allocation14]  }
  0x60   :  { %s154_s29 = sshll.u32 %s8851_s18, 4  ;;  %s174_s23 = sshll.u32 %s8852_s22, 4  ;;  %s155_s29 = int_to_ptr.vmem [resolvable:$true] %s154_s29  ;;  %s175_s23 = int_to_ptr.vmem [resolvable:$true] %s174_s23 }
  0x61   :  { %s8445_s26 = scalar_lea.hbm %s8946_s30, 128 }
  0x62   :  { %p8446_p2 = scmp.ne.s32.totalorder %s8946_s30, %s8445_s26  ;;  %p8449_p3 = scmp.lt.u32.totalorder %s8445_s26, %s8946_s30 }
  0x64   :  { %p8451_p4 = pnand %p8449_p3, %p8446_p2 }
  0x66   :  { %8454 = shalt.err (!%p8451_p4)
}
  0x67   :  { %s8455_s28 = scalar_lea.vmem %s155_s29, 128  ;;  %p8460_p6 = scmp.lt.s32.totalorder %s155_s29, %s155_s29 }
  0x68   :  { %p8456_p5 = scmp.ne.s32.totalorder %s155_s29, %s8455_s28  ;;  %p8461_p7 = scmp.lt.s32.totalorder %s8455_s28, %s8455_s28 }
  0x6a   :  { %p8462_p8 = por %p8461_p7, %p8460_p6 }
  0x6c   :  { %p8463_p9 = pnand %p8462_p8, %p8456_p5 }
  0x6e   :  { %8466 = shalt.err (!%p8463_p9)
}
  0x6f   :  { %157 = dma.hbm_to_vmem [thread:$0]  %s8946_s30, 128, %s155_s29, [#allocation12]  }
  0x70   :  { %s8467_s8 = scalar_lea.hbm %s8956_s12, 16 }
  0x71   :  { %p8468_p10 = scmp.ne.s32.totalorder %s8956_s12, %s8467_s8  ;;  %p8471_p11 = scmp.lt.u32.totalorder %s8467_s8, %s8956_s12 }
  0x73   :  { %p8473_p12 = pnand %p8471_p11, %p8468_p10 }
  0x75   :  { %8476 = shalt.err (!%p8473_p12)
}
  0x76   :  { %s8477_s1 = scalar_lea.vmem %s175_s23, 16  ;;  %s8481_s2 = scalar_lea.vmem %s175_s23, 32 }
  0x77   :  { %p8478_p13 = scmp.ne.s32.totalorder %s175_s23, %s8477_s1  ;;  %p8482_p0 = scmp.lt.s32.totalorder %s175_s23, %s175_s23 }
  0x78   :  { %p8483_p1 = scmp.lt.s32.totalorder %s8481_s2, %s8477_s1 }
  0x7a   :  { %p8484_p2 = por %p8483_p1, %p8482_p0 }
  0x7c   :  { %p8485_p3 = pnand %p8484_p2, %p8478_p13 }
  0x7e   :  { %8488 = shalt.err (!%p8485_p3)
}
  0x7f   :  { %177 = dma.hbm_to_vmem [thread:$0]  %s8956_s12, 16, %s175_s23, [#allocation15]  }
  0x80   :  { %s8853_s7 = smov [#allocation17]   ;;  %s8854_s0 = smov [#allocation20]  }
  0x81   :  { %s197_s30 = sshll.u32 %s8853_s7, 4  ;;  %s226_s10 = sshll.u32 %s8854_s0, 4  ;;  %s198_s30 = int_to_ptr.vmem [resolvable:$true] %s197_s30  ;;  %s9064_s10 = int_to_ptr.vmem [resolvable:$true] %s226_s10 }
  0x82   :  { %s8489_s11 = scalar_lea.hbm %s8971_s4, 384 }
  0x83   :  { %p8490_p4 = scmp.ne.s32.totalorder %s8971_s4, %s8489_s11  ;;  %p8493_p5 = scmp.lt.u32.totalorder %s8489_s11, %s8971_s4 }
  0x85   :  { %p8495_p6 = pnand %p8493_p5, %p8490_p4 }
  0x87   :  { %8498 = shalt.err (!%p8495_p6)
}
  0x88   :  { %s8499_s15 = scalar_lea.vmem %s198_s30, 384  ;;  %p8504_p8 = scmp.lt.s32.totalorder %s198_s30, %s198_s30 }
  0x89   :  { %p8500_p7 = scmp.ne.s32.totalorder %s198_s30, %s8499_s15  ;;  %p8505_p9 = scmp.lt.s32.totalorder %s8499_s15, %s8499_s15 }
  0x8b   :  { %p8506_p10 = por %p8505_p9, %p8504_p8 }
  0x8d   :  { %p8507_p11 = pnand %p8506_p10, %p8500_p7 }
  0x8f   :  { %8510 = shalt.err (!%p8507_p11)
}
  0x90   :  { %s8855_s12 = smov 128   ;;  %s8856_s16 = smov 8  }
  0x91   :  { %203 = dma.hbm_to_vmem [thread:$0]  %s8971_s4, 384, %s198_s30, [#allocation18], %s8855_s12, %s8855_s12, %s8856_s16  }
  0x92   :  { %s8511_s18 = scalar_lea.hbm %s8991_s25, 16 }
  0x93   :  { %p8512_p12 = scmp.ne.s32.totalorder %s8991_s25, %s8511_s18  ;;  %p8515_p13 = scmp.lt.u32.totalorder %s8511_s18, %s8991_s25 }
  0x95   :  { %p8517_p0 = pnand %p8515_p13, %p8512_p12 }
  0x97   :  { %8520 = shalt.err (!%p8517_p0)
}
  0x98   :  { %s8521_s29 = scalar_lea.vmem %s9064_s10, 16  ;;  %s8525_s22 = scalar_lea.vmem %s9064_s10, 32 }
  0x99   :  { %p8522_p1 = scmp.ne.s32.totalorder %s9064_s10, %s8521_s29  ;;  %p8526_p2 = scmp.lt.s32.totalorder %s9064_s10, %s9064_s10 }
  0x9a   :  { %p8527_p3 = scmp.lt.s32.totalorder %s8525_s22, %s8521_s29 }
  0x9c   :  { %p8528_p4 = por %p8527_p3, %p8526_p2 }
  0x9e   :  { %p8529_p5 = pnand %p8528_p4, %p8522_p1 }
  0xa0   :  { %8532 = shalt.err (!%p8529_p5)
}
  0xa1   :  { %229 = dma.hbm_to_vmem [thread:$0]  %s8991_s25, 16, %s9064_s10, [#allocation21]  }
  0xa2   :  { %s8857_s4 = smov [#allocation23]   ;;  %s8858_s26 = smov [#allocation26]  }
  0xa3   :  { %s245_s23 = sshll.u32 %s8857_s4, 4  ;;  %s274_s28 = sshll.u32 %s8858_s26, 4  ;;  %s246_s23 = int_to_ptr.vmem [resolvable:$true] %s245_s23  ;;  %s275_s28 = int_to_ptr.vmem [resolvable:$true] %s274_s28 }
  0xa4   :  { %s8533_s8 = scalar_lea.hbm %s9001_s19, 384 }
  0xa5   :  { %p8534_p6 = scmp.ne.s32.totalorder %s9001_s19, %s8533_s8  ;;  %p8537_p7 = scmp.lt.u32.totalorder %s8533_s8, %s9001_s19 }
  0xa7   :  { %p8539_p8 = pnand %p8537_p7, %p8534_p6 }
  0xa9   :  { %8542 = shalt.err (!%p8539_p8)
}
  0xaa   :  { %s8543_s1 = scalar_lea.vmem %s246_s23, 384  ;;  %p8548_p10 = scmp.lt.s32.totalorder %s246_s23, %s246_s23 }
  0xab   :  { %p8544_p9 = scmp.ne.s32.totalorder %s246_s23, %s8543_s1  ;;  %p8549_p11 = scmp.lt.s32.totalorder %s8543_s1, %s8543_s1 }
  0xad   :  { %p8550_p12 = por %p8549_p11, %p8548_p10 }
  0xaf   :  { %p8551_p13 = pnand %p8550_p12, %p8544_p9 }
  0xb1   :  { %8554 = shalt.err (!%p8551_p13)
}
  0xb2   :  { %251 = dma.hbm_to_vmem [thread:$0]  %s9001_s19, 384, %s246_s23, [#allocation24], %s8855_s12, %s8855_s12, %s8856_s16  }
  0xb3   :  { %s8555_s25 = scalar_lea.hbm %s9021_s5, 16 }
  0xb4   :  { %p8556_p0 = scmp.ne.s32.totalorder %s9021_s5, %s8555_s25  ;;  %p8559_p1 = scmp.lt.u32.totalorder %s8555_s25, %s9021_s5 }
  0xb6   :  { %p8561_p2 = pnand %p8559_p1, %p8556_p0 }
  0xb8   :  { %8564 = shalt.err (!%p8561_p2)
}
  0xb9   :  { %s8565_s2 = scalar_lea.vmem %s275_s28, 16  ;;  %s8569_s7 = scalar_lea.vmem %s275_s28, 32 }
  0xba   :  { %p8566_p3 = scmp.ne.s32.totalorder %s275_s28, %s8565_s2  ;;  %p8570_p4 = scmp.lt.s32.totalorder %s275_s28, %s275_s28 }
  0xbb   :  { %p8571_p5 = scmp.lt.s32.totalorder %s8569_s7, %s8565_s2 }
  0xbd   :  { %p8572_p6 = por %p8571_p5, %p8570_p4 }
  0xbf   :  { %p8573_p7 = pnand %p8572_p6, %p8566_p3 }
  0xc1   :  { %8576 = shalt.err (!%p8573_p7)
}
  0xc2   :  { %277 = dma.hbm_to_vmem [thread:$0]  %s9021_s5, 16, %s275_s28, [#allocation27]  }
  0xc3   :  { %s8859_s30 = smov [#allocation2]   ;;  %s8860_s0 = smov [#allocation7]  }
  0xc4   :  { %s91_s19 = sshll.u32 %s8859_s30, 4  ;;  %s118_s10 = sshll.u32 %s8860_s0, 4  ;;  %s92_s19 = int_to_ptr.vmem [resolvable:$true] %s91_s19  ;;  %s119_s10 = int_to_ptr.vmem [resolvable:$true] %s118_s10 }
  0xc5   :  { %s8577_s11 = scalar_lea.hbm %s8901_s17, 1920 }
  0xc6   :  { %p8578_p8 = scmp.ne.s32.totalorder %s8901_s17, %s8577_s11  ;;  %p8581_p9 = scmp.lt.u32.totalorder %s8577_s11, %s8901_s17 }
  0xc8   :  { %p8583_p10 = pnand %p8581_p9, %p8578_p8 }
  0xca   :  { %8586 = shalt.err (!%p8583_p10)
}
  0xcb   :  { %s8587_s15 = scalar_lea.vmem %s92_s19, 1920  ;;  %p8592_p12 = scmp.lt.s32.totalorder %s92_s19, %s92_s19 }
  0xcc   :  { %p8588_p11 = scmp.ne.s32.totalorder %s92_s19, %s8587_s15  ;;  %p8593_p13 = scmp.lt.s32.totalorder %s8587_s15, %s8587_s15 }
  0xce   :  { %p8594_p0 = por %p8593_p13, %p8592_p12 }
  0xd0   :  { %p8595_p1 = pnand %p8594_p0, %p8588_p11 }
  0xd2   :  { %8598 = shalt.err (!%p8595_p1)
}
  0xd3   :  { %97 = dma.hbm_to_vmem [thread:$0]  %s8901_s17, 1920, %s92_s19, [#allocation3], %s8855_s12, %s8855_s12, %s8856_s16  }
  0xd4   :  { %s8599_s5 = scalar_lea.hbm %s8921_s3, 16 }
  0xd5   :  { %p8600_p2 = scmp.ne.s32.totalorder %s8921_s3, %s8599_s5  ;;  %p8603_p3 = scmp.lt.u32.totalorder %s8599_s5, %s8921_s3 }
  0xd7   :  { %p8605_p4 = pnand %p8603_p3, %p8600_p2 }
  0xd9   :  { %8608 = shalt.err (!%p8605_p4)
}
  0xda   :  { %s8609_s18 = scalar_lea.vmem %s119_s10, 16  ;;  %s8613_s29 = scalar_lea.vmem %s119_s10, 32 }
  0xdb   :  { %p8610_p5 = scmp.ne.s32.totalorder %s119_s10, %s8609_s18  ;;  %p8614_p6 = scmp.lt.s32.totalorder %s119_s10, %s119_s10 }
  0xdc   :  { %p8615_p7 = scmp.lt.s32.totalorder %s8613_s29, %s8609_s18 }
  0xde   :  { %p8616_p8 = por %p8615_p7, %p8614_p6 }
  0xe0   :  { %p8617_p9 = pnand %p8616_p8, %p8610_p5 }
  0xe2   :  { %8620 = shalt.err (!%p8617_p9)
}
  0xe3   :  { %121 = dma.hbm_to_vmem [thread:$0]  %s8921_s3, 16, %s119_s10, [#allocation6]  }
  0xe4   :  { %s8861_s22 = smov [#allocation10]   ;;  %s8862_s4 = smov [#allocation13]  }
  0xe5   :  { %s137_s17 = sshll.u32 %s8861_s22, 4  ;;  %s164_s23 = sshll.u32 %s8862_s4, 4  ;;  %s138_s17 = int_to_ptr.vmem [resolvable:$true] %s137_s17  ;;  %s165_s23 = int_to_ptr.vmem [resolvable:$true] %s164_s23 }
  0xe6   :  { %s8621_s26 = scalar_lea.hbm %s8931_s14, 1152 }
  0xe7   :  { %p8622_p10 = scmp.ne.s32.totalorder %s8931_s14, %s8621_s26  ;;  %p8625_p11 = scmp.lt.u32.totalorder %s8621_s26, %s8931_s14 }
  0xe9   :  { %p8627_p12 = pnand %p8625_p11, %p8622_p10 }
  0xeb   :  { %8630 = shalt.err (!%p8627_p12)
}
  0xec   :  { %s8631_s28 = scalar_lea.vmem %s138_s17, 1152  ;;  %p8636_p0 = scmp.lt.s32.totalorder %s138_s17, %s138_s17 }
  0xed   :  { %p8632_p13 = scmp.ne.s32.totalorder %s138_s17, %s8631_s28  ;;  %p8637_p1 = scmp.lt.s32.totalorder %s8631_s28, %s8631_s28 }
  0xef   :  { %p8638_p2 = por %p8637_p1, %p8636_p0 }
  0xf1   :  { %p8639_p3 = pnand %p8638_p2, %p8632_p13 }
  0xf3   :  { %8642 = shalt.err (!%p8639_p3)
}
  0xf4   :  { %143 = dma.hbm_to_vmem [thread:$0]  %s8931_s14, 1152, %s138_s17, [#allocation9], %s8855_s12, %s8855_s12, %s8856_s16  }
  0xf5   :  { %s8643_s3 = scalar_lea.hbm %s8951_s6, 16 }
  0xf6   :  { %p8644_p4 = scmp.ne.s32.totalorder %s8951_s6, %s8643_s3  ;;  %p8647_p5 = scmp.lt.u32.totalorder %s8643_s3, %s8951_s6 }
  0xf8   :  { %p8649_p6 = pnand %p8647_p5, %p8644_p4 }
  0xfa   :  { %8652 = shalt.err (!%p8649_p6)
}
  0xfb   :  { %s8653_s8 = scalar_lea.vmem %s165_s23, 16  ;;  %s8657_s1 = scalar_lea.vmem %s165_s23, 32 }
  0xfc   :  { %p8654_p7 = scmp.ne.s32.totalorder %s165_s23, %s8653_s8  ;;  %p8658_p8 = scmp.lt.s32.totalorder %s165_s23, %s165_s23 }
  0xfd   :  { %p8659_p9 = scmp.lt.s32.totalorder %s8657_s1, %s8653_s8 }
  0xff   :  { %p8660_p10 = por %p8659_p9, %p8658_p8 }
 0x101   :  { %p8661_p11 = pnand %p8660_p10, %p8654_p7 }
 0x103   :  { %8664 = shalt.err (!%p8661_p11)
}
 0x104   :  { %167 = dma.hbm_to_vmem [thread:$0]  %s8951_s6, 16, %s165_s23, [#allocation12]  }
 0x105   :  { %s8863_s25 = smov [#allocation16]   ;;  %s8864_s2 = smov [#allocation19]  }
 0x106   :  { %s183_s14 = sshll.u32 %s8863_s25, 4  ;;  %s209_s7 = sshll.u32 %s8864_s2, 4  ;;  %s184_s14 = int_to_ptr.vmem [resolvable:$true] %s183_s14  ;;  %s9116_s7 = int_to_ptr.vmem [resolvable:$true] %s209_s7 }
 0x107   :  { %s8665_s30 = scalar_lea.hbm %s8961_s20, 384 }
 0x108   :  { %p8666_p12 = scmp.ne.s32.totalorder %s8961_s20, %s8665_s30  ;;  %p8669_p13 = scmp.lt.u32.totalorder %s8665_s30, %s8961_s20 }
 0x10a   :  { %p8671_p0 = pnand %p8669_p13, %p8666_p12 }
 0x10c   :  { %8674 = shalt.err (!%p8671_p0)
}
 0x10d   :  { %s8675_s19 = scalar_lea.vmem %s184_s14, 384  ;;  %p8680_p2 = scmp.lt.s32.totalorder %s184_s14, %s184_s14 }
 0x10e   :  { %p8676_p1 = scmp.ne.s32.totalorder %s184_s14, %s8675_s19  ;;  %p8681_p3 = scmp.lt.s32.totalorder %s8675_s19, %s8675_s19 }
 0x110   :  { %p8682_p4 = por %p8681_p3, %p8680_p2 }
 0x112   :  { %p8683_p5 = pnand %p8682_p4, %p8676_p1 }
 0x114   :  { %8686 = shalt.err (!%p8683_p5)
}
 0x115   :  { %189 = dma.hbm_to_vmem [thread:$0]  %s8961_s20, 384, %s184_s14, [#allocation15], %s8855_s12, %s8855_s12, %s8856_s16  }
 0x116   :  { %s8687_s6 = scalar_lea.hbm %s8976_s24, 1536 }
 0x117   :  { %p8688_p6 = scmp.ne.s32.totalorder %s8976_s24, %s8687_s6  ;;  %p8691_p7 = scmp.lt.u32.totalorder %s8687_s6, %s8976_s24 }
 0x119   :  { %p8693_p8 = pnand %p8691_p7, %p8688_p6 }
 0x11b   :  { %8696 = shalt.err (!%p8693_p8)
}
 0x11c   :  { %s8697_s0 = scalar_lea.vmem %s9116_s7, 1536  ;;  %p8702_p10 = scmp.lt.s32.totalorder %s9116_s7, %s9116_s7 }
 0x11d   :  { %p8698_p9 = scmp.ne.s32.totalorder %s9116_s7, %s8697_s0  ;;  %p8703_p11 = scmp.lt.s32.totalorder %s8697_s0, %s8697_s0 }
 0x11f   :  { %p8704_p12 = por %p8703_p11, %p8702_p10 }
 0x121   :  { %p8705_p13 = pnand %p8704_p12, %p8698_p9 }
 0x123   :  { %8708 = shalt.err (!%p8705_p13)
}
 0x124   :  { %s10265_s20 = sld [smem:[#allocation50_spill]]  ;;  %s8865_s10 = smov [#allocation22]  }
 0x125   :  { %215 = dma.hbm_to_vmem [thread:$0]  %s8976_s24, 1536, %s9116_s7, [#allocation18], %s8855_s12, %s8855_s12, %s8856_s16  }
 0x126   :  { %s236_s11 = sshll.u32 %s8865_s10, 4  ;;  %s8866_s15 = smov [#allocation25]   ;;  %s237_s11 = int_to_ptr.vmem [resolvable:$true] %s236_s11 }
 0x127   :  { %s261_s5 = sshll.u32 %s8866_s15, 4  ;;  %s9137_s5 = int_to_ptr.vmem [resolvable:$true] %s261_s5 }
 0x12a   :  { %s8709_s18 = scalar_lea.hbm %s10265_s20, 16 }
 0x12b   :  { %p8710_p0 = scmp.ne.s32.totalorder %s10265_s20, %s8709_s18  ;;  %p8713_p1 = scmp.lt.u32.totalorder %s8709_s18, %s10265_s20 }
 0x12d   :  { %p8715_p2 = pnand %p8713_p1, %p8710_p0 }
 0x12f   :  { %8718 = shalt.err (!%p8715_p2)
}
 0x130   :  { %s8719_s29 = scalar_lea.vmem %s237_s11, 16  ;;  %s8723_s22 = scalar_lea.vmem %s237_s11, 32 }
 0x131   :  { %p8720_p3 = scmp.ne.s32.totalorder %s237_s11, %s8719_s29  ;;  %p8724_p4 = scmp.lt.s32.totalorder %s237_s11, %s237_s11 }
 0x132   :  { %p8725_p5 = scmp.lt.s32.totalorder %s8723_s22, %s8719_s29 }
 0x134   :  { %p8726_p6 = por %p8725_p5, %p8724_p4 }
 0x136   :  { %p8727_p7 = pnand %p8726_p6, %p8720_p3 }
 0x138   :  { %8730 = shalt.err (!%p8727_p7)
}
 0x139   :  { %s10266_s24 = sld [smem:[#allocation53_spill]] }
 0x13a   :  { %239 = dma.hbm_to_vmem [thread:$0]  %s10265_s20, 16, %s237_s11, [#allocation21]  }
 0x13f   :  { %s8731_s17 = scalar_lea.hbm %s10266_s24, 256 }
 0x140   :  { %p8732_p8 = scmp.ne.s32.totalorder %s10266_s24, %s8731_s17  ;;  %p8735_p9 = scmp.lt.u32.totalorder %s8731_s17, %s10266_s24 }
 0x142   :  { %p8737_p10 = pnand %p8735_p9, %p8732_p8 }
 0x144   :  { %8740 = shalt.err (!%p8737_p10)
}
 0x145   :  { %s8741_s4 = scalar_lea.vmem %s9137_s5, 256  ;;  %p8746_p12 = scmp.lt.s32.totalorder %s9137_s5, %s9137_s5 }
 0x146   :  { %p8742_p11 = scmp.ne.s32.totalorder %s9137_s5, %s8741_s4  ;;  %p8747_p13 = scmp.lt.s32.totalorder %s8741_s4, %s8741_s4 }
 0x148   :  { %p8748_p0 = por %p8747_p13, %p8746_p12 }
 0x14a   :  { %p8749_p1 = pnand %p8748_p0, %p8742_p11 }
 0x14c   :  { %8752 = shalt.err (!%p8749_p1)
}
 0x14d   :  { %267 = dma.hbm_to_vmem [thread:$0]  %s10266_s24, 256, %s9137_s5, [#allocation24], %s8855_s12, %s8855_s12, %s8856_s16  }
 0x14e   :  { %s8867_s23 = smov [#allocation28]   ;;  %s8753_s28 = scalar_lea.hbm %s9036_s9, 7680 }
 0x14f   :  { %s287_s26 = sshll.u32 %s8867_s23, 4  ;;  %p8754_p2 = scmp.ne.s32.totalorder %s9036_s9, %s8753_s28  ;;  %s288_s26 = int_to_ptr.vmem [resolvable:$true] %s287_s26 }
 0x150   :  { %p8757_p3 = scmp.lt.u32.totalorder %s8753_s28, %s9036_s9 }
 0x152   :  { %p8759_p4 = pnand %p8757_p3, %p8754_p2 }
 0x154   :  { %8762 = shalt.err (!%p8759_p4)
}
 0x155   :  { %s8763_s3 = scalar_lea.vmem %s288_s26, 7680  ;;  %p8768_p6 = scmp.lt.s32.totalorder %s288_s26, %s288_s26 }
 0x156   :  { %p8764_p5 = scmp.ne.s32.totalorder %s288_s26, %s8763_s3  ;;  %p8769_p7 = scmp.lt.s32.totalorder %s8763_s3, %s8763_s3 }
 0x158   :  { %p8770_p8 = por %p8769_p7, %p8768_p6 }
 0x15a   :  { %p8771_p9 = pnand %p8770_p8, %p8764_p5 }
 0x15c   :  { %8774 = shalt.err (!%p8771_p9)
}
 0x15d   :  { %s8868_s8 = smov 256   ;;  %s8869_s1 = smov 16  }
 0x15e   :  { %293 = dma.hbm_to_vmem [thread:$0]  %s9036_s9, 7680, %s288_s26, [#allocation27], %s8868_s8, %s8868_s8, %s8869_s1  }
 0x15f   :  { %8797 = dma.done.wait [#allocation3], 1920  }
 0x160   :  { %8798 = vsyncadd [#allocation3], 4294965376 }
 0x161   :  { %8799 = dma.done.wait [#allocation6], 80  }
 0x162   :  { %8800 = vsyncadd [#allocation6], 4294967216 }
 0x163   :  { %8801 = dma.done.wait [#allocation9], 1168  }
 0x164   :  { %8802 = vsyncadd [#allocation9], 4294966128 }
 0x165   :  { %8803 = dma.done.wait [#allocation12], 144  }
 0x166   :  { %8804 = vsyncadd [#allocation12], 4294967152 }
 0x167   :  { %8805 = dma.done.wait [#allocation15], 400  }
 0x168   :  { %8806 = vsyncadd [#allocation15], 4294966896 }
 0x169   :  { %8807 = dma.done.wait [#allocation18], 1920  }
 0x16a   :  { %8808 = vsyncadd [#allocation18], 4294965376 }
 0x16b   :  { %8809 = dma.done.wait [#allocation21], 32  }
 0x16c   :  { %8810 = vsyncadd [#allocation21], 4294967264 }
 0x16d   :  { %8811 = dma.done.wait [#allocation24], 640  }
 0x16e   :  { %8812 = vsyncadd [#allocation24], 4294966656 }
 0x16f   :  { %8813 = dma.done.wait [#allocation27], 7696  }
 0x170   :  { %8814 = vsyncadd [#allocation27], 4294959600  ;;  %s10267_s12 = sld [smem:[#allocation40_spill]]  ;;  %v8870_v0 = vmov 0.0|0.0   ;;  %s10268_s9 = sld [smem:[#allocation41_spill]]  ;;  %vm383_vm0 = vcmask 130048  }
 0x171   :  { %7698 = vmatprep.subr.bf16.mxu1 %v8870_v0  ;;  %7671 = vmatprep.subr.bf16.mxu0 %v8870_v0  ;;  %s10269_s16 = sld [smem:[#allocation42_spill]]  ;;  %vm706_vm1 = vcmask 457728   ;;  %s10270_s25 = sld [smem:[#allocation43_spill]]  ;;  %vm2053_vm2 = vcmask 1041408   ;;  %vm2025_vm3 = vcmask 277504   ;;  %vm8872_vm4 = vmmov 0  }
 0x172   :  { %vm2194_vm5 = vcmask 1045504   ;;  %vm2178_vm6 = vcmask 572416   ;;  %s10271_s14 = sld [smem:[#allocation44_spill]]  ;;  %vm2559_vm7 = vcmask 1042432   ;;  %vm8873_vm8 = vmmov 1   ;;  %s10274_s2 = sld [smem:[#allocation45_spill]] }
 0x173   :  { %vm9777_vm9 = vmpackc.low %vm2559_vm7, %vm8873_vm8  ;;  %vm2519_vm10 = vcmask 613376   ;;  %vm2527_vm11 = vcmask 607232   ;;  %vm2718_vm12 = vcmask 23552   ;;  %s10275_s7 = sld [smem:[#allocation46_spill]]  ;;  %s10276_s30 = sld [smem:[#allocation47_spill]] }
 0x174   :  { %s10279_s19 = sld [smem:[#allocation48_spill]]  ;;  %s10280_s6 = sld [smem:[#allocation49_spill]] }
 0x175   :  { %s10281_s0 = sld [smem:[#allocation51_spill]]  ;;  %s10282_s20 = sld [smem:[#allocation52_spill]] }
 0x176   :  { %v347_v1 = vld [vmem:[%s10267_s12] sm:$0xff]  ;;  %v348_v2 = vld [vmem:[%s10267_s12 + $0x8] sm:$0xff]  ;;  %v349_v3 = vld [vmem:[%s10267_s12 + $0x10] sm:$0xff]  ;;  %s10283_s10 = sld [smem:[#allocation54_spill]]  ;;  %s8876_s11 = smov 32  }
 0x177   :  { %v9164_v4 = vpack.c.bf16 %v348_v2, %v347_v1  ;;  %v350_v5 = vld [vmem:[%s10267_s12 + $0x18] sm:$0xff]  ;;  %v351_v7 = vld [vmem:[%s10267_s12 + $0x20] sm:$0xff]  ;;  %v352_v8 = vld [vmem:[%s10267_s12 + $0x28] sm:$0xff]  ;;  %s8877_s15 = smov [#allocation29]  }
 0x178   :  { %v9168_v6 = vpack.c.bf16 %v350_v5, %v349_v3  ;;  %v6450_v9 = vld [vmem:[%s10268_s9 + $0x98] sm:$0xff]  ;;  %v9177_v10 = vpack.c.bf16 %v352_v8, %v351_v7  ;;  %v353_v11 = vld [vmem:[%s10267_s12 + $0x30] sm:$0xff]  ;;  %v355_v14 = vld [vmem:[%s10267_s12 + $0x40] sm:$0xff]  ;;  %s6391_s5 = sshll.u32 %s8877_s15, 4  ;;  %s6392_s5 = int_to_ptr.vmem [resolvable:$true] %s6391_s5 }
 0x179   :  { %7700 = vmatpush1.bf16.msra.mxu1 %v9164_v4  ;;  %7673 = vmatpush1.bf16.msra.mxu0 %v9164_v4  ;;  %v354_v12 = vld [vmem:[%s10267_s12 + $0x38] sm:$0xff]  ;;  %v356_v15 = vld [vmem:[%s10267_s12 + $0x48] sm:$0xff]  ;;  %v357_v18 = vld [vmem:[%s10267_s12 + $0x50] sm:$0xff]  ;;  %s8775_s18 = scalar_lea.vmem %s6392_s5, 32  ;;  %p8780_p11 = scmp.lt.s32.totalorder %s6392_s5, %s6392_s5 }
 0x17a   :  { %7701 = vmatprep.subr.bf16.mxu1 %v8870_v0  ;;  %7674 = vmatprep.subr.bf16.mxu0 %v8870_v0  ;;  %v9186_v13 = vpack.c.bf16 %v354_v12, %v353_v11  ;;  %v366_v16 = vld [vmem:[%s10268_s9 + $0x8] sm:$0xff]  ;;  %v9196_v17 = vpack.c.bf16 %v356_v15, %v355_v14  ;;  %v358_v19 = vld [vmem:[%s10267_s12 + $0x58] sm:$0xff]  ;;  %v359_v21 = vld [vmem:[%s10267_s12 + $0x60] sm:$0xff]  ;;  %p8776_p10 = scmp.ne.s32.totalorder %s6392_s5, %s8775_s18  ;;  %p8781_p12 = scmp.lt.s32.totalorder %s8775_s18, %s8775_s18 }
 0x17b   :  { %6467 = vmatprep.mubr.msk.f32.mxu1 %vm383_vm0, %v6450_v9  ;;  %6440 = vmatprep.mubr.msk.f32.mxu0 %vm383_vm0, %v366_v16  ;;  %v9204_v20 = vpack.c.bf16 %v358_v19, %v357_v18  ;;  %v360_v22 = vld [vmem:[%s10267_s12 + $0x68] sm:$0xff]  ;;  %v361_v24 = vld [vmem:[%s10267_s12 + $0x70] sm:$0xff]  ;;  %v362_v25 = vld [vmem:[%s10267_s12 + $0x78] sm:$0xff] }
 0x17c   :  { %v9212_v23 = vpack.c.bf16 %v360_v22, %v359_v21  ;;  %v9220_v26 = vpack.c.bf16 %v362_v25, %v361_v24  ;;  %v363_v27 = vld [vmem:[%s10267_s12 + $0x80] sm:$0xff]  ;;  %v364_v28 = vld [vmem:[%s10267_s12 + $0x88] sm:$0xff]  ;;  %v6449_v30 = vld [vmem:[%s10268_s9 + $0x90] sm:$0xff]  ;;  %p8782_p13 = por %p8781_p12, %p8780_p11 }
 0x17d   :  { %7703 = vmatpush1.bf16.msra.mxu1 %v9168_v6  ;;  %7676 = vmatpush1.bf16.msra.mxu0 %v9168_v6  ;;  %v9228_v29 = vpack.c.bf16 %v364_v28, %v363_v27  ;;  %v6452_v31 = vld [vmem:[%s10268_s9 + $0xa8] sm:$0xff]  ;;  %v365_v32 = vld [vmem:[%s10268_s9] sm:$0xff]  ;;  %v368_v33 = vld [vmem:[%s10268_s9 + $0x18] sm:$0xff] }
 0x17e   :  { %7704 = vmatprep.subr.bf16.mxu1 %v8870_v0  ;;  %7677 = vmatprep.subr.bf16.mxu0 %v8870_v0  ;;  %v6451_v34 = vld [vmem:[%s10268_s9 + $0xa0] sm:$0xff]  ;;  %v6454_v35 = vld [vmem:[%s10268_s9 + $0xb8] sm:$0xff]  ;;  %v367_v36 = vld [vmem:[%s10268_s9 + $0x10] sm:$0xff]  ;;  %p8783_p0 = pnand %p8782_p13, %p8776_p10 }
 0x17f   :  { %v370_v37 = vld [vmem:[%s10268_s9 + $0x28] sm:$0xff]  ;;  %v6453_v38 = vld [vmem:[%s10268_s9 + $0xb0] sm:$0xff]  ;;  %v369_v40 = vld [vmem:[%s10268_s9 + $0x20] sm:$0xff] }
 0x180   :  { %v6456_v39 = vld [vmem:[%s10268_s9 + $0xc8] sm:$0xff]  ;;  %v372_v41 = vld [vmem:[%s10268_s9 + $0x38] sm:$0xff]  ;;  %v6455_v42 = vld [vmem:[%s10268_s9 + $0xc0] sm:$0xff] }
 0x181   :  { %7706 = vmatpush1.bf16.msra.mxu1 %v9177_v10  ;;  %7679 = vmatpush1.bf16.msra.mxu0 %v9177_v10  ;;  %v6458_v43 = vld [vmem:[%s10268_s9 + $0xd8] sm:$0xff]  ;;  %v371_v44 = vld [vmem:[%s10268_s9 + $0x30] sm:$0xff]  ;;  %v374_v45 = vld [vmem:[%s10268_s9 + $0x48] sm:$0xff] }
 0x182   :  { %7707 = vmatprep.subr.bf16.mxu1 %v8870_v0  ;;  %7680 = vmatprep.subr.bf16.mxu0 %v8870_v0  ;;  %v6457_v46 = vld [vmem:[%s10268_s9 + $0xd0] sm:$0xff]  ;;  %v6460_v47 = vld [vmem:[%s10268_s9 + $0xe8] sm:$0xff]  ;;  %v373_v48 = vld [vmem:[%s10268_s9 + $0x40] sm:$0xff] }
 0x183   :  { %v6477_v49 = vld [vmem:[%s10269_s16 + $0x78] sm:$0xff]  ;;  %v6479_v50 = vld [vmem:[%s10269_s16 + $0x88] sm:$0xff]  ;;  %v6476_v51 = vld [vmem:[%s10269_s16 + $0x70] sm:$0xff] }
 0x184   :  { %v7725_v52 = vpack.c.bf16 %v6479_v50, %v6477_v49  ;;  %v6478_v53 = vld [vmem:[%s10269_s16 + $0x80] sm:$0xff]  ;;  %v6481_v54 = vld [vmem:[%s10269_s16 + $0x98] sm:$0xff]  ;;  %v6483_v55 = vld [vmem:[%s10269_s16 + $0xa8] sm:$0xff] }
 0x185   :  { %7709 = vmatpush1.bf16.msra.mxu1 %v9186_v13  ;;  %7682 = vmatpush1.bf16.msra.mxu0 %v9186_v13  ;;  %v376_v56 = vld [vmem:[%s10268_s9 + $0x58] sm:$0xff]  ;;  %v7727_v57 = vpack.c.bf16 %v6478_v53, %v6476_v51  ;;  %v7729_v58 = vpack.c.bf16 %v6483_v55, %v6481_v54  ;;  %v6480_v59 = vld [vmem:[%s10269_s16 + $0x90] sm:$0xff]  ;;  %v6482_v60 = vld [vmem:[%s10269_s16 + $0xa0] sm:$0xff]  ;;  %v8871_v55 = vmov 0.0  }
 0x186   :  { %7710 = vmatprep.subr.bf16.mxu1 %v8870_v0  ;;  %7683 = vmatprep.subr.bf16.mxu0 %v8870_v0  ;;  %v6459_v61 = vld [vmem:[%s10268_s9 + $0xe0] sm:$0xff]  ;;  %v6485_v62 = vld [vmem:[%s10269_s16 + $0xb8] sm:$0xff]  ;;  %v6487_v63 = vld [vmem:[%s10269_s16 + $0xc8] sm:$0xff]  ;;  %v7731_v5 = vpack.c.bf16 %v6482_v60, %v6480_v59 }
 0x187   :  { %v6462_v1 = vld [vmem:[%s10268_s9 + $0xf8] sm:$0xff]  ;;  %v375_v2 = vld [vmem:[%s10268_s9 + $0x50] sm:$0xff]  ;;  %v378_v3 = vld [vmem:[%s10268_s9 + $0x68] sm:$0xff]  ;;  %v7733_v7 = vpack.c.bf16 %v6487_v63, %v6485_v62 }
 0x188   :  { %v6484_v8 = vld [vmem:[%s10269_s16 + $0xb0] sm:$0xff]  ;;  %v6486_v9 = vld [vmem:[%s10269_s16 + $0xc0] sm:$0xff]  ;;  %v6464_v12 = vld [vmem:[%s10268_s9 + $0x108] sm:$0xff] }
 0x189   :  { %7712 = vmatpush1.bf16.msra.mxu1 %v9196_v17  ;;  %7685 = vmatpush1.bf16.msra.mxu0 %v9196_v17  ;;  %v6461_v11 = vld [vmem:[%s10268_s9 + $0xf0] sm:$0xff]  ;;  %v377_v14 = vld [vmem:[%s10268_s9 + $0x60] sm:$0xff]  ;;  %v380_v15 = vld [vmem:[%s10268_s9 + $0x78] sm:$0xff]  ;;  %v7735_v16 = vpack.c.bf16 %v6486_v9, %v6484_v8 }
 0x18a   :  { %7713 = vmatprep.subr.bf16.mxu1 %v8870_v0  ;;  %7686 = vmatprep.subr.bf16.mxu0 %v8870_v0  ;;  %v6463_v18 = vld [vmem:[%s10268_s9 + $0x100] sm:$0xff]  ;;  %v6489_v19 = vld [vmem:[%s10269_s16 + $0xd8] sm:$0xff]  ;;  %v379_v22 = vld [vmem:[%s10268_s9 + $0x70] sm:$0xff] }
 0x18b   :  { %v6466_v21 = vld [vmem:[%s10268_s9 + $0x118] sm:$0x3f]  ;;  %v382_v24 = vld [vmem:[%s10268_s9 + $0x88] sm:$0x3f]  ;;  %v6465_v25 = vld [vmem:[%s10268_s9 + $0x110] sm:$0x3f] }
 0x18c   :  { %v381_v27 = vld [vmem:[%s10268_s9 + $0x80] sm:$0x3f]  ;;  %v6509_v28 = vld [vmem:[%s10268_s9 + $0x128] sm:$0xff]  ;;  %v6563_v51 = vld [vmem:[%s10268_s9 + $0x1d8] sm:$0xff] }
 0x18d   :  { %7715 = vmatpush1.bf16.msra.mxu1 %v9204_v20  ;;  %7688 = vmatpush1.bf16.msra.mxu0 %v9204_v20  ;;  %v6561_v49 = vld [vmem:[%s10268_s9 + $0x1c8] sm:$0xff]  ;;  %v6560_v50 = vld [vmem:[%s10268_s9 + $0x1c0] sm:$0xff]  ;;  %v6488_v54 = vld [vmem:[%s10269_s16 + $0xd0] sm:$0xff] }
 0x18e   :  { %7716 = vmatprep.subr.bf16.mxu1 %v8870_v0  ;;  %7689 = vmatprep.subr.bf16.mxu0 %v8870_v0  ;;  %v6565_v53 = vld [vmem:[%s10268_s9 + $0x1e8] sm:$0xff]  ;;  %v524_v59 = vld [vmem:[%s10269_s16 + $0x18] sm:$0xff]  ;;  %v6572_v62 = vld [vmem:[%s10268_s9 + $0x220] sm:$0xff] }
 0x18f   :  { %v6574_v63 = vld [vmem:[%s10268_s9 + $0x230] sm:$0x3f]  ;;  %v6617_v8 = vld [vmem:[%s10268_s9 + $0x288] sm:$0xff]  ;;  %v6616_v9 = vld [vmem:[%s10268_s9 + $0x280] sm:$0xff] }
 0x191   :  { %7718 = vmatpush1.bf16.msra.mxu1 %v9212_v23  ;;  %7691 = vmatpush1.bf16.msra.mxu0 %v9212_v23 }
 0x192   :  { %7719 = vmatprep.subr.bf16.mxu1 %v8870_v0  ;;  %7692 = vmatprep.subr.bf16.mxu0 %v8870_v0 }
 0x195   :  { %7721 = vmatpush1.bf16.msra.mxu1 %v9220_v26  ;;  %7694 = vmatpush1.bf16.msra.mxu0 %v9220_v26 }
 0x196   :  { %7722 = vmatprep.subr.bf16.mxu1 %v8870_v0  ;;  %7695 = vmatprep.subr.bf16.mxu0 %v8870_v0 }
 0x199   :  { %7724 = vmatpush1.bf16.msra.mxu1 %v9228_v29  ;;  %7697 = vmatpush1.bf16.msra.mxu0 %v9228_v29 }
 0x19a   :  { %7749 = vmatprep.subr.bf16.mxu1 %v8870_v0  ;;  %7726 = vmatprep.subr.bf16.mxu0 %v7725_v52  ;;  %v6562_v52 = vld [vmem:[%s10268_s9 + $0x1d0] sm:$0xff] }
 0x19c   :  { %646 = vmatmul.mubr.f32.vlgmr.msra.gmra.mrb[0].mxu1 %v6449_v30  ;;  %476 = vmatmul.mubr.f32.vlgmr.msra.gmra.mrb[0].mxu0 %v365_v32  ;;  %v6508_v30 = vld [vmem:[%s10268_s9 + $0x120] sm:$0xff]  ;;  %v6510_v32 = vld [vmem:[%s10268_s9 + $0x130] sm:$0xff] }
 0x19d   :  { %6468 = vmatprep.mubr.msk.f32.mxu1 %vm383_vm0, %v6452_v31  ;;  %7751 = vmatpush1.bf16.msra.mxu1 %v9164_v4  ;;  %v6511_v31 = vld [vmem:[%s10268_s9 + $0x138] sm:$0xff] }
 0x19e   :  { %6441 = vmatprep.mubr.msk.f32.mxu0 %vm383_vm0, %v368_v33  ;;  %7752 = vmatprep.subr.bf16.mxu1 %v8870_v0  ;;  %v6513_v33 = vld [vmem:[%s10268_s9 + $0x148] sm:$0xff] }
 0x19f   :  { %7728 = vmatpush1.bf16.msra.mxu0 %v7727_v57  ;;  %v6568_v57 = vld [vmem:[%s10268_s9 + $0x200] sm:$0xff] }
 0x1a0   :  { %651 = vmatmul.mubr.f32.gmra.mrb[2].mxu1 %v6451_v34  ;;  %481 = vmatmul.mubr.f32.gmra.mrb[2].mxu0 %v367_v36  ;;  %v6512_v34 = vld [vmem:[%s10268_s9 + $0x140] sm:$0xff]  ;;  %v6514_v36 = vld [vmem:[%s10268_s9 + $0x150] sm:$0xff] }
 0x1a1   :  { %6469 = vmatprep.mubr.msk.f32.mxu1 %vm383_vm0, %v6454_v35  ;;  %7754 = vmatpush1.bf16.msra.mxu1 %v9168_v6  ;;  %v6515_v35 = vld [vmem:[%s10268_s9 + $0x158] sm:$0xff] }
 0x1a2   :  { %6442 = vmatprep.mubr.msk.f32.mxu0 %vm383_vm0, %v370_v37  ;;  %7755 = vmatprep.subr.bf16.mxu1 %v8870_v0  ;;  %v6517_v37 = vld [vmem:[%s10268_s9 + $0x168] sm:$0xff] }
 0x1a3   :  { %7730 = vmatprep.subr.bf16.mxu0 %v7729_v58  ;;  %v6571_v58 = vld [vmem:[%s10268_s9 + $0x218] sm:$0xff] }
 0x1a4   :  { %656 = vmatmul.mubr.f32.gmra.mrb[4].mxu1 %v6453_v38  ;;  %486 = vmatmul.mubr.f32.gmra.mrb[4].mxu0 %v369_v40  ;;  %v6516_v38 = vld [vmem:[%s10268_s9 + $0x160] sm:$0xff]  ;;  %v6518_v40 = vld [vmem:[%s10268_s9 + $0x170] sm:$0xff] }
 0x1a5   :  { %6470 = vmatprep.mubr.msk.f32.mxu1 %vm383_vm0, %v6456_v39  ;;  %7757 = vmatpush1.bf16.msra.mxu1 %v9177_v10  ;;  %v6519_v39 = vld [vmem:[%s10268_s9 + $0x178] sm:$0xff] }
 0x1a6   :  { %6443 = vmatprep.mubr.msk.f32.mxu0 %vm383_vm0, %v372_v41  ;;  %7758 = vmatprep.subr.bf16.mxu1 %v8870_v0  ;;  %v6521_v41 = vld [vmem:[%s10268_s9 + $0x188] sm:$0xff] }
 0x1a7   :  { %7732 = vmatpush1.bf16.msra.mxu0 %v7731_v5  ;;  %v6615_v5 = vld [vmem:[%s10268_s9 + $0x278] sm:$0xff] }
 0x1a8   :  { %661 = vmatmul.mubr.f32.gmra.mrb[6].mxu1 %v6455_v42  ;;  %491 = vmatmul.mubr.f32.gmra.mrb[6].mxu0 %v371_v44  ;;  %v6520_v42 = vld [vmem:[%s10268_s9 + $0x180] sm:$0xff]  ;;  %v6522_v44 = vld [vmem:[%s10268_s9 + $0x190] sm:$0xff] }
 0x1a9   :  { %6471 = vmatprep.mubr.msk.f32.mxu1 %vm383_vm0, %v6458_v43  ;;  %7760 = vmatpush1.bf16.msra.mxu1 %v9186_v13  ;;  %v6523_v43 = vld [vmem:[%s10268_s9 + $0x198] sm:$0xff] }
 0x1aa   :  { %6444 = vmatprep.mubr.msk.f32.mxu0 %vm383_vm0, %v374_v45  ;;  %7761 = vmatprep.subr.bf16.mxu1 %v8870_v0  ;;  %v6525_v45 = vld [vmem:[%s10268_s9 + $0x1a8] sm:$0x3f] }
 0x1ab   :  { %7734 = vmatprep.subr.bf16.mxu0 %v7733_v7  ;;  %v6614_v7 = vld [vmem:[%s10268_s9 + $0x270] sm:$0xff] }
 0x1ac   :  { %666 = vmatmul.mubr.f32.gmra.mrb[8].mxu1 %v6457_v46  ;;  %496 = vmatmul.mubr.f32.gmra.mrb[8].mxu0 %v373_v48  ;;  %v6524_v46 = vld [vmem:[%s10268_s9 + $0x1a0] sm:$0x3f]  ;;  %v6558_v48 = vld [vmem:[%s10268_s9 + $0x1b0] sm:$0xff] }
 0x1ad   :  { %6472 = vmatprep.mubr.msk.f32.mxu1 %vm383_vm0, %v6460_v47  ;;  %7763 = vmatpush1.bf16.msra.mxu1 %v9196_v17  ;;  %v6559_v47 = vld [vmem:[%s10268_s9 + $0x1b8] sm:$0xff] }
 0x1ae   :  { %6445 = vmatprep.mubr.msk.f32.mxu0 %vm383_vm0, %v376_v56  ;;  %7764 = vmatprep.subr.bf16.mxu1 %v8870_v0  ;;  %v6569_v56 = vld [vmem:[%s10268_s9 + $0x208] sm:$0xff] }
 0x1af   :  { %7736 = vmatpush1.bf16.msra.mxu0 %v7735_v16  ;;  %v6623_v16 = vld [vmem:[%s10268_s9 + $0x2b8] sm:$0xff] }
 0x1b0   :  { %671 = vmatmul.mubr.f32.gmra.mrb[10].mxu1 %v6459_v61  ;;  %501 = vmatmul.mubr.f32.gmra.mrb[10].mxu0 %v375_v2  ;;  %v6570_v61 = vld [vmem:[%s10268_s9 + $0x210] sm:$0xff]  ;;  %v6611_v2 = vld [vmem:[%s10268_s9 + $0x258] sm:$0xff] }
 0x1b1   :  { %6473 = vmatprep.mubr.msk.f32.mxu1 %vm383_vm0, %v6462_v1  ;;  %7766 = vmatpush1.bf16.msra.mxu1 %v9204_v20  ;;  %v6609_v1 = vld [vmem:[%s10268_s9 + $0x248] sm:$0xff] }
 0x1b2   :  { %6446 = vmatprep.mubr.msk.f32.mxu0 %vm383_vm0, %v378_v3  ;;  %7767 = vmatprep.subr.bf16.mxu1 %v8870_v0  ;;  %v6613_v3 = vld [vmem:[%s10268_s9 + $0x268] sm:$0xff] }
 0x1b3   :  { %746 = vmatprep.subr.mxu0 %v6489_v19  ;;  %v6625_v19 = vld [vmem:[%s10268_s9 + $0x2c8] sm:$0x3f] }
 0x1b4   :  { %676 = vmatmul.mubr.f32.gmra.mrb[12].mxu1 %v6461_v11  ;;  %506 = vmatmul.mubr.f32.gmra.mrb[12].mxu0 %v377_v14  ;;  %v6619_v11 = vld [vmem:[%s10268_s9 + $0x298] sm:$0xff]  ;;  %v6621_v14 = vld [vmem:[%s10268_s9 + $0x2a8] sm:$0xff] }
 0x1b5   :  { %6474 = vmatprep.mubr.msk.f32.mxu1 %vm383_vm0, %v6464_v12  ;;  %7769 = vmatpush1.bf16.msra.mxu1 %v9212_v23  ;;  %v6618_v12 = vld [vmem:[%s10268_s9 + $0x290] sm:$0xff] }
 0x1b6   :  { %6447 = vmatprep.mubr.msk.f32.mxu0 %vm383_vm0, %v380_v15  ;;  %7770 = vmatprep.subr.bf16.mxu1 %v8870_v0  ;;  %v6620_v15 = vld [vmem:[%s10268_s9 + $0x2a0] sm:$0xff] }
 0x1b7   :  { %747 = vmatpush1.msra.mxu0 %v6488_v54  ;;  %v533_v54 = vld [vmem:[%s10269_s16 + $0x60] sm:$0xff] }
 0x1b8   :  { %681 = vmatmul.mubr.f32.gmra.mrb[14].mxu1 %v6463_v18  ;;  %511 = vmatmul.mubr.f32.gmra.mrb[14].mxu0 %v379_v22  ;;  %v6622_v18 = vld [vmem:[%s10268_s9 + $0x2b0] sm:$0xff]  ;;  %v521_v22 = vld [vmem:[%s10269_s16] sm:$0xff] }
 0x1b9   :  { %6475 = vmatprep.mubr.msk.f32.mxu1 %vm383_vm0, %v6466_v21  ;;  %7772 = vmatpush1.bf16.msra.mxu1 %v9220_v26  ;;  %v6624_v21 = vld [vmem:[%s10268_s9 + $0x2c0] sm:$0x3f] }
 0x1ba   :  { %6448 = vmatprep.mubr.msk.f32.mxu0 %vm383_vm0, %v382_v24  ;;  %7773 = vmatprep.subr.bf16.mxu1 %v8870_v0  ;;  %v523_v24 = vld [vmem:[%s10269_s16 + $0x10] sm:$0xff] }
 0x1bc   :  { %686 = vmatmul.mubr.f32.gmra.mrb[16].mxu1 %v6465_v25  ;;  %516 = vmatmul.mubr.f32.gmra.mrb[16].mxu0 %v381_v27  ;;  %v526_v25 = vld [vmem:[%s10269_s16 + $0x28] sm:$0xff]  ;;  %v528_v27 = vld [vmem:[%s10269_s16 + $0x38] sm:$0xff] }
 0x1bd   :  { %6526 = vmatprep.mubr.msk.f32.mxu1 %vm383_vm0, %v6509_v28  ;;  %7775 = vmatpush1.bf16.msra.mxu1 %v9228_v29  ;;  %v7739_v28 = vpack.c.bf16 %v523_v24, %v521_v22  ;;  %v6539_v22 = vld [vmem:[%s10269_s16 + $0x100] sm:$0xff]  ;;  %v6541_v24 = vld [vmem:[%s10269_s16 + $0x110] sm:$0xff] }
 0x1be   :  { %7788 = vmatprep.subr.bf16.mxu1 %v8870_v0  ;;  %798 = vmatprep.mubr.f32.mxu0 %v8871_v55 }
 0x1c0   :  { %1110 = vmatmul.mubr.f32.vlgmr.msra.gmra.mrb[18].mxu1 %v6508_v30  ;;  %v7741_v30 = vpack.c.bf16 %v528_v27, %v526_v25  ;;  %v6544_v25 = vld [vmem:[%s10269_s16 + $0x128] sm:$0xff]  ;;  %v6546_v27 = vld [vmem:[%s10269_s16 + $0x138] sm:$0xff] }
 0x1c1   :  { %7790 = vmatpush1.bf16.msra.mxu1 %v9164_v4  ;;  %6527 = vmatprep.mubr.msk.f32.mxu1 %vm383_vm0, %v6511_v31  ;;  %v525_v31 = vld [vmem:[%s10269_s16 + $0x20] sm:$0xff] }
 0x1c2   :  { %7791 = vmatprep.subr.bf16.mxu1 %v8870_v0 }
 0x1c4   :  { %1115 = vmatmul.mubr.f32.gmra.mrb[20].mxu1 %v6510_v32  ;;  %v527_v32 = vld [vmem:[%s10269_s16 + $0x30] sm:$0xff] }
 0x1c5   :  { %7793 = vmatpush1.bf16.msra.mxu1 %v9168_v6  ;;  %6528 = vmatprep.mubr.msk.f32.mxu1 %vm383_vm0, %v6513_v33 }
 0x1c6   :  { %7794 = vmatprep.subr.bf16.mxu1 %v8870_v0 }
 0x1c8   :  { %1120 = vmatmul.mubr.f32.gmra.mrb[22].mxu1 %v6512_v34  ;;  %v530_v34 = vld [vmem:[%s10269_s16 + $0x48] sm:$0xff] }
 0x1c9   :  { %7796 = vmatpush1.bf16.msra.mxu1 %v9177_v10  ;;  %6529 = vmatprep.mubr.msk.f32.mxu1 %vm383_vm0, %v6515_v35  ;;  %v532_v35 = vld [vmem:[%s10269_s16 + $0x58] sm:$0xff] }
 0x1ca   :  { %7797 = vmatprep.subr.bf16.mxu1 %v8870_v0 }
 0x1cc   :  { %1125 = vmatmul.mubr.f32.gmra.mrb[24].mxu1 %v6514_v36 }
 0x1cd   :  { %7799 = vmatpush1.bf16.msra.mxu1 %v9186_v13  ;;  %6530 = vmatprep.mubr.msk.f32.mxu1 %vm383_vm0, %v6517_v37 }
 0x1ce   :  { %7800 = vmatprep.subr.bf16.mxu1 %v8870_v0 }
 0x1d0   :  { %1130 = vmatmul.mubr.f32.gmra.mrb[26].mxu1 %v6516_v38  ;;  %v7743_v38 = vpack.c.bf16 %v527_v32, %v525_v31  ;;  %v7784_v32 = vpack.c.bf16 %v6546_v27, %v6544_v25  ;;  %v2018_v25 = vld [vmem:[%s10270_s25 + $0x70] sm:$0xff]  ;;  %v2019_v27 = vld [vmem:[%s10270_s25 + $0x78] sm:$0xff] }
 0x1d1   :  { %7802 = vmatpush1.bf16.msra.mxu1 %v9196_v17  ;;  %6531 = vmatprep.mubr.msk.f32.mxu1 %vm383_vm0, %v6519_v39 }
 0x1d2   :  { %7803 = vmatprep.subr.bf16.mxu1 %v8870_v0 }
 0x1d4   :  { %1135 = vmatmul.mubr.f32.gmra.mrb[28].mxu1 %v6518_v40  ;;  %v7745_v40 = vpack.c.bf16 %v532_v35, %v530_v34  ;;  %v6545_v34 = vld [vmem:[%s10269_s16 + $0x130] sm:$0xff] }
 0x1d5   :  { %7805 = vmatpush1.bf16.msra.mxu1 %v9204_v20  ;;  %6532 = vmatprep.mubr.msk.f32.mxu1 %vm383_vm0, %v6521_v41  ;;  %v529_v41 = vld [vmem:[%s10269_s16 + $0x40] sm:$0xff] }
 0x1d6   :  { %7806 = vmatprep.subr.bf16.mxu1 %v8870_v0 }
 0x1d8   :  { %1140 = vmatmul.mubr.f32.gmra.mrb[30].mxu1 %v6520_v42  ;;  %v531_v42 = vld [vmem:[%s10269_s16 + $0x50] sm:$0xff] }
 0x1d9   :  { %7808 = vmatpush1.bf16.msra.mxu1 %v9212_v23  ;;  %6533 = vmatprep.mubr.msk.f32.mxu1 %vm383_vm0, %v6523_v43 }
 0x1da   :  { %7809 = vmatprep.subr.bf16.mxu1 %v8870_v0 }
 0x1dc   :  { %1145 = vmatmul.mubr.f32.gmra.mrb[32].mxu1 %v6522_v44 }
 0x1dd   :  { %7811 = vmatpush1.bf16.msra.mxu1 %v9220_v26  ;;  %6534 = vmatprep.mubr.msk.f32.mxu1 %vm383_vm0, %v6525_v45 }
 0x1de   :  { %7812 = vmatprep.subr.bf16.mxu1 %v8870_v0 }
 0x1e0   :  { %1150 = vmatmul.mubr.f32.gmra.mrb[34].mxu1 %v6524_v46  ;;  %v7747_v46 = vpack.c.bf16 %v531_v42, %v529_v41 }
 0x1e1   :  { %7814 = vmatpush1.bf16.msra.mxu1 %v9228_v29  ;;  %6576 = vmatprep.mubr.msk.f32.mxu1 %vm383_vm0, %v6559_v47 }
 0x1e2   :  { %7827 = vmatprep.subr.bf16.mxu1 %v8870_v0 }
 0x1e4   :  { %1445 = vmatmul.mubr.f32.vlgmr.msra.gmra.mrb[36].mxu1 %v6558_v48 }
 0x1e5   :  { %7829 = vmatpush1.bf16.msra.mxu1 %v9164_v4  ;;  %6577 = vmatprep.mubr.msk.f32.mxu1 %vm383_vm0, %v6561_v49  ;;  %v6564_v4 = vld [vmem:[%s10268_s9 + $0x1e0] sm:$0xff]  ;;  %v534_v49 = vld [vmem:[%s10269_s16 + $0x68] sm:$0xff] }
 0x1e6   :  { %7830 = vmatprep.subr.bf16.mxu1 %v8870_v0 }
 0x1e8   :  { %1450 = vmatmul.mubr.f32.gmra.mrb[38].mxu1 %v6560_v50  ;;  %v6536_v50 = vld [vmem:[%s10269_s16 + $0xe8] sm:$0xff] }
 0x1e9   :  { %7832 = vmatpush1.bf16.msra.mxu1 %v9168_v6  ;;  %6578 = vmatprep.mubr.msk.f32.mxu1 %vm383_vm0, %v6563_v51  ;;  %v6567_v6 = vld [vmem:[%s10268_s9 + $0x1f8] sm:$0xff] }
 0x1ea   :  { %7833 = vmatprep.subr.bf16.mxu1 %v8870_v0  ;;  %v6538_v51 = vld [vmem:[%s10269_s16 + $0xf8] sm:$0xff] }
 0x1ec   :  { %1455 = vmatmul.mubr.f32.gmra.mrb[40].mxu1 %v6562_v52 }
 0x1ed   :  { %7835 = vmatpush1.bf16.msra.mxu1 %v9177_v10  ;;  %6579 = vmatprep.mubr.msk.f32.mxu1 %vm383_vm0, %v6565_v53  ;;  %v6566_v10 = vld [vmem:[%s10268_s9 + $0x1f0] sm:$0xff] }
 0x1ee   :  { %7836 = vmatprep.subr.bf16.mxu1 %v8870_v0 }
 0x1f0   :  { %1460 = vmatmul.mubr.f32.gmra.mrb[42].mxu1 %v6564_v4 }
 0x1f1   :  { %7838 = vmatpush1.bf16.msra.mxu1 %v9186_v13  ;;  %6580 = vmatprep.mubr.msk.f32.mxu1 %vm383_vm0, %v6567_v6  ;;  %v522_v13 = vld [vmem:[%s10269_s16 + $0x8] sm:$0xff]  ;;  %v7776_v6 = vpack.c.bf16 %v6538_v51, %v6536_v50  ;;  %v2007_v51 = vld [vmem:[%s10270_s25 + $0x18] sm:$0xff] }
 0x1f2   :  { %7839 = vmatprep.subr.bf16.mxu1 %v8870_v0  ;;  %v7737_v60 = vpack.c.bf16 %v524_v59, %v522_v13 }
 0x1f4   :  { %1465 = vmatmul.mubr.f32.gmra.mrb[44].mxu1 %v6566_v10  ;;  %7738 = vmatprep.subr.bf16.mxu0 %v7737_v60 }
 0x1f5   :  { %7841 = vmatpush1.bf16.msra.mxu1 %v9196_v17  ;;  %6581 = vmatprep.mubr.msk.f32.mxu1 %vm383_vm0, %v6569_v56  ;;  %v6573_v17 = vld [vmem:[%s10268_s9 + $0x228] sm:$0xff] }
 0x1f6   :  { %7842 = vmatprep.subr.bf16.mxu1 %v8870_v0 }
 0x1f8   :  { %1470 = vmatmul.mubr.f32.gmra.mrb[46].mxu1 %v6568_v57 }
 0x1f9   :  { %7844 = vmatpush1.bf16.msra.mxu1 %v9204_v20  ;;  %6582 = vmatprep.mubr.msk.f32.mxu1 %vm383_vm0, %v6571_v58  ;;  %v6575_v20 = vld [vmem:[%s10268_s9 + $0x238] sm:$0x3f] }
 0x1fa   :  { %7845 = vmatprep.subr.bf16.mxu1 %v8870_v0 }
 0x1fc   :  { %1475 = vmatmul.mubr.f32.gmra.mrb[48].mxu1 %v6570_v61 }
 0x1fd   :  { %7847 = vmatpush1.bf16.msra.mxu1 %v9212_v23  ;;  %6583 = vmatprep.mubr.msk.f32.mxu1 %vm383_vm0, %v6573_v17  ;;  %v6608_v23 = vld [vmem:[%s10268_s9 + $0x240] sm:$0xff] }
 0x1fe   :  { %7848 = vmatprep.subr.bf16.mxu1 %v8870_v0 }
 0x200   :  { %1480 = vmatmul.mubr.f32.gmra.mrb[50].mxu1 %v6572_v62 }
 0x201   :  { %7850 = vmatpush1.bf16.msra.mxu1 %v9220_v26  ;;  %6584 = vmatprep.mubr.msk.f32.mxu1 %vm383_vm0, %v6575_v20  ;;  %v6610_v26 = vld [vmem:[%s10268_s9 + $0x250] sm:$0xff] }
 0x202   :  { %7851 = vmatprep.subr.bf16.mxu1 %v8870_v0 }
 0x204   :  { %1485 = vmatmul.mubr.f32.gmra.mrb[52].mxu1 %v6574_v63 }
 0x205   :  { %7853 = vmatpush1.bf16.msra.mxu1 %v9228_v29  ;;  %6626 = vmatprep.mubr.msk.f32.mxu1 %vm383_vm0, %v6609_v1  ;;  %v6612_v29 = vld [vmem:[%s10268_s9 + $0x260] sm:$0xff] }
 0x206   :  { %7866 = vmatprep.subr.bf16.mxu1 %v8870_v0 }
 0x208   :  { %1780 = vmatmul.mubr.f32.vlgmr.msra.gmra.mrb[54].mxu1 %v6608_v23 }
 0x209   :  { %6627 = vmatprep.mubr.msk.f32.mxu1 %vm383_vm0, %v6611_v2 }
 0x20c   :  { %1785 = vmatmul.mubr.f32.gmra.mrb[56].mxu1 %v6610_v26 }
 0x20d   :  { %6628 = vmatprep.mubr.msk.f32.mxu1 %vm383_vm0, %v6613_v3 }
 0x210   :  { %1790 = vmatmul.mubr.f32.gmra.mrb[58].mxu1 %v6612_v29 }
 0x211   :  { %6629 = vmatprep.mubr.msk.f32.mxu1 %vm383_vm0, %v6615_v5 }
 0x214   :  { %1795 = vmatmul.mubr.f32.gmra.mrb[60].mxu1 %v6614_v7 }
 0x215   :  { %6630 = vmatprep.mubr.msk.f32.mxu1 %vm383_vm0, %v6617_v8  ;;  %v6535_v8 = vld [vmem:[%s10269_s16 + $0xe0] sm:$0xff] }
 0x218   :  { %1800 = vmatmul.mubr.f32.gmra.mrb[62].mxu1 %v6616_v9  ;;  %v6537_v9 = vld [vmem:[%s10269_s16 + $0xf0] sm:$0xff] }
 0x219   :  { %6631 = vmatprep.mubr.msk.f32.mxu1 %vm383_vm0, %v6619_v11 }
 0x21c   :  { %1805 = vmatmul.mubr.f32.gmra.mrb[64].mxu1 %v6618_v12  ;;  %v6540_v12 = vld [vmem:[%s10269_s16 + $0x108] sm:$0xff] }
 0x21d   :  { %6632 = vmatprep.mubr.msk.f32.mxu1 %vm383_vm0, %v6621_v14  ;;  %v6542_v14 = vld [vmem:[%s10269_s16 + $0x118] sm:$0xff] }
 0x220   :  { %1810 = vmatmul.mubr.f32.gmra.mrb[66].mxu1 %v6620_v15 }
 0x221   :  { %6633 = vmatprep.mubr.msk.f32.mxu1 %vm383_vm0, %v6623_v16 }
 0x224   :  { %1815 = vmatmul.mubr.f32.gmra.mrb[68].mxu1 %v6622_v18  ;;  %v7778_v18 = vpack.c.bf16 %v6537_v9, %v6535_v8  ;;  %v2016_v9 = vld [vmem:[%s10270_s25 + $0x60] sm:$0xff] }
 0x225   :  { %6634 = vmatprep.mubr.msk.f32.mxu1 %vm383_vm0, %v6625_v19 }
 0x228   :  { %1820 = vmatmul.mubr.f32.gmra.mrb[70].mxu1 %v6624_v21  ;;  %v7780_v21 = vpack.c.bf16 %v6542_v14, %v6540_v12 }
 0x26f   :  { %v647_v33 = vpop.f32.mrb[0].mxu1  ;;  %v9447_v37 = vpop.f32.mrb[0].mxu0 }
 0x270   :  { %v649_v36 = vpop.f32.mrb[1].mxu1  ;;  %6490 = vmatmul.mubr.msk.f32.vlgmr.msra.gmra.mrb[18].mxu0 %vm706_vm1, %v647_v33  ;;  %v479_v39 = vpop.f32.mrb[1].mxu0  ;;  %v6543_v33 = vld [vmem:[%s10269_s16 + $0x120] sm:$0xff] }
 0x271   :  { %804 = vmatprep.mubr.f32.mxu0 %v8871_v55  ;;  %7740 = vmatpush1.bf16.msra.mxu0 %v7739_v28  ;;  %v7786_v36 = vpack.c.bf16 %v6545_v34, %v6543_v33  ;;  %v6586_v39 = vld [vmem:[%s10269_s16 + $0x158] sm:$0xff]  ;;  %v6593_v33 = vld [vmem:[%s10269_s16 + $0x190] sm:$0xff]  ;;  %v7888_v34 = vpack.c.bf16 %v2019_v27, %v2018_v25 }
 0x272   :  { %7742 = vmatprep.subr.bf16.mxu0 %v7741_v30  ;;  %v7782_v30 = vpack.c.bf16 %v6541_v24, %v6539_v22  ;;  %v6596_v22 = vld [vmem:[%s10269_s16 + $0x1a8] sm:$0xff] }
 0x273   :  { %v652_v43 = vpop.f32.mrb[2].mxu1  ;;  %v9453_v45 = vpop.f32.mrb[2].mxu0 }
 0x274   :  { %v654_v44 = vpop.f32.mrb[3].mxu1  ;;  %6491 = vmatmul.mubr.msk.f32.gmra.mrb[20].mxu0 %vm706_vm1, %v652_v43  ;;  %v484_v47 = vpop.f32.mrb[3].mxu0  ;;  %v6547_v43 = vld [vmem:[%s10269_s16 + $0x140] sm:$0xff] }
 0x275   :  { %810 = vmatprep.mubr.f32.mxu0 %v8871_v55  ;;  %7744 = vmatpush1.bf16.msra.mxu0 %v7743_v38  ;;  %v6548_v38 = vld [vmem:[%s10269_s16 + $0x148] sm:$0xff] }
 0x276   :  { %7746 = vmatprep.subr.bf16.mxu0 %v7745_v40  ;;  %v6588_v40 = vld [vmem:[%s10269_s16 + $0x168] sm:$0xff] }
 0x277   :  { %v657_v48 = vpop.f32.mrb[4].mxu1  ;;  %v9460_v53 = vpop.f32.mrb[4].mxu0  ;;  %v7815_v44 = vpack.c.bf16 %v6588_v40, %v6586_v39  ;;  %v2005_v47 = vld [vmem:[%s10270_s25 + $0x8] sm:$0xff] }
 0x278   :  { %v659_v52 = vpop.f32.mrb[5].mxu1  ;;  %6492 = vmatmul.mubr.msk.f32.gmra.mrb[22].mxu0 %vm706_vm1, %v657_v48  ;;  %v489_v4 = vpop.f32.mrb[5].mxu0  ;;  %v2006_v48 = vld [vmem:[%s10270_s25 + $0x10] sm:$0xff] }
 0x279   :  { %816 = vmatprep.mubr.f32.mxu0 %v8871_v55  ;;  %7748 = vmatpush1.bf16.msra.mxu0 %v7747_v46  ;;  %v2004_v46 = vld [vmem:[%s10270_s25] sm:$0xff]  ;;  %v7870_v52 = vpack.c.bf16 %v2007_v51, %v2006_v48  ;;  %v2023_v48 = vld [vmem:[%s10270_s25 + $0x98] sm:$0xff] }
 0x27a   :  { %892 = vmatprep.subr.mxu0 %v534_v49  ;;  %v7867_v50 = vpack.c.bf16 %v2005_v47, %v2004_v46  ;;  %v2008_v4 = vld [vmem:[%s10270_s25 + $0x20] sm:$0xff]  ;;  %v2022_v47 = vld [vmem:[%s10270_s25 + $0x90] sm:$0xff] }
 0x27b   :  { %v662_v10 = vpop.f32.mrb[6].mxu1  ;;  %v9465_v57 = vpop.f32.mrb[6].mxu0 }
 0x27c   :  { %v664_v56 = vpop.f32.mrb[7].mxu1  ;;  %6493 = vmatmul.mubr.msk.f32.gmra.mrb[24].mxu0 %vm706_vm1, %v662_v10  ;;  %v494_v58 = vpop.f32.mrb[7].mxu0  ;;  %7868 = vmatpush1.bf16.msra.mxu1 %v7867_v50  ;;  %v6597_v50 = vld [vmem:[%s10269_s16 + $0x1b0] sm:$0xff] }
 0x27d   :  { %822 = vmatprep.mubr.f32.mxu0 %v8871_v55  ;;  %893 = vmatpush1.msra.mxu0 %v533_v54  ;;  %v2009_v54 = vld [vmem:[%s10270_s25 + $0x28] sm:$0xff]  ;;  %v2011_v58 = vld [vmem:[%s10270_s25 + $0x38] sm:$0xff] }
 0x27e   :  { %7777 = vmatprep.subr.bf16.mxu0 %v7776_v6  ;;  %7869 = vmatprep.subr.bf16.mxu1 %v8870_v0  ;;  %v7873_v10 = vpack.c.bf16 %v2009_v54, %v2008_v4 }
 0x27f   :  { %v667_v13 = vpop.f32.mrb[8].mxu1  ;;  %v9469_v60 = vpop.f32.mrb[8].mxu0 }
 0x280   :  { %v669_v59 = vpop.f32.mrb[9].mxu1  ;;  %6494 = vmatmul.mubr.msk.f32.gmra.mrb[26].mxu0 %vm706_vm1, %v667_v13  ;;  %v499_v61 = vpop.f32.mrb[9].mxu0  ;;  %7871 = vmatpush1.bf16.msra.mxu1 %v7870_v52  ;;  %v7894_v52 = vpack.c.bf16 %v2023_v48, %v2022_v47 }
 0x281   :  { %828 = vmatprep.mubr.f32.mxu0 %v8871_v55  ;;  %7872 = vmatprep.subr.bf16.mxu1 %v8870_v0  ;;  %v2012_v61 = vld [vmem:[%s10270_s25 + $0x40] sm:$0xff] }
 0x283   :  { %v672_v17 = vpop.f32.mrb[10].mxu1  ;;  %v9473_v20 = vpop.f32.mrb[10].mxu0 }
 0x284   :  { %v674_v62 = vpop.f32.mrb[11].mxu1  ;;  %6495 = vmatmul.mubr.msk.f32.gmra.mrb[28].mxu0 %vm706_vm1, %v672_v17  ;;  %v504_v63 = vpop.f32.mrb[11].mxu0  ;;  %7874 = vmatpush1.bf16.msra.mxu1 %v7873_v10  ;;  %v2013_v17 = vld [vmem:[%s10270_s25 + $0x48] sm:$0xff] }
 0x285   :  { %834 = vmatprep.mubr.f32.mxu0 %v8871_v55  ;;  %7875 = vmatprep.subr.bf16.mxu1 %v8870_v0 }
 0x287   :  { %v677_v1 = vpop.f32.mrb[12].mxu1  ;;  %v9477_v2 = vpop.f32.mrb[12].mxu0 }
 0x288   :  { %v679_v23 = vpop.f32.mrb[13].mxu1  ;;  %6496 = vmatmul.mubr.msk.f32.gmra.mrb[30].mxu0 %vm706_vm1, %v677_v1  ;;  %v509_v26 = vpop.f32.mrb[13].mxu0  ;;  %v2014_v1 = vld [vmem:[%s10270_s25 + $0x50] sm:$0xff] }
 0x289   :  { %840 = vmatprep.mubr.f32.mxu0 %v8871_v55  ;;  %v2015_v23 = vld [vmem:[%s10270_s25 + $0x58] sm:$0xff]  ;;  %v6585_v26 = vld [vmem:[%s10269_s16 + $0x150] sm:$0xff] }
 0x28b   :  { %v682_v3 = vpop.f32.mrb[14].mxu1  ;;  %v9481_v5 = vpop.f32.mrb[14].mxu0 }
 0x28c   :  { %v684_v29 = vpop.f32.mrb[15].mxu1  ;;  %6497 = vmatmul.mubr.msk.f32.gmra.mrb[32].mxu0 %vm706_vm1, %v682_v3  ;;  %v514_v7 = vpop.f32.mrb[15].mxu0  ;;  %v6587_v3 = vld [vmem:[%s10269_s16 + $0x160] sm:$0xff] }
 0x28d   :  { %846 = vmatprep.mubr.f32.mxu0 %v8871_v55  ;;  %v6590_v29 = vld [vmem:[%s10269_s16 + $0x178] sm:$0xff]  ;;  %v6592_v7 = vld [vmem:[%s10269_s16 + $0x188] sm:$0xff]  ;;  %v7817_v12 = vpack.c.bf16 %v6587_v3, %v6585_v26 }
 0x28e   :  { %v6646_v26 = vld [vmem:[%s10269_s16 + $0x218] sm:$0xff] }
 0x28f   :  { %v687_v11 = vpop.f32.mrb[16].mxu1  ;;  %v9489_v16 = vpop.f32.mrb[16].mxu0 }
 0x290   :  { %v689_v15 = vpop.f32.mrb[17].mxu1  ;;  %6498 = vmatmul.mubr.msk.f32.gmra.mrb[34].mxu0 %vm706_vm1, %v687_v11  ;;  %v519_v19 = vpop.f32.mrb[17].mxu0  ;;  %v2017_v11 = vld [vmem:[%s10270_s25 + $0x68] sm:$0xff] }
 0x291   :  { %944 = vmatprep.mubr.f32.mxu0 %v8871_v55  ;;  %v7819_v15 = vpack.c.bf16 %v6592_v7, %v6590_v29  ;;  %v6591_v19 = vld [vmem:[%s10269_s16 + $0x180] sm:$0xff] }
 0x293   :  { %v9498_v28 = vpop.f32.mrb[18].mxu1 }
 0x294   :  { %6499 = vmatmul.mubr.msk.f32.vlgmr.msra.gmra.mrb[18].mxu0 %vm706_vm1, %v9447_v37  ;;  %v1113_v31 = vpop.f32.mrb[19].mxu1 }
 0x295   :  { %950 = vmatprep.mubr.f32.mxu0 %v8871_v55  ;;  %7779 = vmatpush1.bf16.msra.mxu0 %v7778_v18  ;;  %v6589_v18 = vld [vmem:[%s10269_s16 + $0x170] sm:$0xff] }
 0x296   :  { %7781 = vmatprep.subr.bf16.mxu0 %v7780_v21  ;;  %v6594_v21 = vld [vmem:[%s10269_s16 + $0x198] sm:$0xff] }
 0x297   :  { %v9505_v35 = vpop.f32.mrb[20].mxu1 }
 0x298   :  { %6500 = vmatmul.mubr.msk.f32.gmra.mrb[20].mxu0 %vm706_vm1, %v9453_v45  ;;  %v1118_v37 = vpop.f32.mrb[21].mxu1 }
 0x299   :  { %956 = vmatprep.mubr.f32.mxu0 %v8871_v55  ;;  %7783 = vmatpush1.bf16.msra.mxu0 %v7782_v30  ;;  %v7821_v30 = vpack.c.bf16 %v6591_v19, %v6589_v18  ;;  %v2020_v37 = vld [vmem:[%s10270_s25 + $0x80] sm:$0xff] }
 0x29a   :  { %7785 = vmatprep.subr.bf16.mxu0 %v7784_v32  ;;  %v7823_v32 = vpack.c.bf16 %v6596_v22, %v6594_v21  ;;  %v6647_v21 = vld [vmem:[%s10269_s16 + $0x220] sm:$0xff] }
 0x29b   :  { %v9513_v41 = vpop.f32.mrb[22].mxu1 }
 0x29c   :  { %6501 = vmatmul.mubr.msk.f32.gmra.mrb[22].mxu0 %vm706_vm1, %v9460_v53  ;;  %v1123_v42 = vpop.f32.mrb[23].mxu1 }
 0x29d   :  { %962 = vmatprep.mubr.f32.mxu0 %v8871_v55  ;;  %7787 = vmatpush1.bf16.msra.mxu0 %v7786_v36  ;;  %v6598_v42 = vld [vmem:[%s10269_s16 + $0x1b8] sm:$0xff] }
 0x29e   :  { %1209 = vmatprep.subr.mxu0 %v6548_v38  ;;  %v2021_v38 = vld [vmem:[%s10270_s25 + $0x88] sm:$0xff] }
 0x29f   :  { %v9519_v45 = vpop.f32.mrb[24].mxu1 }
 0x2a0   :  { %6502 = vmatmul.mubr.msk.f32.gmra.mrb[24].mxu0 %vm706_vm1, %v9465_v57  ;;  %v1128_v49 = vpop.f32.mrb[25].mxu1  ;;  %v2010_v57 = vld [vmem:[%s10270_s25 + $0x30] sm:$0xff] }
 0x2a1   :  { %968 = vmatprep.mubr.f32.mxu0 %v8871_v55  ;;  %1210 = vmatpush1.msra.mxu0 %v6547_v43  ;;  %v7876_v59 = vpack.c.bf16 %v2011_v58, %v2010_v57  ;;  %v6636_v43 = vld [vmem:[%s10269_s16 + $0x1c8] sm:$0xff] }
 0x2a2   :  { %7816 = vmatprep.subr.bf16.mxu0 %v7815_v44  ;;  %v6638_v44 = vld [vmem:[%s10269_s16 + $0x1d8] sm:$0xff] }
 0x2a3   :  { %v9528_v53 = vpop.f32.mrb[26].mxu1  ;;  %7877 = vmatpush1.bf16.msra.mxu1 %v7876_v59  ;;  %v7854_v51 = vpack.c.bf16 %v6638_v44, %v6636_v43  ;;  %v6637_v59 = vld [vmem:[%s10269_s16 + $0x1d0] sm:$0xff] }
 0x2a4   :  { %6503 = vmatmul.mubr.msk.f32.gmra.mrb[26].mxu0 %vm706_vm1, %v9469_v60  ;;  %v1133_v6 = vpop.f32.mrb[27].mxu1  ;;  %7878 = vmatprep.subr.bf16.mxu1 %v8870_v0 }
 0x2a5   :  { %974 = vmatprep.mubr.f32.mxu0 %v8871_v55 }
 0x2a7   :  { %v9536_v56 = vpop.f32.mrb[28].mxu1 }
 0x2a8   :  { %6504 = vmatmul.mubr.msk.f32.gmra.mrb[28].mxu0 %vm706_vm1, %v9473_v20  ;;  %v1138_v13 = vpop.f32.mrb[29].mxu1  ;;  %v7879_v20 = vpack.c.bf16 %v2013_v17, %v2012_v61  ;;  %v6640_v61 = vld [vmem:[%s10269_s16 + $0x1e8] sm:$0xff]  ;;  %v6642_v17 = vld [vmem:[%s10269_s16 + $0x1f8] sm:$0xff] }
 0x2a9   :  { %980 = vmatprep.mubr.f32.mxu0 %v8871_v55  ;;  %v6635_v13 = vld [vmem:[%s10269_s16 + $0x1c0] sm:$0xff] }
 0x2aa   :  { %7880 = vmatpush1.bf16.msra.mxu1 %v7879_v20 }
 0x2ab   :  { %v9544_v60 = vpop.f32.mrb[30].mxu1  ;;  %7881 = vmatprep.subr.bf16.mxu1 %v8870_v0 }
 0x2ac   :  { %6505 = vmatmul.mubr.msk.f32.gmra.mrb[30].mxu0 %vm706_vm1, %v9477_v2  ;;  %v1143_v62 = vpop.f32.mrb[31].mxu1 }
 0x2ad   :  { %986 = vmatprep.mubr.f32.mxu0 %v8871_v55  ;;  %v7856_v62 = vpack.c.bf16 %v6637_v59, %v6635_v13 }
 0x2af   :  { %v9552_v63 = vpop.f32.mrb[32].mxu1 }
 0x2b0   :  { %6506 = vmatmul.mubr.msk.f32.gmra.mrb[32].mxu0 %vm706_vm1, %v9481_v5  ;;  %v1148_v2 = vpop.f32.mrb[33].mxu1  ;;  %v7882_v5 = vpack.c.bf16 %v2015_v23, %v2014_v1  ;;  %v6639_v1 = vld [vmem:[%s10269_s16 + $0x1e0] sm:$0xff]  ;;  %v6641_v23 = vld [vmem:[%s10269_s16 + $0x1f0] sm:$0xff] }
 0x2b1   :  { %992 = vmatprep.mubr.f32.mxu0 %v8871_v55  ;;  %v6644_v2 = vld [vmem:[%s10269_s16 + $0x208] sm:$0xff]  ;;  %v7860_v29 = vpack.c.bf16 %v6641_v23, %v6639_v1 }
 0x2b2   :  { %7883 = vmatpush1.bf16.msra.mxu1 %v7882_v5  ;;  %v7862_v5 = vpack.c.bf16 %v6646_v26, %v6644_v2 }
 0x2b3   :  { %v9564_v8 = vpop.f32.mrb[34].mxu1  ;;  %7884 = vmatprep.subr.bf16.mxu1 %v8870_v0 }
 0x2b4   :  { %6507 = vmatmul.mubr.msk.f32.gmra.mrb[34].mxu0 %vm706_vm1, %v9489_v16  ;;  %v1153_v14 = vpop.f32.mrb[35].mxu1  ;;  %v7885_v16 = vpack.c.bf16 %v2017_v11, %v2016_v9  ;;  %v6645_v9 = vld [vmem:[%s10269_s16 + $0x210] sm:$0xff] }
 0x2b5   :  { %1261 = vmatprep.mubr.f32.mxu0 %v8871_v55 }
 0x2b6   :  { %7886 = vmatpush1.bf16.msra.mxu1 %v7885_v16 }
 0x2b7   :  { %v9576_v24 = vpop.f32.mrb[36].mxu1  ;;  %7887 = vmatprep.subr.bf16.mxu1 %v8870_v0 }
 0x2b8   :  { %6549 = vmatmul.mubr.msk.f32.vlgmr.msra.gmra.mrb[18].mxu0 %vm706_vm1, %v9498_v28  ;;  %v1448_v31 = vpop.f32.mrb[37].mxu1  ;;  %v6595_v28 = vld [vmem:[%s10269_s16 + $0x1a0] sm:$0xff] }
 0x2b9   :  { %1267 = vmatprep.mubr.f32.mxu0 %v8871_v55  ;;  %7818 = vmatpush1.bf16.msra.mxu0 %v7817_v12  ;;  %v7825_v39 = vpack.c.bf16 %v6595_v28, %v6593_v33 }
 0x2ba   :  { %7820 = vmatprep.subr.bf16.mxu0 %v7819_v15  ;;  %7889 = vmatpush1.bf16.msra.mxu1 %v7888_v34  ;;  %v6648_v15 = vld [vmem:[%s10269_s16 + $0x228] sm:$0xff] }
 0x2bb   :  { %v9586_v36 = vpop.f32.mrb[38].mxu1  ;;  %7890 = vmatprep.subr.bf16.mxu1 %v8870_v0 }
 0x2bc   :  { %6550 = vmatmul.mubr.msk.f32.gmra.mrb[20].mxu0 %vm706_vm1, %v9505_v35  ;;  %v1453_v40 = vpop.f32.mrb[39].mxu1  ;;  %v7891_v35 = vpack.c.bf16 %v2021_v38, %v2020_v37  ;;  %v2024_v37 = vld [vmem:[%s10270_s25 + $0xa0] sm:$0x3] }
 0x2bd   :  { %1273 = vmatprep.mubr.f32.mxu0 %v8871_v55  ;;  %7822 = vmatpush1.bf16.msra.mxu0 %v7821_v30 }
 0x2be   :  { %7824 = vmatprep.subr.bf16.mxu0 %v7823_v32  ;;  %7892 = vmatpush1.bf16.msra.mxu1 %v7891_v35 }
 0x2bf   :  { %v9597_v46 = vpop.f32.mrb[40].mxu1  ;;  %7893 = vmatprep.subr.bf16.mxu1 %v8870_v0 }
 0x2c0   :  { %6551 = vmatmul.mubr.msk.f32.gmra.mrb[22].mxu0 %vm706_vm1, %v9513_v41  ;;  %v1458_v49 = vpop.f32.mrb[41].mxu1 }
 0x2c1   :  { %1279 = vmatprep.mubr.f32.mxu0 %v8871_v55  ;;  %7826 = vmatpush1.bf16.msra.mxu0 %v7825_v39 }
 0x2c2   :  { %1544 = vmatprep.subr.mxu0 %v6598_v42  ;;  %7895 = vmatpush1.bf16.msra.mxu1 %v7894_v52 }
 0x2c3   :  { %v9606_v4 = vpop.f32.mrb[42].mxu1  ;;  %2097 = vmatprep.subr.mxu1 %v8871_v55 }
 0x2c4   :  { %6552 = vmatmul.mubr.msk.f32.gmra.mrb[24].mxu0 %vm706_vm1, %v9519_v45  ;;  %v1463_v41 = vpop.f32.mrb[43].mxu1 }
 0x2c5   :  { %1285 = vmatprep.mubr.f32.mxu0 %v8871_v55  ;;  %1545 = vmatpush1.msra.mxu0 %v6597_v50 }
 0x2c6   :  { %7855 = vmatprep.subr.bf16.mxu0 %v7854_v51  ;;  %6658 = vmatpush1.msk.msra.mxu1 %vm2053_vm2, %v2024_v37  ;;  %v2513_v37 = vld [vmem:[%s10271_s14 + $0x20] sm:$0xff] }
 0x2c7   :  { %v1466_v54 = vpop.f32.mrb[44].mxu1  ;;  %7896 = vmatprep.subr.bf16.mxu1 %v8870_v0 }
 0x2c8   :  { %6553 = vmatmul.mubr.msk.f32.gmra.mrb[26].mxu0 %vm706_vm1, %v9528_v53  ;;  %v1468_v45 = vpop.f32.mrb[45].mxu1 }
 0x2c9   :  { %1291 = vmatprep.mubr.f32.mxu0 %v8871_v55 }
 0x2cb   :  { %v1471_v6 = vpop.f32.mrb[46].mxu1 }
 0x2cc   :  { %6554 = vmatmul.mubr.msk.f32.gmra.mrb[28].mxu0 %vm706_vm1, %v9536_v56  ;;  %v1473_v10 = vpop.f32.mrb[47].mxu1 }
 0x2cd   :  { %1297 = vmatprep.mubr.f32.mxu0 %v8871_v55 }
 0x2cf   :  { %v1476_v53 = vpop.f32.mrb[48].mxu1 }
 0x2d0   :  { %6555 = vmatmul.mubr.msk.f32.gmra.mrb[30].mxu0 %vm706_vm1, %v9544_v60  ;;  %v1478_v57 = vpop.f32.mrb[49].mxu1 }
 0x2d1   :  { %1303 = vmatprep.mubr.f32.mxu0 %v8871_v55 }
 0x2d3   :  { %v1481_v58 = vpop.f32.mrb[50].mxu1 }
 0x2d4   :  { %6556 = vmatmul.mubr.msk.f32.gmra.mrb[32].mxu0 %vm706_vm1, %v9552_v63  ;;  %v1483_v56 = vpop.f32.mrb[51].mxu1  ;;  %v7858_v63 = vpack.c.bf16 %v6642_v17, %v6640_v61 }
 0x2d5   :  { %1309 = vmatprep.mubr.f32.mxu0 %v8871_v55 }
 0x2d7   :  { %v1486_v60 = vpop.f32.mrb[52].mxu1 }
 0x2d8   :  { %6557 = vmatmul.mubr.msk.f32.gmra.mrb[34].mxu0 %vm706_vm1, %v9564_v8  ;;  %v1488_v20 = vpop.f32.mrb[53].mxu1  ;;  %v6643_v8 = vld [vmem:[%s10269_s16 + $0x200] sm:$0xff] }
 0x2d9   :  { %1596 = vmatprep.mubr.f32.mxu0 %v8871_v55  ;;  %v7864_v12 = vpack.c.bf16 %v6645_v9, %v6643_v8  ;;  %v2173_v8 = vld [vmem:[#allocation2 + $0x28] sm:$0xff]  ;;  %v2174_v9 = vld [vmem:[#allocation2 + $0x30] sm:$0xff] }
 0x2db   :  { %v1781_v3 = vpop.f32.mrb[54].mxu1 }
 0x2dc   :  { %6599 = vmatmul.mubr.msk.f32.vlgmr.msra.gmra.mrb[18].mxu0 %vm706_vm1, %v9576_v24  ;;  %v1783_v7 = vpop.f32.mrb[55].mxu1 }
 0x2dd   :  { %1602 = vmatprep.mubr.f32.mxu0 %v8871_v55  ;;  %7857 = vmatpush1.bf16.msra.mxu0 %v7856_v62 }
 0x2de   :  { %7859 = vmatprep.subr.bf16.mxu0 %v7858_v63 }
 0x2df   :  { %v1786_v11 = vpop.f32.mrb[56].mxu1 }
 0x2e0   :  { %6600 = vmatmul.mubr.msk.f32.gmra.mrb[20].mxu0 %vm706_vm1, %v9586_v36  ;;  %v1788_v14 = vpop.f32.mrb[57].mxu1 }
 0x2e1   :  { %1608 = vmatprep.mubr.f32.mxu0 %v8871_v55  ;;  %7861 = vmatpush1.bf16.msra.mxu0 %v7860_v29  ;;  %v2177_v14 = vld [vmem:[#allocation2 + $0x48] sm:$0x3] }
 0x2e2   :  { %7863 = vmatprep.subr.bf16.mxu0 %v7862_v5 }
 0x2e3   :  { %v1791_v18 = vpop.f32.mrb[58].mxu1 }
 0x2e4   :  { %6601 = vmatmul.mubr.msk.f32.gmra.mrb[22].mxu0 %vm706_vm1, %v9597_v46  ;;  %v1793_v19 = vpop.f32.mrb[59].mxu1 }
 0x2e5   :  { %1614 = vmatprep.mubr.f32.mxu0 %v8871_v55  ;;  %7865 = vmatpush1.bf16.msra.mxu0 %v7864_v12  ;;  %v2176_v12 = vld [vmem:[#allocation2 + $0x40] sm:$0xff]  ;;  %v2169_v19 = vld [vmem:[#allocation2 + $0x10] sm:$0xff] }
 0x2e6   :  { %1879 = vmatprep.subr.mxu0 %v6648_v15  ;;  %v2167_v15 = vld [vmem:[#allocation2] sm:$0xff] }
 0x2e7   :  { %v1796_v22 = vpop.f32.mrb[60].mxu1 }
 0x2e8   :  { %6602 = vmatmul.mubr.msk.f32.gmra.mrb[24].mxu0 %vm706_vm1, %v9606_v4  ;;  %v1798_v16 = vpop.f32.mrb[61].mxu1 }
 0x2e9   :  { %1620 = vmatprep.mubr.f32.mxu0 %v8871_v55  ;;  %1880 = vmatpush1.msra.mxu0 %v6647_v21  ;;  %v2170_v21 = vld [vmem:[#allocation2 + $0x18] sm:$0xff]  ;;  %v2394_v16 = vld [vmem:[#allocation2 + $0x50] sm:$0xff] }
 0x2ea   :  { %7948 = vmatprep.subr.bf16.mxu0 %v8870_v0 }
 0x2eb   :  { %v1801_v24 = vpop.f32.mrb[62].mxu1 }
 0x2ec   :  { %6603 = vmatmul.mubr.msk.f32.gmra.mrb[26].mxu0 %vm706_vm1, %v1466_v54  ;;  %v1803_v25 = vpop.f32.mrb[63].mxu1 }
 0x2ed   :  { %1626 = vmatprep.mubr.f32.mxu0 %v8871_v55  ;;  %v2396_v25 = vld [vmem:[#allocation2 + $0x60] sm:$0xff] }
 0x2ef   :  { %v1806_v27 = vpop.f32.mrb[64].mxu1 }
 0x2f0   :  { %6604 = vmatmul.mubr.msk.f32.gmra.mrb[28].mxu0 %vm706_vm1, %v1471_v6  ;;  %v1808_v30 = vpop.f32.mrb[65].mxu1 }
 0x2f1   :  { %1632 = vmatprep.mubr.f32.mxu0 %v8871_v55  ;;  %v2398_v30 = vld [vmem:[#allocation2 + $0x70] sm:$0x3] }
 0x2f3   :  { %v1811_v31 = vpop.f32.mrb[66].mxu1 }
 0x2f4   :  { %6605 = vmatmul.mubr.msk.f32.gmra.mrb[30].mxu0 %vm706_vm1, %v1476_v53  ;;  %v1813_v32 = vpop.f32.mrb[67].mxu1 }
 0x2f5   :  { %1638 = vmatprep.mubr.f32.mxu0 %v8871_v55  ;;  %v2510_v32 = vld [vmem:[%s10271_s14 + $0x8] sm:$0xff] }
 0x2f7   :  { %v1816_v33 = vpop.f32.mrb[68].mxu1 }
 0x2f8   :  { %6606 = vmatmul.mubr.msk.f32.gmra.mrb[32].mxu0 %vm706_vm1, %v1481_v58  ;;  %v1818_v28 = vpop.f32.mrb[69].mxu1 }
 0x2f9   :  { %1644 = vmatprep.mubr.f32.mxu0 %v8871_v55  ;;  %v2511_v28 = vld [vmem:[%s10271_s14 + $0x10] sm:$0xff] }
 0x2fb   :  { %v1821_v34 = vpop.f32.mrb[70].mxu1 }
 0x2fc   :  { %6607 = vmatmul.mubr.msk.f32.gmra.mrb[34].mxu0 %vm706_vm1, %v1486_v60  ;;  %v1823_v36 = vpop.f32.mrb[71].mxu1 }
 0x2fd   :  { %1931 = vmatprep.mubr.f32.mxu0 %v8871_v55 }
 0x300   :  { %6649 = vmatmul.mubr.msk.f32.vlgmr.msra.gmra.mrb[18].mxu0 %vm706_vm1, %v1781_v3 }
 0x301   :  { %1937 = vmatprep.mubr.f32.mxu0 %v8871_v55 }
 0x304   :  { %6650 = vmatmul.mubr.msk.f32.gmra.mrb[20].mxu0 %vm706_vm1, %v1786_v11  ;;  %v2175_v11 = vld [vmem:[#allocation2 + $0x38] sm:$0xff] }
 0x305   :  { %1943 = vmatprep.mubr.f32.mxu0 %v8871_v55 }
 0x308   :  { %6651 = vmatmul.mubr.msk.f32.gmra.mrb[22].mxu0 %vm706_vm1, %v1791_v18  ;;  %v2168_v18 = vld [vmem:[#allocation2 + $0x8] sm:$0xff] }
 0x309   :  { %1949 = vmatprep.mubr.f32.mxu0 %v8871_v55 }
 0x30c   :  { %6652 = vmatmul.mubr.msk.f32.gmra.mrb[24].mxu0 %vm706_vm1, %v1796_v22  ;;  %v2171_v22 = vld [vmem:[#allocation2 + $0x20] sm:$0x3] }
 0x30d   :  { %1955 = vmatprep.mubr.f32.mxu0 %v8871_v55 }
 0x310   :  { %6653 = vmatmul.mubr.msk.f32.gmra.mrb[26].mxu0 %vm706_vm1, %v1801_v24  ;;  %v2395_v24 = vld [vmem:[#allocation2 + $0x58] sm:$0xff] }
 0x311   :  { %1961 = vmatprep.mubr.f32.mxu0 %v8871_v55 }
 0x314   :  { %6654 = vmatmul.mubr.msk.f32.gmra.mrb[28].mxu0 %vm706_vm1, %v1806_v27  ;;  %v2397_v27 = vld [vmem:[#allocation2 + $0x68] sm:$0xff] }
 0x315   :  { %1967 = vmatprep.mubr.f32.mxu0 %v8871_v55 }
 0x318   :  { %6655 = vmatmul.mubr.msk.f32.gmra.mrb[30].mxu0 %vm706_vm1, %v1811_v31  ;;  %v2509_v31 = vld [vmem:[%s10271_s14] sm:$0xff] }
 0x319   :  { %1973 = vmatprep.mubr.f32.mxu0 %v8871_v55 }
 0x31c   :  { %6656 = vmatmul.mubr.msk.f32.gmra.mrb[32].mxu0 %vm706_vm1, %v1816_v33  ;;  %v7933_v33 = vpack.c.bf16 %v2510_v32, %v2509_v31 }
 0x31d   :  { %1979 = vmatprep.mubr.f32.mxu0 %v8871_v55 }
 0x31e   :  { %7950 = vmatpush3.bf16.msra.mxu0 %v7933_v33 }
 0x31f   :  { %7951 = vmatprep.subr.bf16.mxu0 %v8870_v0 }
 0x320   :  { %6657 = vmatmul.mubr.msk.f32.gmra.mrb[34].mxu0 %vm706_vm1, %v1821_v34  ;;  %v2512_v34 = vld [vmem:[%s10271_s14 + $0x18] sm:$0xff] }
 0x321   :  { %7207 = vmatprep.mubr.msk.f32.mxu0 %vm8872_vm4, %v8871_v55  ;;  %v7936_v36 = vpack.c.bf16 %v2512_v34, %v2511_v28 }
 0x323   :  { %7953 = vmatpush3.bf16.msra.mxu0 %v7936_v36 }
 0x324   :  { %7954 = vmatprep.subr.bf16.mxu0 %v8870_v0 }
 0x3d3   :  { %v1933_v38 = vpop.f32.mrb[18].mxu0 }
 0x3d4   :  { %v1935_v39 = vpop.f32.mrb[19].mxu0 }
 0x3d5   :  { %6659 = vmatprep.mubr.msk.f32.mxu1 %vm2025_vm3, %v1935_v39 }
 0x3d6   :  { %2122 = vmatmul.mubr.f32.vlgmr.msra.gmra.mrb[72].mxu1 %v1933_v38  ;;  %v2514_v38 = vld [vmem:[%s10271_s14 + $0x28] sm:$0xff] }
 0x3d7   :  { %v1939_v40 = vpop.f32.mrb[20].mxu0  ;;  %v7939_v39 = vpack.c.bf16 %v2514_v38, %v2513_v37 }
 0x3d8   :  { %v1941_v42 = vpop.f32.mrb[21].mxu0 }
 0x3d9   :  { %6660 = vmatprep.mubr.msk.f32.mxu1 %vm2025_vm3, %v1941_v42  ;;  %7956 = vmatpush3.bf16.msra.mxu0 %v7939_v39  ;;  %v2516_v42 = vld [vmem:[%s10271_s14 + $0x38] sm:$0xff] }
 0x3da   :  { %2127 = vmatmul.mubr.f32.gmra.mrb[74].mxu1 %v1939_v40  ;;  %v2515_v40 = vld [vmem:[%s10271_s14 + $0x30] sm:$0xff]  ;;  %7957 = vmatprep.subr.bf16.mxu0 %v8870_v0 }
 0x3db   :  { %v1945_v43 = vpop.f32.mrb[22].mxu0 }
 0x3dc   :  { %v1947_v44 = vpop.f32.mrb[23].mxu0 }
 0x3dd   :  { %6661 = vmatprep.mubr.msk.f32.mxu1 %vm2025_vm3, %v1947_v44  ;;  %v2517_v44 = vld [vmem:[%s10271_s14 + $0x40] sm:$0xff] }
 0x3de   :  { %2132 = vmatmul.mubr.f32.gmra.mrb[76].mxu1 %v1945_v43  ;;  %v7942_v43 = vpack.c.bf16 %v2516_v42, %v2515_v40  ;;  %v2710_v40 = vld [vmem:[#allocation7] sm:$0x1] }
 0x3df   :  { %v1951_v35 = vpop.f32.mrb[24].mxu0 }
 0x3e0   :  { %v1953_v46 = vpop.f32.mrb[25].mxu0  ;;  %7959 = vmatpush3.bf16.msra.mxu0 %v7942_v43 }
 0x3e1   :  { %6662 = vmatprep.mubr.msk.f32.mxu1 %vm2025_vm3, %v1953_v46  ;;  %7960 = vmatprep.subr.bf16.mxu0 %v8870_v0 }
 0x3e2   :  { %2137 = vmatmul.mubr.f32.gmra.mrb[78].mxu1 %v1951_v35  ;;  %v2518_v35 = vld [vmem:[%s10271_s14 + $0x48] sm:$0x7] }
 0x3e3   :  { %v1957_v47 = vpop.f32.mrb[26].mxu0  ;;  %v7945_v46 = vpack.c.bf16 %v2518_v35, %v2517_v44  ;;  %v2714_v44 = vld [vmem:[#allocation8] sm:$0x1] }
 0x3e4   :  { %v1959_v48 = vpop.f32.mrb[27].mxu0 }
 0x3e5   :  { %6663 = vmatprep.mubr.msk.f32.mxu1 %vm2025_vm3, %v1959_v48  ;;  %7963 = vmatpush3.bf16.msk.msra.mxu0 %vm9777_vm9, %v7945_v46 }
 0x3e6   :  { %2142 = vmatmul.mubr.f32.gmra.mrb[80].mxu1 %v1957_v47  ;;  %7210 = vmatprep.subr.mxu0 %v8871_v55  ;;  %v3493_v47 = vld [vmem:[%s10275_s7] sm:$0xff] }
 0x3e7   :  { %v1963_v49 = vpop.f32.mrb[28].mxu0 }
 0x3e8   :  { %v1965_v50 = vpop.f32.mrb[29].mxu0 }
 0x3e9   :  { %6664 = vmatprep.mubr.msk.f32.mxu1 %vm2025_vm3, %v1965_v50 }
 0x3ea   :  { %2147 = vmatmul.mubr.f32.gmra.mrb[82].mxu1 %v1963_v49 }
 0x3eb   :  { %v1969_v51 = vpop.f32.mrb[30].mxu0 }
 0x3ec   :  { %v1971_v52 = vpop.f32.mrb[31].mxu0 }
 0x3ed   :  { %6665 = vmatprep.mubr.msk.f32.mxu1 %vm2025_vm3, %v1971_v52 }
 0x3ee   :  { %2152 = vmatmul.mubr.f32.gmra.mrb[84].mxu1 %v1969_v51 }
 0x3ef   :  { %v1975_v4 = vpop.f32.mrb[32].mxu0 }
 0x3f0   :  { %v1977_v41 = vpop.f32.mrb[33].mxu0 }
 0x3f1   :  { %6666 = vmatprep.mubr.msk.f32.mxu1 %vm2025_vm3, %v1977_v41 }
 0x3f2   :  { %2157 = vmatmul.mubr.f32.gmra.mrb[86].mxu1 %v1975_v4 }
 0x3f3   :  { %v1981_v54 = vpop.f32.mrb[34].mxu0 }
 0x3f4   :  { %v1983_v45 = vpop.f32.mrb[35].mxu0 }
 0x3f5   :  { %6667 = vmatprep.mubr.msk.f32.mxu1 %vm2025_vm3, %v1983_v45 }
 0x3f6   :  { %2162 = vmatmul.mubr.f32.gmra.mrb[88].mxu1 %v1981_v54 }
 0x3f7   :  { %7083 = vmatprep.mubr.msk.f32.mxu1 %vm8872_vm4, %v8871_v55 }
 0x4a9   :  { %v2123_v6 = vpop.f32.mrb[72].mxu1 }
 0x4aa   :  { %v2125_v10 = vpop.f32.mrb[73].mxu1 }
 0x4ad   :  { %v2128_v53 = vpop.f32.mrb[74].mxu1 }
 0x4ae   :  { %v7897_v57 = vpack.c.bf16 %v2128_v53, %v2123_v6  ;;  %v2130_v58 = vpop.f32.mrb[75].mxu1 }
 0x4b0   :  { %7898 = vmatpush3.bf16.msra.mxu1 %v7897_v57 }
 0x4b1   :  { %v2133_v56 = vpop.f32.mrb[76].mxu1  ;;  %7899 = vmatprep.subr.bf16.mxu1 %v8870_v0 }
 0x4b2   :  { %v2135_v13 = vpop.f32.mrb[77].mxu1 }
 0x4b5   :  { %v2138_v59 = vpop.f32.mrb[78].mxu1 }
 0x4b6   :  { %v7900_v61 = vpack.c.bf16 %v2138_v59, %v2133_v56  ;;  %v2140_v17 = vpop.f32.mrb[79].mxu1 }
 0x4b8   :  { %7901 = vmatpush3.bf16.msra.mxu1 %v7900_v61 }
 0x4b9   :  { %v2143_v60 = vpop.f32.mrb[80].mxu1  ;;  %7902 = vmatprep.subr.bf16.mxu1 %v8870_v0 }
 0x4ba   :  { %v2145_v62 = vpop.f32.mrb[81].mxu1 }
 0x4bd   :  { %v2148_v20 = vpop.f32.mrb[82].mxu1 }
 0x4be   :  { %v7903_v63 = vpack.c.bf16 %v2148_v20, %v2143_v60  ;;  %v2150_v1 = vpop.f32.mrb[83].mxu1 }
 0x4c0   :  { %7904 = vmatpush3.bf16.msra.mxu1 %v7903_v63 }
 0x4c1   :  { %v2153_v23 = vpop.f32.mrb[84].mxu1  ;;  %7905 = vmatprep.subr.bf16.mxu1 %v8870_v0 }
 0x4c2   :  { %v2155_v2 = vpop.f32.mrb[85].mxu1 }
 0x4c5   :  { %v2158_v26 = vpop.f32.mrb[86].mxu1 }
 0x4c6   :  { %v7906_v3 = vpack.c.bf16 %v2158_v26, %v2153_v23  ;;  %v2160_v29 = vpop.f32.mrb[87].mxu1 }
 0x4c8   :  { %7907 = vmatpush3.bf16.msra.mxu1 %v7906_v3 }
 0x4c9   :  { %v2163_v7 = vpop.f32.mrb[88].mxu1  ;;  %7081 = vmatprep.subr.mxu1 %v8871_v55 }
 0x4ca   :  { %v2165_v5 = vpop.f32.mrb[89].mxu1 }
 0x4cc   :  { %7082 = vmatpush3.msk.msra.mxu1 %vm2194_vm5, %v2163_v7 }
 0x4cd   :  { %7084 = vmatmul.mubr.msk.f32.vlgmr.msra.gmra.mrb[90].mxu1 %vm2178_vm6, %v2173_v8  ;;  %7908 = vmatprep.subr.bf16.mxu1 %v8870_v0 }
 0x4ce   :  { %7910 = vmatpush3.bf16.msra.mxu1 %v7897_v57  ;;  %7086 = vmatprep.mubr.msk.f32.mxu1 %vm8872_vm4, %v8871_v55 }
 0x4cf   :  { %7911 = vmatprep.subr.bf16.mxu1 %v8870_v0 }
 0x4d1   :  { %7087 = vmatmul.mubr.msk.f32.gmra.mrb[92].mxu1 %vm2178_vm6, %v2174_v9 }
 0x4d2   :  { %7913 = vmatpush3.bf16.msra.mxu1 %v7900_v61  ;;  %7089 = vmatprep.mubr.msk.f32.mxu1 %vm8872_vm4, %v8871_v55 }
 0x4d3   :  { %7914 = vmatprep.subr.bf16.mxu1 %v8870_v0 }
 0x4d5   :  { %7090 = vmatmul.mubr.msk.f32.gmra.mrb[94].mxu1 %vm2178_vm6, %v2175_v11 }
 0x4d6   :  { %7916 = vmatpush3.bf16.msra.mxu1 %v7903_v63  ;;  %7092 = vmatprep.mubr.msk.f32.mxu1 %vm8872_vm4, %v8871_v55 }
 0x4d7   :  { %7917 = vmatprep.subr.bf16.mxu1 %v8870_v0 }
 0x4d9   :  { %7093 = vmatmul.mubr.msk.f32.gmra.mrb[96].mxu1 %vm2178_vm6, %v2176_v12 }
 0x4da   :  { %7919 = vmatpush3.bf16.msra.mxu1 %v7906_v3  ;;  %7095 = vmatprep.mubr.msk.f32.mxu1 %vm8872_vm4, %v8871_v55 }
 0x4db   :  { %7114 = vmatprep.subr.mxu1 %v8871_v55 }
 0x4dd   :  { %7096 = vmatmul.mubr.msk.f32.gmra.mrb[98].mxu1 %vm2178_vm6, %v2177_v14 }
 0x4de   :  { %7115 = vmatpush3.msk.msra.mxu1 %vm2194_vm5, %v2163_v7  ;;  %7116 = vmatprep.mubr.msk.f32.mxu1 %vm8872_vm4, %v8871_v55 }
 0x4df   :  { %7920 = vmatprep.subr.bf16.mxu1 %v8870_v0 }
 0x4e1   :  { %7117 = vmatmul.mubr.msk.f32.vlgmr.msra.gmra.mrb[90].mxu1 %vm2178_vm6, %v2167_v15 }
 0x4e2   :  { %7922 = vmatpush3.bf16.msra.mxu1 %v7897_v57  ;;  %7119 = vmatprep.mubr.msk.f32.mxu1 %vm8872_vm4, %v8871_v55 }
 0x4e3   :  { %7923 = vmatprep.subr.bf16.mxu1 %v8870_v0 }
 0x4e5   :  { %7120 = vmatmul.mubr.msk.f32.gmra.mrb[92].mxu1 %vm2178_vm6, %v2168_v18 }
 0x4e6   :  { %7925 = vmatpush3.bf16.msra.mxu1 %v7900_v61  ;;  %7122 = vmatprep.mubr.msk.f32.mxu1 %vm8872_vm4, %v8871_v55 }
 0x4e7   :  { %7926 = vmatprep.subr.bf16.mxu1 %v8870_v0 }
 0x4e9   :  { %7123 = vmatmul.mubr.msk.f32.gmra.mrb[94].mxu1 %vm2178_vm6, %v2169_v19 }
 0x4ea   :  { %7928 = vmatpush3.bf16.msra.mxu1 %v7903_v63  ;;  %7125 = vmatprep.mubr.msk.f32.mxu1 %vm8872_vm4, %v8871_v55 }
 0x4eb   :  { %7929 = vmatprep.subr.bf16.mxu1 %v8870_v0 }
 0x4ed   :  { %7126 = vmatmul.mubr.msk.f32.gmra.mrb[96].mxu1 %vm2178_vm6, %v2170_v21 }
 0x4ee   :  { %7931 = vmatpush3.bf16.msra.mxu1 %v7906_v3  ;;  %7128 = vmatprep.mubr.msk.f32.mxu1 %vm8872_vm4, %v8871_v55 }
 0x4ef   :  { %7147 = vmatprep.subr.mxu1 %v8871_v55 }
 0x4f1   :  { %7129 = vmatmul.mubr.msk.f32.gmra.mrb[98].mxu1 %vm2178_vm6, %v2171_v22 }
 0x4f2   :  { %7148 = vmatpush3.msk.msra.mxu1 %vm2194_vm5, %v2163_v7  ;;  %7149 = vmatprep.mubr.msk.f32.mxu1 %vm8872_vm4, %v8871_v55 }
 0x4f3   :  { %7932 = vmatprep.subr.bf16.mxu1 %v8870_v0 }
 0x4f5   :  { %7150 = vmatmul.mubr.msk.f32.vlgmr.msra.gmra.mrb[90].mxu1 %vm2178_vm6, %v2394_v16 }
 0x4f6   :  { %7152 = vmatprep.mubr.msk.f32.mxu1 %vm8872_vm4, %v8871_v55  ;;  %7934 = vmatpush3.bf16.msra.mxu1 %v7933_v33 }
 0x4f7   :  { %7935 = vmatprep.subr.bf16.mxu1 %v8870_v0 }
 0x4f9   :  { %7153 = vmatmul.mubr.msk.f32.gmra.mrb[92].mxu1 %vm2178_vm6, %v2395_v24 }
 0x4fa   :  { %7155 = vmatprep.mubr.msk.f32.mxu1 %vm8872_vm4, %v8871_v55  ;;  %7937 = vmatpush3.bf16.msra.mxu1 %v7936_v36 }
 0x4fb   :  { %7938 = vmatprep.subr.bf16.mxu1 %v8870_v0 }
 0x4fd   :  { %7156 = vmatmul.mubr.msk.f32.gmra.mrb[94].mxu1 %vm2178_vm6, %v2396_v25 }
 0x4fe   :  { %7158 = vmatprep.mubr.msk.f32.mxu1 %vm8872_vm4, %v8871_v55  ;;  %7940 = vmatpush3.bf16.msra.mxu1 %v7939_v39 }
 0x4ff   :  { %7941 = vmatprep.subr.bf16.mxu1 %v8870_v0 }
 0x501   :  { %7159 = vmatmul.mubr.msk.f32.gmra.mrb[96].mxu1 %vm2178_vm6, %v2397_v27 }
 0x502   :  { %7161 = vmatprep.mubr.msk.f32.mxu1 %vm8872_vm4, %v8871_v55  ;;  %7943 = vmatpush3.bf16.msra.mxu1 %v7942_v43 }
 0x503   :  { %7944 = vmatprep.subr.bf16.mxu1 %v8870_v0 }
 0x505   :  { %7162 = vmatmul.mubr.msk.f32.gmra.mrb[98].mxu1 %vm2178_vm6, %v2398_v30  ;;  %v2717_v30 = vld [vmem:[#allocation5] sm:$0x7]  ;;  %vm3500_vm6 = vcmask 449536  }
 0x506   :  { %7184 = vmatprep.mubr.msk.f32.mxu1 %vm8872_vm4, %v8871_v55  ;;  %7947 = vmatpush3.bf16.msk.msra.mxu1 %vm9777_vm9, %v7945_v46 }
 0x507   :  { %7964 = vmatprep.subr.bf16.mxu1 %v8870_v0 }
 0x5c8   :  { %v9787_v48 = vpop.f32.mrb[90].mxu1 }
 0x5c9   :  { %v7151_v49 = vpop.f32.mrb[91].mxu1  ;;  %v2536_v50 = vmul.f32 %v9787_v48, %v9787_v48  ;;  %v2520_v52 = vsel %vm2519_vm10, %v9787_v48, 0.0 }
 0x5ca   :  { %v2868_v49 = vlaneseq }
 0x5cb   :  { %v2541_v6 = vsel %vm2519_vm10, %v2536_v50, 0.0 }
 0x5cc   :  { %v9791_v51 = vpop.f32.mrb[92].mxu1  ;;  %v9829_v50 = vshrl.u32 %v2868_v49, 7 }
 0x5cd   :  { %v2521_v4 = vsel %vm2519_vm10, %v9791_v51, 0.0  ;;  %v2537_v41 = vmul.f32 %v9791_v51, %v9791_v51  ;;  %v7154_v54 = vpop.f32.mrb[93].mxu1 }
 0x5ce   :  { %v2522_v45 = vadd.f32 %v2521_v4, %v2520_v52  ;;  %v9832_v52 = vsub.s32 0, %v9829_v50 }
 0x5cf   :  { %v2542_v10 = vsel %vm2519_vm10, %v2537_v41, 0.0 }
 0x5d0   :  { %v2543_v53 = vadd.f32 %v2542_v10, %v2541_v6  ;;  %v9801_v57 = vpop.f32.mrb[94].mxu1 }
 0x5d1   :  { %v2523_v58 = vsel %vm2519_vm10, %v9801_v57, 0.0  ;;  %v2538_v56 = vmul.f32 %v9801_v57, %v9801_v57  ;;  %v7157_v13 = vpop.f32.mrb[95].mxu1 }
 0x5d2   :  { %v2524_v59 = vadd.f32 %v2523_v58, %v2522_v45 }
 0x5d3   :  { %v2544_v61 = vsel %vm2519_vm10, %v2538_v56, 0.0 }
 0x5d4   :  { %v2545_v17 = vadd.f32 %v2544_v61, %v2543_v53  ;;  %v9808_v60 = vpop.f32.mrb[96].mxu1 }
 0x5d5   :  { %v2525_v62 = vsel %vm2519_vm10, %v9808_v60, 0.0  ;;  %v2539_v20 = vmul.f32 %v9808_v60, %v9808_v60  ;;  %v7160_v63 = vpop.f32.mrb[97].mxu1 }
 0x5d6   :  { %v2526_v1 = vadd.f32 %v2525_v62, %v2524_v59 }
 0x5d7   :  { %v2546_v23 = vsel %vm2519_vm10, %v2539_v20, 0.0 }
 0x5d8   :  { %v2547_v2 = vadd.f32 %v2546_v23, %v2545_v17  ;;  %v2500_v26 = vpop.f32.mrb[98].mxu1 }
 0x5d9   :  { %v2528_v3 = vsel %vm2527_vm11, %v2500_v26, 0.0  ;;  %v2540_v29 = vmul.f32 %v2500_v26, %v2500_v26  ;;  %v7163_v7 = vpop.f32.mrb[99].mxu1 }
 0x5da   :  { %v2529_v5 = vadd.f32 %v2528_v3, %v2526_v1 }
 0x5db   :  { %v2548_v8 = vsel %vm2527_vm11, %v2540_v29, 0.0  ;;  %vm3956_vm11 = vcmask 146432  }
 0x5dc   :  { %v2530_v9 = vrot.slane %v2529_v5, 4  ;;  %v2549_v11 = vadd.f32 %v2548_v8, %v2547_v2  ;;  %v6702_v8 = vld [vmem:[%s10274_s2 + $0x50] sm:$0xff] }
 0x5de   :  { %v2531_v12 = vadd.f32 %v2530_v9, %v2529_v5  ;;  %v2550_v14 = vrot.slane %v2549_v11, 4  ;;  %v3007_v5 = vld [vmem:[#allocation10 + $0x18] sm:$0xff] }
 0x5df   :  { %v6703_v9 = vld [vmem:[%s10274_s2 + $0x58] sm:$0xff] }
 0x5e0   :  { %v2532_v15 = vrot.slane %v2531_v12, 2  ;;  %v2551_v18 = vadd.f32 %v2550_v14, %v2549_v11  ;;  %v7977_v14 = vpack.c.bf16 %v6703_v9, %v6702_v8  ;;  %v6727_v8 = vld [vmem:[%s10274_s2 + $0xb8] sm:$0xff] }
 0x5e2   :  { %v2533_v19 = vadd.f32 %v2532_v15, %v2531_v12  ;;  %v2552_v21 = vrot.slane %v2551_v18, 2  ;;  %v2901_v12 = vld [vmem:[#allocation10] sm:$0xff] }
 0x5e3   :  { %v3008_v15 = vld [vmem:[#allocation10 + $0x20] sm:$0xff] }
 0x5e4   :  { %v2534_v22 = vrot.slane %v2533_v19, 1  ;;  %v2553_v16 = vadd.f32 %v2552_v21, %v2551_v18  ;;  %v6704_v18 = vld [vmem:[%s10274_s2 + $0x60] sm:$0xff]  ;;  %v2902_v21 = vld [vmem:[#allocation10 + $0x8] sm:$0xff] }
 0x5e6   :  { %v2535_v24 = vadd.f32 %v2534_v22, %v2533_v19  ;;  %v2554_v25 = vrot.slane %v2553_v16, 1  ;;  %v6705_v19 = vld [vmem:[%s10274_s2 + $0x68] sm:$0xff] }
 0x5e7   :  { %v7980_v22 = vpack.c.bf16 %v6705_v19, %v6704_v18  ;;  %v6730_v19 = vld [vmem:[%s10274_s2 + $0xd0] sm:$0xff] }
 0x5e8   :  { %v2555_v27 = vadd.f32 %v2554_v25, %v2553_v16  ;;  %7185 = vmatmul.mubr.msk.f32.vlgmr.msra.gmra.mrb[100].mxu1 %vm2519_vm10, %v2535_v24  ;;  %v3009_v16 = vld [vmem:[#allocation10 + $0x28] sm:$0x3]  ;;  %v6706_v24 = vld [vmem:[%s10274_s2 + $0x70] sm:$0xff]  ;;  %v6707_v25 = vld [vmem:[%s10274_s2 + $0x78] sm:$0xff] }
 0x5e9   :  { %7230 = vmatprep.mubr.msk.f32.mxu1 %vm8872_vm4, %v8871_v55 }
 0x5ea   :  { %7208 = vmatmul.mubr.msk.f32.vlgmr.msra.gmra.mrb[36].mxu0 %vm2519_vm10, %v2555_v27  ;;  %v2903_v27 = vld [vmem:[#allocation10 + $0x10] sm:$0x3] }
 0x5eb   :  { %7212 = vmatprep.mubr.msk.f32.mxu0 %vm8872_vm4, %v8871_v55  ;;  %7211 = vmatpush3.msk.msra.mxu0 %vm2559_vm7, %v2717_v30 }
 0x5ec   :  { %7215 = vmatprep.subr.mxu0 %v8871_v55 }
 0x6bb   :  { %v2629_v31 = vpop.f32.mrb[100].mxu1 }
 0x6bc   :  { %v2633_v32 = vmul.f32 0.0011764705, %v2629_v31  ;;  %v7186_v33 = vpop.f32.mrb[101].mxu1  ;;  %v3295_v31 = vld [vmem:[#allocation10 + $0x30] sm:$0xff] }
 0x6bd   :  { %v2703_v28 = vpop.f32.mrb[36].mxu0  ;;  %v6709_v33 = vld [vmem:[%s10274_s2 + $0x88] sm:$0xff] }
 0x6be   :  { %v2708_v34 = vmul.f32 %v2633_v32, %v2633_v32  ;;  %v2707_v36 = vmul.f32 0.0011764705, %v2703_v28  ;;  %v7209_v37 = vpop.f32.mrb[37].mxu0 }
 0x6bf   :  { %v6711_v37 = vld [vmem:[%s10274_s2 + $0x98] sm:$0x7] }
 0x6c0   :  { %v2709_v38 = vsub.f32 %v2707_v36, %v2708_v34  ;;  %v3296_v34 = vld [vmem:[#allocation10 + $0x38] sm:$0xff]  ;;  %v6710_v36 = vld [vmem:[%s10274_s2 + $0x90] sm:$0xff] }
 0x6c2   :  { %v2711_v39 = vadd.f32 1e-05, %v2709_v38  ;;  %v7989_v38 = vpack.c.bf16 %v6711_v37, %v6710_v36  ;;  %v3499_v37 = vld [vmem:[%s10275_s7 + $0x30] sm:$0x7f] }
 0x6c4   :  { %8393 = vrsqrt.f32 %v2711_v39  ;;  %v3297_v39 = vld [vmem:[#allocation10 + $0x40] sm:$0x3] }
 0x6ce   :  { %v8394_v42 = vpop.eup %8393 }
 0x6cf   :  { %v2713_v43 = vmul.f32 %v8394_v42, %v2710_v40  ;;  %v2996_v40 = vld [vmem:[%s10274_s2] sm:$0xff]  ;;  %v2997_v42 = vld [vmem:[%s10274_s2 + $0x8] sm:$0xff] }
 0x6d1   :  { %7213 = vmatmul.mubr.msk.f32.vlgmr.msra.gmra.mrb[38].mxu0 %vm2718_vm12, %v2713_v43  ;;  %v2715_v35 = vmul.f32 %v2713_v43, %v2633_v32  ;;  %v6708_v32 = vld [vmem:[%s10274_s2 + $0x80] sm:$0xff]  ;;  %v7993_v43 = vpack.c.bf16 %v2997_v42, %v2996_v40 }
 0x6d2   :  { %7216 = vmatpush3.msk.msra.mxu0 %vm2559_vm7, %v2717_v30  ;;  %7217 = vmatprep.mubr.msk.f32.mxu0 %vm8872_vm4, %v8871_v55  ;;  %v7983_v30 = vpack.c.bf16 %v6707_v25, %v6706_v24  ;;  %v7986_v28 = vpack.c.bf16 %v6709_v33, %v6708_v32  ;;  %v6733_v24 = vld [vmem:[%s10274_s2 + $0xe8] sm:$0x7]  ;;  %v3496_v32 = vld [vmem:[%s10275_s7 + $0x18] sm:$0xff]  ;;  %vm3504_vm7 = vcmask 443392  }
 0x6d3   :  { %v2716_v46 = vsub.f32 %v2714_v44, %v2715_v35  ;;  %7970 = vmatprep.subr.bf16.mxu0 %v8870_v0  ;;  %v2998_v44 = vld [vmem:[%s10274_s2 + $0x10] sm:$0xff]  ;;  %v2999_v35 = vld [vmem:[%s10274_s2 + $0x18] sm:$0xff] }
 0x6d5   :  { %7218 = vmatmul.mubr.msk.f32.vlgmr.msra.gmra.mrb[40].mxu0 %vm2718_vm12, %v2716_v46 }
 0x6d6   :  { %7249 = vmatprep.mubr.msk.f32.mxu0 %vm8872_vm4, %v8871_v55 }
 0x7a4   :  { %v2791_v4 = vpop.f32.mrb[38].mxu0 }
 0x7a5   :  { %v2871_v41 = vrot.slane %v2791_v4, %v9832_v52  ;;  %v7214_v54 = vpop.f32.mrb[39].mxu0  ;;  %v7996_v4 = vpack.c.bf16 %v2999_v35, %v2998_v44 }
 0x7a6   :  { %v3000_v54 = vld [vmem:[%s10274_s2 + $0x20] sm:$0xff] }
 0x7a7   :  { %v2872_v45 = vmul.f32 %v2871_v41, %v9787_v48  ;;  %v2873_v6 = vmul.f32 %v2871_v41, %v9791_v51  ;;  %v2874_v10 = vmul.f32 %v2871_v41, %v9801_v57  ;;  %v2875_v53 = vmul.f32 %v2871_v41, %v9808_v60 }
 0x7a8   :  { %v2864_v58 = vpop.f32.mrb[40].mxu0  ;;  %v2876_v56 = vmul.f32 %v2871_v41, %v2500_v26 }
 0x7a9   :  { %v2880_v13 = vrot.slane %v2864_v58, %v9832_v52  ;;  %v7219_v59 = vpop.f32.mrb[41].mxu0 }
 0x7aa   :  { %v3003_v59 = vld [vmem:[%s10274_s2 + $0x38] sm:$0xff] }
 0x7ab   :  { %v2881_v61 = vadd.f32 %v2880_v13, %v2872_v45  ;;  %v2882_v17 = vadd.f32 %v2880_v13, %v2873_v6  ;;  %v2883_v62 = vadd.f32 %v2880_v13, %v2874_v10  ;;  %v2884_v20 = vadd.f32 %v2880_v13, %v2875_v53  ;;  %v3001_v45 = vld [vmem:[%s10274_s2 + $0x28] sm:$0xff] }
 0x7ac   :  { %v2885_v63 = vadd.f32 %v2880_v13, %v2876_v56  ;;  %v7999_v58 = vpack.c.bf16 %v3001_v45, %v3000_v54  ;;  %v3002_v13 = vld [vmem:[%s10274_s2 + $0x30] sm:$0xff] }
 0x7ad   :  { %vm2886_vm13 = vcmp.ge.f32.partialorder %v2881_v61, 0.0  ;;  %vm2887_vm14 = vcmp.ge.f32.partialorder %v2882_v17, 0.0  ;;  %v2891_v1 = vmul.f32 0.2, %v2881_v61  ;;  %v2892_v48 = vmul.f32 0.2, %v2882_v17 }
 0x7ae   :  { %vm2888_vm15 = vcmp.ge.f32.partialorder %v2883_v62, 0.0  ;;  %vm2889_vm1 = vcmp.ge.f32.partialorder %v2884_v20, 0.0  ;;  %v2893_v51 = vmul.f32 0.2, %v2883_v62  ;;  %v2894_v57 = vmul.f32 0.2, %v2884_v20 }
 0x7af   :  { %v2896_v23 = vsel %vm2886_vm13, %v2881_v61, %v2891_v1  ;;  %v2897_v60 = vsel %vm2887_vm14, %v2882_v17, %v2892_v48  ;;  %v2895_v7 = vmul.f32 0.2, %v2885_v63  ;;  %vm2890_vm5 = vcmp.ge.f32.partialorder %v2885_v63, 0.0  ;;  %v3004_v1 = vld [vmem:[%s10274_s2 + $0x40] sm:$0xff]  ;;  %v3005_v48 = vld [vmem:[%s10274_s2 + $0x48] sm:$0x7] }
 0x7b0   :  { %v7965_v2 = vpack.c.bf16 %v2897_v60, %v2896_v23  ;;  %v2898_v26 = vsel %vm2888_vm15, %v2883_v62, %v2893_v51  ;;  %v2899_v3 = vsel %vm2889_vm1, %v2884_v20, %v2894_v57  ;;  %v8002_v20 = vpack.c.bf16 %v3003_v59, %v3002_v13 }
 0x7b1   :  { %v7968_v29 = vpack.c.bf16 %v2899_v3, %v2898_v26  ;;  %v2900_v11 = vsel %vm2890_vm5, %v2885_v63, %v2895_v7  ;;  %v8005_v60 = vpack.c.bf16 %v3005_v48, %v3004_v1  ;;  %v6725_v26 = vld [vmem:[%s10274_s2 + $0xa8] sm:$0xff]  ;;  %vm4348_vm13 = vcmask 1040384  }
 0x7b2   :  { %7966 = vmatpush3.bf16.msra.mxu1 %v7965_v2  ;;  %7972 = vmatpush3.bf16.msra.mxu0 %v7965_v2  ;;  %vm10062_vm14 = vmpackc.low %vm4348_vm13, %vm8873_vm8  ;;  %vm4344_vm15 = vcmask 203776   ;;  %vm4660_vm8 = vcmask 326656   ;;  %vm5461_vm1 = vcmask 654336   ;;  %vm6324_vm5 = vcmask 257024  }
 0x7b3   :  { %7967 = vmatprep.subr.bf16.mxu1 %v8870_v0  ;;  %7973 = vmatprep.subr.bf16.mxu0 %v8870_v0 }
 0x7b6   :  { %7969 = vmatpush3.bf16.msra.mxu1 %v7968_v29  ;;  %7975 = vmatpush3.bf16.msra.mxu0 %v7968_v29 }
 0x7b7   :  { %7228 = vmatprep.subr.mxu1 %v8871_v55  ;;  %7247 = vmatprep.subr.mxu0 %v8871_v55 }
 0x7ba   :  { %7229 = vmatpush3.msk.msra.mxu1 %vm2053_vm2, %v2900_v11  ;;  %7248 = vmatpush3.msk.msra.mxu0 %vm2053_vm2, %v2900_v11 }
 0x7bb   :  { %7250 = vmatmul.mubr.msk.f32.vlgmr.msra.gmra.mrb[42].mxu0 %vm2025_vm3, %v3007_v5  ;;  %8008 = vmatprep.subr.bf16.mxu0 %v8870_v0  ;;  %v6726_v5 = vld [vmem:[%s10274_s2 + $0xb0] sm:$0xff] }
 0x7bc   :  { %8010 = vmatpush3.bf16.msra.mxu0 %v7965_v2  ;;  %7252 = vmatprep.mubr.msk.f32.mxu0 %vm8872_vm4, %v8871_v55  ;;  %v6724_v2 = vld [vmem:[%s10274_s2 + $0xa0] sm:$0xff] }
 0x7bd   :  { %8011 = vmatprep.subr.bf16.mxu0 %v8870_v0  ;;  %7231 = vmatmul.mubr.msk.f32.vlgmr.msra.gmra.mrb[102].mxu1 %vm2025_vm3, %v2901_v12  ;;  %v8015_v7 = vpack.c.bf16 %v6725_v26, %v6724_v2  ;;  %v8018_v12 = vpack.c.bf16 %v6727_v8, %v6726_v5  ;;  %v3688_v2 = vld [vmem:[#allocation11] sm:$0x1f]  ;;  %v3854_v26 = vld [vmem:[%s10276_s30] sm:$0xff] }
 0x7be   :  { %7233 = vmatprep.mubr.msk.f32.mxu1 %vm8872_vm4, %v8871_v55  ;;  %7976 = vmatprep.subr.bf16.mxu1 %v8870_v0 }
 0x7bf   :  { %7253 = vmatmul.mubr.msk.f32.gmra.mrb[44].mxu0 %vm2025_vm3, %v3008_v15  ;;  %7978 = vmatpush3.bf16.msra.mxu1 %v7977_v14  ;;  %v6728_v14 = vld [vmem:[%s10274_s2 + $0xc0] sm:$0xff]  ;;  %v6729_v15 = vld [vmem:[%s10274_s2 + $0xc8] sm:$0xff] }
 0x7c0   :  { %8013 = vmatpush3.bf16.msra.mxu0 %v7968_v29  ;;  %7255 = vmatprep.mubr.msk.f32.mxu0 %vm8872_vm4, %v8871_v55  ;;  %v8021_v18 = vpack.c.bf16 %v6729_v15, %v6728_v14 }
 0x7c1   :  { %7324 = vmatprep.subr.mxu0 %v8871_v55  ;;  %7234 = vmatmul.mubr.msk.f32.gmra.mrb[104].mxu1 %vm2025_vm3, %v2902_v21  ;;  %v6731_v21 = vld [vmem:[%s10274_s2 + $0xd8] sm:$0xff] }
 0x7c2   :  { %7236 = vmatprep.mubr.msk.f32.mxu1 %vm8872_vm4, %v8871_v55  ;;  %7979 = vmatprep.subr.bf16.mxu1 %v8870_v0 }
 0x7c3   :  { %7256 = vmatmul.mubr.msk.f32.gmra.mrb[46].mxu0 %vm2025_vm3, %v3009_v16  ;;  %7981 = vmatpush3.bf16.msra.mxu1 %v7980_v22  ;;  %v8024_v22 = vpack.c.bf16 %v6731_v21, %v6730_v19  ;;  %v6732_v16 = vld [vmem:[%s10274_s2 + $0xe0] sm:$0xff]  ;;  %v3681_v19 = vld [vmem:[#allocation13] sm:$0x1] }
 0x7c4   :  { %7325 = vmatpush3.msk.msra.mxu0 %vm2053_vm2, %v2900_v11  ;;  %7326 = vmatprep.mubr.msk.f32.mxu0 %vm8872_vm4, %v8871_v55  ;;  %v8027_v25 = vpack.c.bf16 %v6733_v24, %v6732_v16  ;;  %v3685_v16 = vld [vmem:[#allocation14] sm:$0x1] }
 0x7c5   :  { %7237 = vmatmul.mubr.msk.f32.gmra.mrb[106].mxu1 %vm2025_vm3, %v2903_v27  ;;  %7982 = vmatprep.subr.bf16.mxu1 %v8870_v0  ;;  %v3494_v27 = vld [vmem:[%s10275_s7 + $0x8] sm:$0xff] }
 0x7c6   :  { %7278 = vmatprep.mubr.msk.f32.mxu1 %vm8872_vm4, %v8871_v55  ;;  %8030 = vmatprep.subr.bf16.mxu0 %v8870_v0 }
 0x7c7   :  { %7327 = vmatmul.mubr.msk.f32.vlgmr.msra.gmra.mrb[48].mxu0 %vm2025_vm3, %v3295_v31  ;;  %7984 = vmatpush3.bf16.msra.mxu1 %v7983_v30  ;;  %v8031_v30 = vpack.c.bf16 %v3494_v27, %v3493_v47  ;;  %v3495_v31 = vld [vmem:[%s10275_s7 + $0x10] sm:$0xff]  ;;  %v3857_v27 = vld [vmem:[%s10276_s30 + $0x18] sm:$0xff] }
 0x7c8   :  { %7329 = vmatprep.mubr.msk.f32.mxu0 %vm8872_vm4, %v8871_v55  ;;  %7985 = vmatprep.subr.bf16.mxu1 %v8870_v0  ;;  %v8034_v33 = vpack.c.bf16 %v3496_v32, %v3495_v31  ;;  %v3856_v47 = vld [vmem:[%s10276_s30 + $0x10] sm:$0xff]  ;;  %v3858_v31 = vld [vmem:[%s10276_s30 + $0x20] sm:$0xff]  ;;  %v3859_v32 = vld [vmem:[%s10276_s30 + $0x28] sm:$0xff] }
 0x7c9   :  { %8032 = vmatpush3.bf16.msra.mxu0 %v8031_v30 }
 0x7ca   :  { %8033 = vmatprep.subr.bf16.mxu0 %v8870_v0 }
 0x7cb   :  { %7330 = vmatmul.mubr.msk.f32.gmra.mrb[50].mxu0 %vm2025_vm3, %v3296_v34  ;;  %7987 = vmatpush3.bf16.msra.mxu1 %v7986_v28  ;;  %v3497_v28 = vld [vmem:[%s10275_s7 + $0x20] sm:$0xff]  ;;  %v3498_v34 = vld [vmem:[%s10275_s7 + $0x28] sm:$0xff] }
 0x7cc   :  { %7332 = vmatprep.mubr.msk.f32.mxu0 %vm8872_vm4, %v8871_v55  ;;  %7988 = vmatprep.subr.bf16.mxu1 %v8870_v0  ;;  %v8037_v36 = vpack.c.bf16 %v3498_v34, %v3497_v28  ;;  %v3860_v28 = vld [vmem:[%s10276_s30 + $0x30] sm:$0x7f] }
 0x7cd   :  { %8035 = vmatpush3.bf16.msra.mxu0 %v8034_v33 }
 0x7ce   :  { %8036 = vmatprep.subr.bf16.mxu0 %v8870_v0 }
 0x7cf   :  { %7333 = vmatmul.mubr.msk.f32.gmra.mrb[52].mxu0 %vm2025_vm3, %v3297_v39  ;;  %7991 = vmatpush3.bf16.msk.msra.mxu1 %vm9777_vm9, %v7989_v38  ;;  %vm3530_vm3 = vcmask 1046528  }
 0x7d0   :  { %7992 = vmatprep.subr.bf16.mxu1 %v8870_v0  ;;  %7378 = vmatprep.mubr.msk.f32.mxu0 %vm8872_vm4, %v8871_v55 }
 0x7d1   :  { %8038 = vmatpush3.bf16.msra.mxu0 %v8037_v36 }
 0x7d2   :  { %7376 = vmatprep.subr.mxu0 %v8871_v55 }
 0x7d5   :  { %7377 = vmatpush3.msk.msra.mxu0 %vm3530_vm3, %v3499_v37 }
 0x7d6   :  { %8039 = vmatprep.subr.bf16.mxu0 %v8870_v0 }
 0x88e   :  { %v3085_v46 = vpop.f32.mrb[42].mxu0 }
 0x88f   :  { %7279 = vmatmul.mubr.msk.f32.vlgmr.msra.gmra.mrb[108].mxu1 %vm2519_vm10, %v3085_v46  ;;  %v7251_v49 = vpop.f32.mrb[43].mxu0 }
 0x890   :  { %7994 = vmatpush3.bf16.msra.mxu1 %v7993_v43  ;;  %7281 = vmatprep.mubr.msk.f32.mxu1 %vm8872_vm4, %v8871_v55  ;;  %v2982_v41 = vpop.f32.mrb[102].mxu1 }
 0x891   :  { %7995 = vmatprep.subr.bf16.mxu1 %v8870_v0  ;;  %v7232_v6 = vpop.f32.mrb[103].mxu1 }
 0x892   :  { %v3090_v10 = vpop.f32.mrb[44].mxu0 }
 0x893   :  { %7282 = vmatmul.mubr.msk.f32.gmra.mrb[110].mxu1 %vm2519_vm10, %v3090_v10  ;;  %v7254_v53 = vpop.f32.mrb[45].mxu0 }
 0x894   :  { %7997 = vmatpush3.bf16.msra.mxu1 %v7996_v4  ;;  %7284 = vmatprep.mubr.msk.f32.mxu1 %vm8872_vm4, %v8871_v55  ;;  %v2987_v56 = vpop.f32.mrb[104].mxu1 }
 0x895   :  { %7998 = vmatprep.subr.bf16.mxu1 %v8870_v0  ;;  %v7235_v61 = vpop.f32.mrb[105].mxu1 }
 0x896   :  { %v3095_v17 = vpop.f32.mrb[46].mxu0 }
 0x897   :  { %7285 = vmatmul.mubr.msk.f32.gmra.mrb[112].mxu1 %vm2519_vm10, %v3095_v17  ;;  %v7257_v62 = vpop.f32.mrb[47].mxu0 }
 0x898   :  { %8000 = vmatpush3.bf16.msra.mxu1 %v7999_v58  ;;  %7307 = vmatprep.mubr.msk.f32.mxu1 %vm8872_vm4, %v8871_v55  ;;  %v2992_v63 = vpop.f32.mrb[106].mxu1 }
 0x899   :  { %8001 = vmatprep.subr.bf16.mxu1 %v8870_v0  ;;  %v7238_v51 = vpop.f32.mrb[107].mxu1 }
 0x89a   :  { %v3373_v57 = vpop.f32.mrb[48].mxu0 }
 0x89b   :  { %v7328_v23 = vpop.f32.mrb[49].mxu0 }
 0x89c   :  { %8003 = vmatpush3.bf16.msra.mxu1 %v8002_v20 }
 0x89d   :  { %8004 = vmatprep.subr.bf16.mxu1 %v8870_v0 }
 0x89e   :  { %v3378_v3 = vpop.f32.mrb[50].mxu0 }
 0x89f   :  { %v7331_v29 = vpop.f32.mrb[51].mxu0 }
 0x8a0   :  { %8007 = vmatpush3.bf16.msk.msra.mxu1 %vm9777_vm9, %v8005_v60 }
 0x8a1   :  { %8014 = vmatprep.subr.bf16.mxu1 %v8870_v0 }
 0x8a2   :  { %v3383_v9 = vpop.f32.mrb[52].mxu0 }
 0x8a3   :  { %7308 = vmatmul.mubr.msk.f32.vlgmr.msra.gmra.mrb[108].mxu1 %vm2519_vm10, %v2982_v41  ;;  %v7334_v11 = vpop.f32.mrb[53].mxu0 }
 0x8a4   :  { %8016 = vmatpush3.bf16.msra.mxu1 %v8015_v7  ;;  %7310 = vmatprep.mubr.msk.f32.mxu1 %vm8872_vm4, %v8871_v55 }
 0x8a5   :  { %8017 = vmatprep.subr.bf16.mxu1 %v8870_v0 }
 0x8a7   :  { %7311 = vmatmul.mubr.msk.f32.gmra.mrb[110].mxu1 %vm2519_vm10, %v2987_v56 }
 0x8a8   :  { %8019 = vmatpush3.bf16.msra.mxu1 %v8018_v12  ;;  %7313 = vmatprep.mubr.msk.f32.mxu1 %vm8872_vm4, %v8871_v55 }
 0x8a9   :  { %8020 = vmatprep.subr.bf16.mxu1 %v8870_v0 }
 0x8ab   :  { %7314 = vmatmul.mubr.msk.f32.gmra.mrb[112].mxu1 %vm2519_vm10, %v2992_v63 }
 0x8ac   :  { %8022 = vmatpush3.bf16.msra.mxu1 %v8021_v18  ;;  %7355 = vmatprep.mubr.msk.f32.mxu1 %vm8872_vm4, %v8871_v55 }
 0x8ad   :  { %8023 = vmatprep.subr.bf16.mxu1 %v8870_v0 }
 0x8b0   :  { %8025 = vmatpush3.bf16.msra.mxu1 %v8024_v22 }
 0x8b1   :  { %8026 = vmatprep.subr.bf16.mxu1 %v8870_v0 }
 0x8b4   :  { %8029 = vmatpush3.bf16.msk.msra.mxu1 %vm9777_vm9, %v8027_v25  ;;  %vm3693_vm9 = vcmask 1044480  }
 0x8b5   :  { %8048 = vmatprep.subr.bf16.mxu1 %v8870_v0 }
 0x8b7   :  { %7356 = vmatmul.mubr.msk.f32.vlgmr.msra.gmra.mrb[108].mxu1 %vm2519_vm10, %v3373_v57 }
 0x8b8   :  { %7358 = vmatprep.mubr.msk.f32.mxu1 %vm8872_vm4, %v8871_v55 }
 0x8bb   :  { %7359 = vmatmul.mubr.msk.f32.gmra.mrb[110].mxu1 %vm2519_vm10, %v3378_v3  ;;  %v3855_v3 = vld [vmem:[%s10276_s30 + $0x8] sm:$0xff] }
 0x8bc   :  { %7361 = vmatprep.mubr.msk.f32.mxu1 %vm8872_vm4, %v8871_v55  ;;  %v8049_v29 = vpack.c.bf16 %v3855_v3, %v3854_v26  ;;  %v4342_v26 = vld [vmem:[#allocation19 + $0x30] sm:$0xff]  ;;  %v4343_v3 = vld [vmem:[#allocation19 + $0x38] sm:$0x1] }
 0x8be   :  { %8050 = vmatpush3.bf16.msra.mxu1 %v8049_v29  ;;  %v8070_v29 = vpack.c.bf16 %v4343_v3, %v4342_v26 }
 0x8bf   :  { %7362 = vmatmul.mubr.msk.f32.gmra.mrb[112].mxu1 %vm2519_vm10, %v3383_v9  ;;  %8051 = vmatprep.subr.bf16.mxu1 %v8870_v0  ;;  %vm3689_vm10 = vcmask 39936  }
 0x8c0   :  { %7422 = vmatprep.mubr.msk.f32.mxu1 %vm8872_vm4, %v8871_v55 }
 0x98a   :  { %v9969_v38 = vpop.f32.mrb[108].mxu1 }
 0x98b   :  { %v7357_v39 = vpop.f32.mrb[109].mxu1  ;;  %v3513_v40 = vmul.f32 %v9969_v38, %v9969_v38  ;;  %v3501_v43 = vsel %vm3500_vm6, %v9969_v38, 0.0 }
 0x98d   :  { %v3516_v4 = vsel %vm3500_vm6, %v3513_v40, 0.0 }
 0x98e   :  { %v9973_v42 = vpop.f32.mrb[110].mxu1 }
 0x98f   :  { %v3502_v44 = vsel %vm3500_vm6, %v9973_v42, 0.0  ;;  %v3514_v35 = vmul.f32 %v9973_v42, %v9973_v42  ;;  %v7360_v46 = vpop.f32.mrb[111].mxu1 }
 0x990   :  { %v3503_v49 = vadd.f32 %v3502_v44, %v3501_v43 }
 0x991   :  { %v3517_v41 = vsel %vm3500_vm6, %v3514_v35, 0.0 }
 0x992   :  { %v3518_v54 = vadd.f32 %v3517_v41, %v3516_v4  ;;  %v9983_v45 = vpop.f32.mrb[112].mxu1 }
 0x993   :  { %v3505_v6 = vsel %vm3504_vm7, %v9983_v45, 0.0  ;;  %v3515_v10 = vmul.f32 %v9983_v45, %v9983_v45  ;;  %v7363_v53 = vpop.f32.mrb[113].mxu1 }
 0x994   :  { %v3506_v58 = vadd.f32 %v3505_v6, %v3503_v49 }
 0x995   :  { %v3519_v56 = vsel %vm3504_vm7, %v3515_v10, 0.0 }
 0x996   :  { %v3507_v13 = vrot.slane %v3506_v58, 4  ;;  %v3520_v59 = vadd.f32 %v3519_v56, %v3518_v54  ;;  %v3955_v56 = vld [vmem:[#allocation16 + $0x8] sm:$0xff] }
 0x998   :  { %v3508_v61 = vadd.f32 %v3507_v13, %v3506_v58  ;;  %v3521_v62 = vrot.slane %v3520_v59, 4  ;;  %v3953_v58 = vld [vmem:[#allocation16] sm:$0xff]  ;;  %v4107_v13 = vld [vmem:[#allocation16 + $0x10] sm:$0xff] }
 0x99a   :  { %v3509_v17 = vrot.slane %v3508_v61, 2  ;;  %v3522_v1 = vadd.f32 %v3521_v62, %v3520_v59  ;;  %v4340_v59 = vld [vmem:[#allocation19 + $0x20] sm:$0xff] }
 0x99c   :  { %v3510_v20 = vadd.f32 %v3509_v17, %v3508_v61  ;;  %v3523_v51 = vrot.slane %v3522_v1, 2  ;;  %v4341_v61 = vld [vmem:[#allocation19 + $0x28] sm:$0xff] }
 0x99d   :  { %v8067_v17 = vpack.c.bf16 %v4341_v61, %v4340_v59 }
 0x99e   :  { %v3511_v63 = vrot.slane %v3510_v20, 1  ;;  %v3524_v57 = vadd.f32 %v3523_v51, %v3522_v1 }
 0x9a0   :  { %v3512_v48 = vadd.f32 %v3511_v63, %v3510_v20  ;;  %v3525_v23 = vrot.slane %v3524_v57, 1 }
 0x9a2   :  { %7379 = vmatmul.mubr.msk.f32.vlgmr.msra.gmra.mrb[54].mxu0 %vm3500_vm6, %v3512_v48  ;;  %v3526_v60 = vadd.f32 %v3525_v23, %v3524_v57  ;;  %v4185_v57 = vld [vmem:[#allocation17] sm:$0xff] }
 0x9a3   :  { %8041 = vmatpush3.bf16.msra.mxu0 %v8031_v30  ;;  %7395 = vmatprep.mubr.msk.f32.mxu0 %vm8872_vm4, %v8871_v55  ;;  %v8052_v30 = vpack.c.bf16 %v3857_v27, %v3856_v47  ;;  %v4576_v27 = vld [vmem:[#allocation19 + $0x50] sm:$0xff] }
 0x9a4   :  { %8042 = vmatprep.subr.bf16.mxu0 %v8870_v0 }
 0x9a5   :  { %8053 = vmatpush3.bf16.msra.mxu1 %v8052_v30  ;;  %v4577_v30 = vld [vmem:[#allocation19 + $0x58] sm:$0x1] }
 0x9a6   :  { %8054 = vmatprep.subr.bf16.mxu1 %v8870_v0 }
 0x9a7   :  { %8044 = vmatpush3.bf16.msra.mxu0 %v8034_v33  ;;  %v8055_v33 = vpack.c.bf16 %v3859_v32, %v3858_v31  ;;  %v8084_v31 = vpack.c.bf16 %v4577_v30, %v4576_v27  ;;  %v4655_v32 = vld [vmem:[%s10279_s19] sm:$0xff]  ;;  %v6775_v27 = vld [vmem:[%s10281_s0 + $0x48] sm:$0xff] }
 0x9a8   :  { %8045 = vmatprep.subr.bf16.mxu0 %v8870_v0  ;;  %v5451_v30 = vld [vmem:[%s10282_s20] sm:$0xff] }
 0x9a9   :  { %8056 = vmatpush3.bf16.msra.mxu1 %v8055_v33  ;;  %v4656_v33 = vld [vmem:[%s10279_s19 + $0x8] sm:$0xff] }
 0x9aa   :  { %7420 = vmatprep.subr.mxu1 %v8871_v55 }
 0x9ab   :  { %8047 = vmatpush3.bf16.msra.mxu0 %v8037_v36 }
 0x9ac   :  { %7393 = vmatprep.subr.mxu0 %v8871_v55 }
 0x9ad   :  { %7421 = vmatpush3.msk.msra.mxu1 %vm3530_vm3, %v3860_v28  ;;  %v8088_v28 = vpack.c.bf16 %v4656_v33, %v4655_v32  ;;  %v5453_v32 = vld [vmem:[%s10282_s20 + $0x10] sm:$0xff] }
 0x9ae   :  { %8060 = vmatprep.subr.bf16.mxu1 %v8870_v0 }
 0x9af   :  { %7394 = vmatpush3.msk.msra.mxu0 %vm3530_vm3, %v3499_v37  ;;  %vm6359_vm3 = vcmask 261124  }
 0x9b0   :  { %7396 = vmatmul.mubr.msk.f32.vlgmr.msra.gmra.mrb[56].mxu0 %vm3500_vm6, %v3526_v60  ;;  %7398 = vmatprep.subr.mxu0 %v8871_v55  ;;  %v4265_v60 = vld [vmem:[#allocation17 + $0x8] sm:$0xff] }
 0x9b1   :  { %7400 = vmatprep.mubr.msk.f32.mxu0 %vm8872_vm4, %v8871_v55  ;;  %7399 = vmatpush3.msk.msra.mxu0 %vm3693_vm9, %v3688_v2 }
 0x9b2   :  { %7403 = vmatprep.subr.mxu0 %v8871_v55 }
 0xa75   :  { %v3600_v7 = vpop.f32.mrb[54].mxu0 }
 0xa76   :  { %v7380_v5 = vpop.f32.mrb[55].mxu0  ;;  %v3604_v8 = vmul.f32 0.005050505, %v3600_v7 }
 0xa77   :  { %v4260_v5 = vld [vmem:[#allocation19] sm:$0xff] }
 0xa78   :  { %v3679_v11 = vmul.f32 %v3604_v8, %v3604_v8 }
 0xa83   :  { %v3674_v9 = vpop.f32.mrb[56].mxu0 }
 0xa84   :  { %v3678_v12 = vmul.f32 0.005050505, %v3674_v9  ;;  %v7397_v14 = vpop.f32.mrb[57].mxu0 }
 0xa85   :  { %v4262_v14 = vld [vmem:[#allocation19 + $0x10] sm:$0xff] }
 0xa86   :  { %v3680_v15 = vsub.f32 %v3678_v12, %v3679_v11 }
 0xa88   :  { %v3682_v18 = vadd.f32 1e-05, %v3680_v15  ;;  %v4263_v15 = vld [vmem:[#allocation19 + $0x18] sm:$0x1] }
 0xa8a   :  { %8395 = vrsqrt.f32 %v3682_v18 }
 0xa94   :  { %v8396_v21 = vpop.eup %8395 }
 0xa95   :  { %v3684_v22 = vmul.f32 %v8396_v21, %v3681_v19  ;;  %v8077_v21 = vpack.c.bf16 %v4263_v15, %v4262_v14  ;;  %v6771_v14 = vld [vmem:[%s10281_s0 + $0x28] sm:$0xff]  ;;  %v6772_v15 = vld [vmem:[%s10281_s0 + $0x30] sm:$0xff] }
 0xa97   :  { %7401 = vmatmul.mubr.msk.f32.vlgmr.msra.gmra.mrb[58].mxu0 %vm3689_vm10, %v3684_v22  ;;  %v3686_v24 = vmul.f32 %v3684_v22, %v3604_v8  ;;  %v4261_v8 = vld [vmem:[#allocation19 + $0x8] sm:$0xff]  ;;  %v4574_v22 = vld [vmem:[#allocation19 + $0x40] sm:$0xff] }
 0xa98   :  { %7404 = vmatpush3.msk.msra.mxu0 %vm3693_vm9, %v3688_v2  ;;  %7405 = vmatprep.mubr.msk.f32.mxu0 %vm8872_vm4, %v8871_v55  ;;  %v4499_v2 = vld [vmem:[#allocation17 + $0x10] sm:$0xff]  ;;  %v8074_v12 = vpack.c.bf16 %v4261_v8, %v4260_v5 }
 0xa99   :  { %v3687_v25 = vsub.f32 %v3685_v16, %v3686_v24  ;;  %8057 = vmatprep.subr.bf16.mxu0 %v8870_v0  ;;  %v4575_v16 = vld [vmem:[#allocation19 + $0x48] sm:$0xff] }
 0xa9a   :  { %v8081_v47 = vpack.c.bf16 %v4575_v16, %v4574_v22  ;;  %v8100_v22 = vpack.c.bf16 %v6772_v15, %v6771_v14  ;;  %v6773_v16 = vld [vmem:[%s10281_s0 + $0x38] sm:$0xff] }
 0xa9b   :  { %7406 = vmatmul.mubr.msk.f32.vlgmr.msra.gmra.mrb[60].mxu0 %vm3689_vm10, %v3687_v25 }
 0xa9c   :  { %7437 = vmatprep.mubr.msk.f32.mxu0 %vm8872_vm4, %v8871_v55 }
 0xb6a   :  { %v3763_v34 = vpop.f32.mrb[58].mxu0 }
 0xb6b   :  { %v3843_v36 = vrot.slane %v3763_v34, %v9832_v52  ;;  %v7402_v37 = vpop.f32.mrb[59].mxu0  ;;  %v4657_v34 = vld [vmem:[%s10279_s19 + $0x10] sm:$0xff] }
 0xb6d   :  { %v3844_v39 = vmul.f32 %v3843_v36, %v9969_v38  ;;  %v3845_v40 = vmul.f32 %v3843_v36, %v9973_v42  ;;  %v3846_v43 = vmul.f32 %v3843_v36, %v9983_v45  ;;  %v4658_v36 = vld [vmem:[%s10279_s19 + $0x18] sm:$0xff] }
 0xb6e   :  { %v3836_v44 = vpop.f32.mrb[60].mxu0  ;;  %v8091_v37 = vpack.c.bf16 %v4658_v36, %v4657_v34  ;;  %v5064_v36 = vld [vmem:[%s10281_s0] sm:$0xff] }
 0xb6f   :  { %v3850_v35 = vrot.slane %v3836_v44, %v9832_v52  ;;  %v7407_v46 = vpop.f32.mrb[61].mxu0 }
 0xb71   :  { %v3851_v49 = vadd.f32 %v3850_v35, %v3844_v39  ;;  %v3852_v4 = vadd.f32 %v3850_v35, %v3845_v40  ;;  %v3853_v41 = vadd.f32 %v3850_v35, %v3846_v43  ;;  %v4659_v39 = vld [vmem:[%s10279_s19 + $0x20] sm:$0xff] }
 0xb73   :  { %7423 = vmatmul.mubr.msk.f32.vlgmr.msra.gmra.mrb[114].mxu1 %vm3500_vm6, %v3851_v49 }
 0xb74   :  { %7425 = vmatprep.mubr.msk.f32.mxu1 %vm8872_vm4, %v8871_v55 }
 0xb77   :  { %7426 = vmatmul.mubr.msk.f32.gmra.mrb[116].mxu1 %vm3500_vm6, %v3852_v4 }
 0xb78   :  { %7428 = vmatprep.mubr.msk.f32.mxu1 %vm8872_vm4, %v8871_v55 }
 0xb7b   :  { %7429 = vmatmul.mubr.msk.f32.gmra.mrb[118].mxu1 %vm3500_vm6, %v3853_v41  ;;  %vm6349_vm6 = vcmask 253952  }
 0xb7c   :  { %7446 = vmatprep.mubr.msk.f32.mxu1 %vm8872_vm4, %v8871_v55 }
 0xc46   :  { %v3939_v38 = vpop.f32.mrb[114].mxu1 }
 0xc47   :  { %v7424_v42 = vpop.f32.mrb[115].mxu1 }
 0xc4a   :  { %v3944_v54 = vpop.f32.mrb[116].mxu1 }
 0xc4b   :  { %v8058_v45 = vpack.c.bf16 %v3944_v54, %v3939_v38  ;;  %v7427_v6 = vpop.f32.mrb[117].mxu1 }
 0xc4d   :  { %8059 = vmatpush3.bf16.msra.mxu0 %v8058_v45  ;;  %8062 = vmatpush3.bf16.msra.mxu1 %v8058_v45 }
 0xc4e   :  { %v3949_v10 = vpop.f32.mrb[118].mxu1  ;;  %7435 = vmatprep.subr.mxu0 %v8871_v55  ;;  %7444 = vmatprep.subr.mxu1 %v8871_v55 }
 0xc4f   :  { %v7430_v53 = vpop.f32.mrb[119].mxu1 }
 0xc51   :  { %7436 = vmatpush3.msk.msra.mxu0 %vm2053_vm2, %v3949_v10  ;;  %7445 = vmatpush3.msk.msra.mxu1 %vm2053_vm2, %v3949_v10 }
 0xc52   :  { %7447 = vmatmul.mubr.msk.f32.vlgmr.msra.gmra.mrb[120].mxu1 %vm3956_vm11, %v3953_v58  ;;  %8063 = vmatprep.subr.bf16.mxu1 %v8870_v0 }
 0xc53   :  { %8065 = vmatpush3.bf16.msra.mxu1 %v8058_v45  ;;  %7455 = vmatprep.mubr.msk.f32.mxu1 %vm8872_vm4, %v8871_v55 }
 0xc54   :  { %7453 = vmatprep.subr.mxu1 %v8871_v55  ;;  %7438 = vmatmul.mubr.msk.f32.vlgmr.msra.gmra.mrb[62].mxu0 %vm3956_vm11, %v3955_v56 }
 0xc55   :  { %7458 = vmatprep.subr.mxu0 %v8871_v55  ;;  %7460 = vmatprep.mubr.msk.f32.mxu0 %vm8872_vm4, %v8871_v55 }
 0xc57   :  { %7454 = vmatpush3.msk.msra.mxu1 %vm2053_vm2, %v3949_v10  ;;  %vm4186_vm2 = vcmask 64512  }
 0xc58   :  { %8066 = vmatprep.subr.bf16.mxu1 %v8870_v0 }
 0xc5a   :  { %7456 = vmatmul.mubr.msk.f32.vlgmr.msra.gmra.mrb[120].mxu1 %vm3956_vm11, %v4107_v13  ;;  %v4833_v13 = vld [vmem:[%s10280_s6] sm:$0xff] }
 0xc5b   :  { %7476 = vmatprep.mubr.msk.f32.mxu1 %vm8872_vm4, %v8871_v55  ;;  %8068 = vmatpush3.bf16.msra.mxu1 %v8067_v17 }
 0xc5c   :  { %8069 = vmatprep.subr.bf16.mxu1 %v8870_v0 }
 0xc5f   :  { %8072 = vmatpush3.bf16.msk.msra.mxu1 %vm10062_vm14, %v8070_v29 }
 0xc60   :  { %8073 = vmatprep.subr.bf16.mxu1 %v8870_v0 }
 0xd27   :  { %v4029_v62 = vpop.f32.mrb[62].mxu0 }
 0xd28   :  { %v7439_v20 = vpop.f32.mrb[63].mxu0 }
 0xd2d   :  { %v4177_v63 = vpop.f32.mrb[120].mxu1 }
 0xd2e   :  { %v8213_v1 = vadd.f32 %v4177_v63, %v4029_v62  ;;  %v7457_v48 = vpop.f32.mrb[121].mxu1 }
 0xd30   :  { %vm4182_vm12 = vcmp.ge.f32.partialorder %v8213_v1, 0.0  ;;  %v4183_v51 = vmul.f32 0.2, %v8213_v1 }
 0xd32   :  { %v4184_v23 = vsel %vm4182_vm12, %v8213_v1, %v4183_v51 }
 0xd33   :  { %7459 = vmatpush3.msra.mxu0 %v4184_v23 }
 0xd34   :  { %7461 = vmatmul.mubr.msk.f32.vlgmr.msra.gmra.mrb[64].mxu0 %vm4186_vm2, %v4185_v57  ;;  %7463 = vmatprep.subr.mxu0 %v8871_v55  ;;  %v4826_v57 = vld [vmem:[#allocation20] sm:$0x1] }
 0xd35   :  { %7464 = vmatpush3.msra.mxu0 %v4184_v23  ;;  %7465 = vmatprep.mubr.msk.f32.mxu0 %vm8872_vm4, %v8871_v55 }
 0xd36   :  { %7490 = vmatprep.subr.mxu0 %v8871_v55 }
 0xd38   :  { %7466 = vmatmul.mubr.msk.f32.vlgmr.msra.gmra.mrb[66].mxu0 %vm4186_vm2, %v4265_v60 }
 0xd39   :  { %7491 = vmatpush3.msra.mxu0 %v4184_v23  ;;  %7492 = vmatprep.mubr.msk.f32.mxu0 %vm8872_vm4, %v8871_v55 }
 0xd3a   :  { %8087 = vmatprep.subr.bf16.mxu0 %v8870_v0 }
 0xd3c   :  { %7493 = vmatmul.mubr.msk.f32.vlgmr.msra.gmra.mrb[68].mxu0 %vm4186_vm2, %v4499_v2  ;;  %v4830_v2 = vld [vmem:[#allocation22] sm:$0x1] }
 0xd3d   :  { %7516 = vmatprep.mubr.msk.f32.mxu0 %vm8872_vm4, %v8871_v55  ;;  %8089 = vmatpush3.bf16.msra.mxu0 %v8088_v28 }
 0xd3e   :  { %8090 = vmatprep.subr.bf16.mxu0 %v8870_v0 }
 0xd41   :  { %8092 = vmatpush3.bf16.msra.mxu0 %v8091_v37 }
 0xd42   :  { %7514 = vmatprep.subr.mxu0 %v8871_v55 }
 0xd45   :  { %7515 = vmatpush3.msra.mxu0 %v4659_v39 }
 0xd46   :  { %8093 = vmatprep.subr.bf16.mxu0 %v8870_v0 }
 0xe07   :  { %v4256_v9 = vpop.f32.mrb[64].mxu0 }
 0xe08   :  { %v7462_v11 = vpop.f32.mrb[65].mxu0 }
 0xe0b   :  { %v4335_v18 = vpop.f32.mrb[66].mxu0 }
 0xe0c   :  { %7477 = vmatmul.mubr.msk.f32.vlgmr.msra.gmra.mrb[122].mxu1 %vm4344_vm15, %v4335_v18  ;;  %v7467_v19 = vpop.f32.mrb[67].mxu0 }
 0xe0d   :  { %8075 = vmatpush3.bf16.msra.mxu1 %v8074_v12  ;;  %7487 = vmatprep.mubr.msk.f32.mxu1 %vm8872_vm4, %v8871_v55  ;;  %v5070_v19 = vld [vmem:[#allocation23 + $0x8] sm:$0xff] }
 0xe0e   :  { %8076 = vmatprep.subr.bf16.mxu1 %v8870_v0 }
 0xe0f   :  { %v4569_v24 = vpop.f32.mrb[68].mxu0 }
 0xe10   :  { %v7494_v25 = vpop.f32.mrb[69].mxu0 }
 0xe11   :  { %8079 = vmatpush3.bf16.msk.msra.mxu1 %vm10062_vm14, %v8077_v21  ;;  %v4990_v21 = vld [vmem:[#allocation23] sm:$0xff]  ;;  %v5297_v25 = vld [vmem:[#allocation23 + $0x10] sm:$0xff] }
 0xe12   :  { %8080 = vmatprep.subr.bf16.mxu1 %v8870_v0 }
 0xe14   :  { %7488 = vmatmul.mubr.msk.f32.vlgmr.msra.gmra.mrb[122].mxu1 %vm4344_vm15, %v4256_v9 }
 0xe15   :  { %8082 = vmatpush3.bf16.msra.mxu1 %v8081_v47  ;;  %7503 = vmatprep.mubr.msk.f32.mxu1 %vm8872_vm4, %v8871_v55 }
 0xe16   :  { %8083 = vmatprep.subr.bf16.mxu1 %v8870_v0 }
 0xe19   :  { %8086 = vmatpush3.bf16.msk.msra.mxu1 %vm10062_vm14, %v8084_v31  ;;  %v5452_v31 = vld [vmem:[%s10282_s20 + $0x8] sm:$0xff] }
 0xe1a   :  { %7532 = vmatprep.subr.mxu1 %v8871_v55  ;;  %v10139_v33 = vpack.c.bf16 %v5452_v31, %v5451_v30 }
 0xe1c   :  { %7504 = vmatmul.mubr.msk.f32.vlgmr.msra.gmra.mrb[122].mxu1 %vm4344_vm15, %v4569_v24  ;;  %v6774_v24 = vld [vmem:[%s10281_s0 + $0x40] sm:$0xff] }
 0xe1d   :  { %7534 = vmatprep.mubr.msk.f32.mxu1 %vm8872_vm4, %v8871_v55  ;;  %7533 = vmatpush3.msra.mxu1 %v4833_v13  ;;  %v8103_v47 = vpack.c.bf16 %v6774_v24, %v6773_v16 }
 0xe1e   :  { %7542 = vmatprep.subr.mxu1 %v8871_v55 }
 0xeef   :  { %v4650_v40 = vpop.f32.mrb[122].mxu1 }
 0xef0   :  { %v4661_v43 = vsel %vm4660_vm8, %v4650_v40, 0.0  ;;  %v4668_v44 = vmul.f32 %v4650_v40, %v4650_v40  ;;  %v7505_v35 = vpop.f32.mrb[123].mxu1 }
 0xef1   :  { %v4662_v46 = vrot.slane %v4661_v43, 4 }
 0xef2   :  { %v4669_v49 = vsel %vm4660_vm8, %v4668_v44, 0.0 }
 0xef3   :  { %v4663_v4 = vadd.f32 %v4662_v46, %v4661_v43  ;;  %v4670_v41 = vrot.slane %v4669_v49, 4  ;;  %v5067_v43 = vld [vmem:[%s10281_s0 + $0x18] sm:$0xff] }
 0xef5   :  { %v4664_v38 = vrot.slane %v4663_v4, 2  ;;  %v4671_v42 = vadd.f32 %v4670_v41, %v4669_v49 }
 0xef7   :  { %v4665_v54 = vadd.f32 %v4664_v38, %v4663_v4  ;;  %v4672_v6 = vrot.slane %v4671_v42, 2  ;;  %v6779_v38 = vld [vmem:[%s10281_s0 + $0x50] sm:$0xff] }
 0xef9   :  { %v4666_v45 = vrot.slane %v4665_v54, 1  ;;  %v4673_v53 = vadd.f32 %v4672_v6, %v4671_v42  ;;  %v6780_v42 = vld [vmem:[%s10281_s0 + $0x58] sm:$0xff] }
 0xefa   :  { %v8112_v6 = vpack.c.bf16 %v6780_v42, %v6779_v38  ;;  %v5966_v42 = vld [vmem:[#allocation28 + $0xc0] sm:$0xff] }
 0xefb   :  { %v4667_v10 = vadd.f32 %v4666_v45, %v4665_v54  ;;  %v4674_v58 = vrot.slane %v4673_v53, 1  ;;  %v5068_v45 = vld [vmem:[%s10281_s0 + $0x20] sm:$0xff] }
 0xefd   :  { %7517 = vmatmul.mubr.msk.f32.vlgmr.msra.gmra.mrb[70].mxu0 %vm4660_vm8, %v4667_v10  ;;  %v4675_v56 = vadd.f32 %v4674_v58, %v4673_v53  ;;  %v6781_v10 = vld [vmem:[%s10281_s0 + $0x60] sm:$0xff]  ;;  %v6782_v53 = vld [vmem:[%s10281_s0 + $0x68] sm:$0xff] }
 0xefe   :  { %8095 = vmatpush3.bf16.msra.mxu0 %v8088_v28  ;;  %7529 = vmatprep.mubr.msk.f32.mxu0 %vm8872_vm4, %v8871_v55  ;;  %v5454_v28 = vld [vmem:[%s10282_s20 + $0x18] sm:$0xff]  ;;  %v8115_v58 = vpack.c.bf16 %v6782_v53, %v6781_v10 }
 0xeff   :  { %8096 = vmatprep.subr.bf16.mxu0 %v8870_v0  ;;  %v10143_v34 = vpack.c.bf16 %v5454_v28, %v5453_v32  ;;  %v5627_v28 = vld [vmem:[#allocation26] sm:$0x1] }
 0xf02   :  { %8098 = vmatpush3.bf16.msra.mxu0 %v8091_v37  ;;  %v5065_v37 = vld [vmem:[%s10281_s0 + $0x8] sm:$0xff] }
 0xf03   :  { %7527 = vmatprep.subr.mxu0 %v8871_v55 }
 0xf06   :  { %7528 = vmatpush3.msra.mxu0 %v4659_v39  ;;  %v8106_v39 = vpack.c.bf16 %v5065_v37, %v5064_v36  ;;  %v5631_v37 = vld [vmem:[%s10283_s10] sm:$0x1] }
 0xf07   :  { %7530 = vmatmul.mubr.msk.f32.vlgmr.msra.gmra.mrb[72].mxu0 %vm4660_vm8, %v4675_v56  ;;  %7537 = vmatprep.subr.mxu0 %v8871_v55  ;;  %v6783_v56 = vld [vmem:[%s10281_s0 + $0x70] sm:$0xff] }
 0xf08   :  { %7539 = vmatprep.mubr.msk.f32.mxu0 %vm8872_vm4, %v8871_v55  ;;  %7538 = vmatpush3.msra.mxu0 %v4833_v13  ;;  %v5455_v13 = vld [vmem:[%s10282_s20 + $0x20] sm:$0xff] }
 0xf09   :  { %7547 = vmatprep.subr.mxu0 %v8871_v55 }
 0xfd0   :  { %v4745_v59 = vpop.f32.mrb[70].mxu0 }
 0xfd1   :  { %v7518_v61 = vpop.f32.mrb[71].mxu0  ;;  %v4749_v17 = vmul.f32 0.025, %v4745_v59  ;;  %v5456_v59 = vld [vmem:[%s10282_s20 + $0x28] sm:$0xff] }
 0xfd2   :  { %v8124_v61 = vpack.c.bf16 %v5456_v59, %v5455_v13  ;;  %v5975_v13 = vld [vmem:[#allocation28 + $0x108] sm:$0xff]  ;;  %v5977_v59 = vld [vmem:[#allocation28 + $0x118] sm:$0xff] }
 0xfd3   :  { %v4824_v20 = vmul.f32 %v4749_v17, %v4749_v17 }
 0xfda   :  { %v4819_v62 = vpop.f32.mrb[72].mxu0 }
 0xfdb   :  { %v4823_v63 = vmul.f32 0.025, %v4819_v62  ;;  %v7531_v1 = vpop.f32.mrb[73].mxu0  ;;  %v5458_v62 = vld [vmem:[%s10282_s20 + $0x38] sm:$0xff] }
 0xfdc   :  { %v5460_v1 = vld [vmem:[%s10282_s20 + $0x48] sm:$0xff] }
 0xfdd   :  { %v4825_v48 = vsub.f32 %v4823_v63, %v4824_v20  ;;  %v5459_v63 = vld [vmem:[%s10282_s20 + $0x40] sm:$0xff] }
 0xfdf   :  { %v4827_v51 = vadd.f32 1e-05, %v4825_v48  ;;  %v8130_v48 = vpack.c.bf16 %v5460_v1, %v5459_v63  ;;  %v5979_v63 = vld [vmem:[#allocation28 + $0x128] sm:$0xff]  ;;  %v5981_v1 = vld [vmem:[#allocation28 + $0x138] sm:$0xff] }
 0xfe1   :  { %8397 = vrsqrt.f32 %v4827_v51 }
 0xfeb   :  { %v8398_v23 = vpop.eup %8397 }
 0xfec   :  { %v4829_v60 = vmul.f32 %v8398_v23, %v4826_v57 }
 0xfee   :  { %7535 = vmatmul.mubr.msk.f32.vlgmr.msra.gmra.mrb[124].mxu1 %vm4186_vm2, %v4829_v60  ;;  %v4831_v26 = vmul.f32 %v4829_v60, %v4749_v17  ;;  %v5457_v17 = vld [vmem:[%s10282_s20 + $0x30] sm:$0xff] }
 0xfef   :  { %7544 = vmatprep.mubr.msk.f32.mxu1 %vm8872_vm4, %v8871_v55  ;;  %v8127_v20 = vpack.c.bf16 %v5458_v62, %v5457_v17  ;;  %v8165_v17 = vpack.c.bf16 %v5977_v59, %v5975_v13  ;;  %v5974_v62 = vld [vmem:[#allocation28 + $0x100] sm:$0xff] }
 0xff0   :  { %v4832_v3 = vsub.f32 %v4830_v2, %v4831_v26 }
 0xff2   :  { %7540 = vmatmul.mubr.msk.f32.vlgmr.msra.gmra.mrb[74].mxu0 %vm4186_vm2, %v4832_v3 }
 0xff3   :  { %7549 = vmatprep.mubr.msk.f32.mxu0 %vm8872_vm4, %v8871_v55 }
0x10c1   :  { %v4903_v29 = vpop.f32.mrb[124].mxu1 }
0x10c2   :  { %v4983_v7 = vrot.slane %v4903_v29, %v9832_v52  ;;  %v7536_v5 = vpop.f32.mrb[125].mxu1 }
0x10c4   :  { %v4984_v8 = vmul.f32 %v4983_v7, %v4650_v40  ;;  %v5066_v40 = vld [vmem:[%s10281_s0 + $0x10] sm:$0xff] }
0x10c5   :  { %v4976_v9 = vpop.f32.mrb[74].mxu0  ;;  %v8109_v49 = vpack.c.bf16 %v5067_v43, %v5066_v40  ;;  %v5963_v40 = vld [vmem:[#allocation28 + $0xa8] sm:$0xff]  ;;  %v5965_v43 = vld [vmem:[#allocation28 + $0xb8] sm:$0xff] }
0x10c6   :  { %v4988_v11 = vrot.slane %v4976_v9, %v9832_v52  ;;  %v7541_v12 = vpop.f32.mrb[75].mxu0 }
0x10c8   :  { %v4989_v18 = vadd.f32 %v4988_v11, %v4984_v8 }
0x10ca   :  { %7543 = vmatpush3.msra.mxu1 %v4989_v18  ;;  %7548 = vmatpush3.msra.mxu0 %v4989_v18 }
0x10cb   :  { %7550 = vmatmul.mubr.msk.f32.vlgmr.msra.gmra.mrb[76].mxu0 %vm4186_vm2, %v5070_v19  ;;  %7578 = vmatprep.subr.mxu0 %v8871_v55  ;;  %v5634_v19 = vld [vmem:[#allocation25] sm:$0xff] }
0x10cc   :  { %7579 = vmatpush3.msra.mxu0 %v4989_v18  ;;  %7545 = vmatmul.mubr.msk.f32.vlgmr.msra.gmra.mrb[126].mxu1 %vm4186_vm2, %v4990_v21  ;;  %v5635_v21 = vld [vmem:[#allocation25 + $0x8] sm:$0xff] }
0x10cd   :  { %7580 = vmatprep.mubr.msk.f32.mxu0 %vm8872_vm4, %v8871_v55  ;;  %8099 = vmatprep.subr.bf16.mxu1 %v8870_v0 }
0x10ce   :  { %8101 = vmatpush3.bf16.msra.mxu1 %v8100_v22  ;;  %7562 = vmatprep.mubr.msk.f32.mxu1 %vm8872_vm4, %v8871_v55  ;;  %v8148_v22 = vpack.c.bf16 %v5635_v21, %v5634_v19  ;;  %v5866_v21 = vld [vmem:[#allocation28] sm:$0xff] }
0x10cf   :  { %7581 = vmatmul.mubr.msk.f32.vlgmr.msra.gmra.mrb[78].mxu0 %vm4186_vm2, %v5297_v25  ;;  %8102 = vmatprep.subr.bf16.mxu1 %v8870_v0 }
0x10d0   :  { %8117 = vmatprep.subr.bf16.mxu0 %v8870_v0  ;;  %7616 = vmatprep.mubr.msk.f32.mxu0 %vm8872_vm4, %v8871_v55 }
0x10d1   :  { %8119 = vmatpush3.bf16.msra.mxu0 %v10139_v33 }
0x10d2   :  { %8104 = vmatpush3.bf16.msra.mxu1 %v8103_v47  ;;  %8120 = vmatprep.subr.bf16.mxu0 %v8870_v0 }
0x10d3   :  { %7560 = vmatprep.subr.mxu1 %v8871_v55 }
0x10d5   :  { %8122 = vmatpush3.bf16.msra.mxu0 %v10143_v34 }
0x10d6   :  { %7561 = vmatpush3.msra.mxu1 %v6775_v27  ;;  %8123 = vmatprep.subr.bf16.mxu0 %v8870_v0 }
0x10d7   :  { %8105 = vmatprep.subr.bf16.mxu1 %v8870_v0 }
0x10d9   :  { %8125 = vmatpush3.bf16.msra.mxu0 %v8124_v61 }
0x10da   :  { %8126 = vmatprep.subr.bf16.mxu0 %v8870_v0 }
0x10dd   :  { %8128 = vmatpush3.bf16.msra.mxu0 %v8127_v20 }
0x10de   :  { %8129 = vmatprep.subr.bf16.mxu0 %v8870_v0 }
0x10e1   :  { %8131 = vmatpush3.bf16.msra.mxu0 %v8130_v48 }
0x10e2   :  { %8132 = vmatprep.subr.bf16.mxu0 %v8870_v0 }
0x119e   :  { %v5140_v44 = vpop.f32.mrb[76].mxu0 }
0x119f   :  { %7563 = vmatmul.mubr.msk.f32.vlgmr.msra.gmra.mrb[128].mxu1 %vm4660_vm8, %v5140_v44  ;;  %v7551_v35 = vpop.f32.mrb[77].mxu0  ;;  %v5060_v46 = vpop.f32.mrb[126].mxu1  ;;  %v5962_v44 = vld [vmem:[#allocation28 + $0xa0] sm:$0xff] }
0x11a0   :  { %8107 = vmatpush3.bf16.msra.mxu1 %v8106_v39  ;;  %7575 = vmatprep.mubr.msk.f32.mxu1 %vm8872_vm4, %v8871_v55  ;;  %v7546_v4 = vpop.f32.mrb[127].mxu1  ;;  %v8153_v35 = vpack.c.bf16 %v5965_v43, %v5963_v40  ;;  %v5876_v40 = vld [vmem:[#allocation28 + $0x50] sm:$0xff]  ;;  %v5879_v43 = vld [vmem:[#allocation28 + $0x68] sm:$0xff] }
0x11a1   :  { %8108 = vmatprep.subr.bf16.mxu1 %v8870_v0  ;;  %v5969_v4 = vld [vmem:[#allocation28 + $0xd8] sm:$0xff] }
0x11a2   :  { %v5367_v41 = vpop.f32.mrb[78].mxu0 }
0x11a3   :  { %v7582_v54 = vpop.f32.mrb[79].mxu0 }
0x11a4   :  { %8110 = vmatpush3.bf16.msra.mxu1 %v8109_v49  ;;  %v5967_v49 = vld [vmem:[#allocation28 + $0xc8] sm:$0xff]  ;;  %v5968_v54 = vld [vmem:[#allocation28 + $0xd0] sm:$0xff] }
0x11a5   :  { %7573 = vmatprep.subr.mxu1 %v8871_v55  ;;  %v8157_v38 = vpack.c.bf16 %v5969_v4, %v5967_v49  ;;  %v8159_v10 = vpack.c.bf16 %v5968_v54, %v5966_v42  ;;  %v5883_v42 = vld [vmem:[#allocation28 + $0x88] sm:$0xff]  ;;  %v5885_v54 = vld [vmem:[#allocation28 + $0x98] sm:$0xff] }
0x11a8   :  { %7574 = vmatpush3.msra.mxu1 %v5068_v45  ;;  %v5971_v45 = vld [vmem:[#allocation28 + $0xe8] sm:$0xff] }
0x11a9   :  { %8111 = vmatprep.subr.bf16.mxu1 %v8870_v0  ;;  %7576 = vmatmul.mubr.msk.f32.vlgmr.msra.gmra.mrb[128].mxu1 %vm4660_vm8, %v5060_v46  ;;  %v5964_v46 = vld [vmem:[#allocation28 + $0xb0] sm:$0xff] }
0x11aa   :  { %8113 = vmatpush3.bf16.msra.mxu1 %v8112_v6  ;;  %7593 = vmatprep.mubr.msk.f32.mxu1 %vm8872_vm4, %v8871_v55  ;;  %v5973_v6 = vld [vmem:[#allocation28 + $0xf8] sm:$0xff] }
0x11ab   :  { %8114 = vmatprep.subr.bf16.mxu1 %v8870_v0  ;;  %v8161_v53 = vpack.c.bf16 %v5973_v6, %v5971_v45  ;;  %v8189_v6 = vpack.c.bf16 %v5885_v54, %v5883_v42 }
0x11ae   :  { %8116 = vmatpush3.bf16.msra.mxu1 %v8115_v58  ;;  %v5970_v58 = vld [vmem:[#allocation28 + $0xe0] sm:$0xff] }
0x11af   :  { %7591 = vmatprep.subr.mxu1 %v8871_v55 }
0x11b2   :  { %7592 = vmatpush3.msra.mxu1 %v6783_v56  ;;  %v5972_v56 = vld [vmem:[#allocation28 + $0xf0] sm:$0xff] }
0x11b3   :  { %7594 = vmatmul.mubr.msk.f32.vlgmr.msra.gmra.mrb[128].mxu1 %vm4660_vm8, %v5367_v41  ;;  %8147 = vmatprep.subr.bf16.mxu1 %v8870_v0  ;;  %v8155_v41 = vpack.c.bf16 %v5964_v46, %v5962_v44  ;;  %v5881_v44 = vld [vmem:[#allocation28 + $0x78] sm:$0xff] }
0x11b4   :  { %7646 = vmatprep.mubr.msk.f32.mxu1 %vm8872_vm4, %v8871_v55  ;;  %8149 = vmatpush3.bf16.msra.mxu1 %v8148_v22  ;;  %v8185_v4 = vpack.c.bf16 %v5881_v44, %v5879_v43 }
0x11b5   :  { %8150 = vmatprep.subr.bf16.mxu1 %v8870_v0 }
0x1286   :  { %v10182_v51 = vpop.f32.mrb[128].mxu1 }
0x1287   :  { %v5462_v57 = vsel %vm5461_vm1, %v10182_v51, 0.0  ;;  %v7595_v23 = vpop.f32.mrb[129].mxu1  ;;  %v5469_v26 = vmul.f32 %v10182_v51, %v10182_v51 }
0x1288   :  { %v5463_v60 = vrot.slane %v5462_v57, 4  ;;  %v5978_v23 = vld [vmem:[#allocation28 + $0x120] sm:$0xff] }
0x1289   :  { %v5470_v7 = vsel %vm5461_vm1, %v5469_v26, 0.0 }
0x128a   :  { %v5464_v2 = vadd.f32 %v5463_v60, %v5462_v57  ;;  %v5471_v9 = vrot.slane %v5470_v7, 4  ;;  %v8169_v57 = vpack.c.bf16 %v5981_v1, %v5979_v63  ;;  %v5980_v60 = vld [vmem:[#allocation28 + $0x130] sm:$0xff] }
0x128c   :  { %v5465_v3 = vrot.slane %v5464_v2, 2  ;;  %v5472_v11 = vadd.f32 %v5471_v9, %v5470_v7 }
0x128e   :  { %v5466_v29 = vadd.f32 %v5465_v3, %v5464_v2  ;;  %v5473_v12 = vrot.slane %v5472_v11, 2  ;;  %v8171_v2 = vpack.c.bf16 %v5980_v60, %v5978_v23  ;;  %v6215_v23 = vld [vmem:[#allocation28 + $0x188] sm:$0xff]  ;;  %v6217_v60 = vld [vmem:[#allocation28 + $0x198] sm:$0xff] }
0x1290   :  { %v5467_v5 = vrot.slane %v5466_v29, 1  ;;  %v5474_v14 = vadd.f32 %v5473_v12, %v5472_v11  ;;  %v5792_v12 = vld [vmem:[%s9031_s13] sm:$0xff] }
0x1292   :  { %v5468_v8 = vadd.f32 %v5467_v5, %v5466_v29  ;;  %v5475_v15 = vrot.slane %v5474_v14, 1 }
0x1294   :  { %7617 = vmatmul.mubr.msk.f32.vlgmr.msra.gmra.mrb[80].mxu0 %vm5461_vm1, %v5468_v8  ;;  %v5476_v18 = vadd.f32 %v5475_v15, %v5474_v14  ;;  %v6790_v14 = vld [vmem:[%s9031_s13 + $0x8] sm:$0xff]  ;;  %v5867_v15 = vld [vmem:[#allocation28 + $0x8] sm:$0xff] }
0x1295   :  { %8134 = vmatpush3.bf16.msra.mxu0 %v10139_v33  ;;  %7639 = vmatprep.mubr.msk.f32.mxu0 %vm8872_vm4, %v8871_v55 }
0x1296   :  { %8135 = vmatprep.subr.bf16.mxu0 %v8870_v0 }
0x1299   :  { %8137 = vmatpush3.bf16.msra.mxu0 %v10143_v34 }
0x129a   :  { %8138 = vmatprep.subr.bf16.mxu0 %v8870_v0 }
0x129d   :  { %8140 = vmatpush3.bf16.msra.mxu0 %v8124_v61  ;;  %v8163_v61 = vpack.c.bf16 %v5972_v56, %v5970_v58  ;;  %v6207_v58 = vld [vmem:[#allocation28 + $0x148] sm:$0xff]  ;;  %v6209_v56 = vld [vmem:[#allocation28 + $0x158] sm:$0xff] }
0x129e   :  { %8141 = vmatprep.subr.bf16.mxu0 %v8870_v0  ;;  %v8193_v59 = vpack.c.bf16 %v6209_v56, %v6207_v58 }
0x12a1   :  { %8143 = vmatpush3.bf16.msra.mxu0 %v8127_v20  ;;  %v5976_v20 = vld [vmem:[#allocation28 + $0x110] sm:$0xff] }
0x12a2   :  { %8144 = vmatprep.subr.bf16.mxu0 %v8870_v0 }
0x12a5   :  { %8146 = vmatpush3.bf16.msra.mxu0 %v8130_v48  ;;  %v8167_v48 = vpack.c.bf16 %v5976_v20, %v5974_v62  ;;  %v6211_v62 = vld [vmem:[#allocation28 + $0x168] sm:$0xff]  ;;  %v6213_v20 = vld [vmem:[#allocation28 + $0x178] sm:$0xff] }
0x12a6   :  { %8154 = vmatprep.subr.bf16.mxu0 %v8153_v35  ;;  %v8197_v1 = vpack.c.bf16 %v6213_v20, %v6211_v62 }
0x12a8   :  { %7640 = vmatmul.mubr.msk.f32.vlgmr.msra.gmra.mrb[82].mxu0 %vm5461_vm1, %v5476_v18  ;;  %v5869_v18 = vld [vmem:[#allocation28 + $0x18] sm:$0xff] }
0x12a9   :  { %6049 = vmatprep.mubr.f32.mxu0 %v8871_v55  ;;  %8156 = vmatpush1.bf16.msra.mxu0 %v8155_v41  ;;  %v8173_v19 = vpack.c.bf16 %v5869_v18, %v5867_v15  ;;  %v5878_v41 = vld [vmem:[#allocation28 + $0x60] sm:$0xff] }
0x12aa   :  { %8158 = vmatprep.subr.bf16.mxu0 %v8157_v38  ;;  %v5880_v38 = vld [vmem:[#allocation28 + $0x70] sm:$0xff] }
0x12ab   :  { %v8187_v45 = vpack.c.bf16 %v5880_v38, %v5878_v41 }
0x12ad   :  { %8160 = vmatpush1.bf16.msra.mxu0 %v8159_v10  ;;  %v5882_v10 = vld [vmem:[#allocation28 + $0x80] sm:$0xff] }
0x12ae   :  { %8162 = vmatprep.subr.bf16.mxu0 %v8161_v53  ;;  %v5884_v53 = vld [vmem:[#allocation28 + $0x90] sm:$0xff] }
0x12af   :  { %v8191_v13 = vpack.c.bf16 %v5884_v53, %v5882_v10 }
0x12b1   :  { %8164 = vmatpush1.bf16.msra.mxu0 %v8163_v61  ;;  %v6206_v61 = vld [vmem:[#allocation28 + $0x140] sm:$0xff] }
0x12b2   :  { %8166 = vmatprep.subr.bf16.mxu0 %v8165_v17  ;;  %v6208_v17 = vld [vmem:[#allocation28 + $0x150] sm:$0xff] }
0x12b3   :  { %v8195_v63 = vpack.c.bf16 %v6208_v17, %v6206_v61 }
0x12b5   :  { %8168 = vmatpush1.bf16.msra.mxu0 %v8167_v48  ;;  %v6210_v48 = vld [vmem:[#allocation28 + $0x160] sm:$0xff] }
0x12b6   :  { %8170 = vmatprep.subr.bf16.mxu0 %v8169_v57  ;;  %v6212_v57 = vld [vmem:[#allocation28 + $0x170] sm:$0xff] }
0x12b9   :  { %8172 = vmatpush1.bf16.msra.mxu0 %v8171_v2  ;;  %v8199_v2 = vpack.c.bf16 %v6212_v57, %v6210_v48 }
0x12ba   :  { %8174 = vmatprep.subr.bf16.mxu0 %v8173_v19  ;;  %v6224_v19 = vld [vmem:[#allocation28 + $0x1d0] sm:$0xff] }
0x1367   :  { %v5546_v16 = vpop.f32.mrb[80].mxu0 }
0x1368   :  { %v7618_v24 = vpop.f32.mrb[81].mxu0  ;;  %v5550_v25 = vmul.f32 0.025, %v5546_v16 }
0x1369   :  { %v5871_v24 = vld [vmem:[#allocation28 + $0x28] sm:$0xff] }
0x136a   :  { %v5625_v27 = vmul.f32 %v5550_v25, %v5550_v25 }
0x137b   :  { %v5620_v47 = vpop.f32.mrb[82].mxu0 }
0x137c   :  { %v5624_v30 = vmul.f32 0.025, %v5620_v47  ;;  %v7641_v31 = vpop.f32.mrb[83].mxu0 }
0x137d   :  { %v5870_v31 = vld [vmem:[#allocation28 + $0x20] sm:$0xff] }
0x137e   :  { %v5626_v32 = vsub.f32 %v5624_v30, %v5625_v27 }
0x1380   :  { %v5628_v33 = vadd.f32 1e-05, %v5626_v32  ;;  %v5872_v32 = vld [vmem:[#allocation28 + $0x30] sm:$0xff] }
0x1382   :  { %8399 = vrsqrt.f32 %v5628_v33 }
0x138c   :  { %v8400_v34 = vpop.eup %8399 }
0x138d   :  { %v5630_v36 = vmul.f32 %v8400_v34, %v5627_v28  ;;  %v5875_v28 = vld [vmem:[#allocation28 + $0x48] sm:$0xff]  ;;  %v5877_v34 = vld [vmem:[#allocation28 + $0x58] sm:$0xff] }
0x138f   :  { %7647 = vmatmul.mubr.msk.f32.vlgmr.msra.gmra.mrb[130].mxu1 %vm383_vm0, %v5630_v36  ;;  %v5632_v39 = vmul.f32 %v5630_v36, %v5550_v25  ;;  %v5873_v25 = vld [vmem:[#allocation28 + $0x38] sm:$0xff] }
0x1390   :  { %8152 = vmatpush3.bf16.msra.mxu1 %v8148_v22  ;;  %7653 = vmatprep.mubr.msk.f32.mxu1 %vm8872_vm4, %v8871_v55  ;;  %v5868_v22 = vld [vmem:[#allocation28 + $0x10] sm:$0xff]  ;;  %v8177_v30 = vpack.c.bf16 %v5873_v25, %v5871_v24 }
0x1391   :  { %v5633_v0 = vsub.f32 %v5631_v37, %v5632_v39  ;;  %7656 = vmatprep.subr.mxu1 %v8871_v55  ;;  %v8175_v27 = vpack.c.bf16 %v5868_v22, %v5866_v21  ;;  %v8179_v37 = vpack.c.bf16 %v5872_v32, %v5870_v31  ;;  %v8181_v39 = vpack.c.bf16 %v5877_v34, %v5875_v28  ;;  %v6302_v22 = vld [vmem:[%s9041_s21] sm:$0x3]  ;;  %s8875_s21 = smov 96  }
0x1392   :  { %v6307_v24 = vrot.slane %v6302_v22, %v9832_v52 }
0x1393   :  { %7654 = vmatmul.mubr.msk.f32.vlgmr.msra.gmra.mrb[132].mxu1 %vm383_vm0, %v5633_v0  ;;  %v5874_v0 = vld [vmem:[#allocation28 + $0x40] sm:$0xff]  ;;  %vm6316_vm0 = vcmask 1043456  }
0x1394   :  { %7658 = vmatprep.mubr.msk.f32.mxu1 %vm8872_vm4, %v8871_v55  ;;  %v8183_v49 = vpack.c.bf16 %v5876_v40, %v5874_v0 }
0x1462   :  { %v5705_v26 = vpop.f32.mrb[130].mxu1 }
0x1463   :  { %v5785_v3 = vrot.slane %v5705_v26, %v9832_v52  ;;  %v7648_v29 = vpop.f32.mrb[131].mxu1  ;;  %v8201_v26 = vpack.c.bf16 %v6217_v60, %v6215_v23 }
0x1464   :  { %v6216_v29 = vld [vmem:[#allocation28 + $0x190] sm:$0xff] }
0x1465   :  { %v5786_v7 = vmul.f32 %v5785_v3, %v10182_v51  ;;  %v6794_v51 = vld [vmem:[%s9031_s13 + $0x10] sm:$0xff]  ;;  %s8874_s13 = smov 64  }
0x1466   :  { %v5778_v5 = vpop.f32.mrb[132].mxu1  ;;  %v6214_v3 = vld [vmem:[#allocation28 + $0x180] sm:$0xff] }
0x1467   :  { %v5790_v8 = vrot.slane %v5778_v5, %v9832_v52  ;;  %v7655_v9 = vpop.f32.mrb[133].mxu1  ;;  %v6221_v5 = vld [vmem:[#allocation28 + $0x1b8] sm:$0xff] }
0x1469   :  { %v5791_v11 = vadd.f32 %v5790_v8, %v5786_v7  ;;  %v6219_v7 = vld [vmem:[#allocation28 + $0x1a8] sm:$0xff]  ;;  %v8203_v8 = vpack.c.bf16 %v6216_v29, %v6214_v3 }
0x146a   :  { %v8205_v9 = vpack.c.bf16 %v6221_v5, %v6219_v7 }
0x146b   :  { %7657 = vmatpush3.msra.mxu1 %v5791_v11 }
0x146c   :  { %7659 = vmatmul.mubr.msk.f32.vlgmr.msra.gmra.mrb[134].mxu1 %vm4186_vm2, %v5792_v12  ;;  %7661 = vmatprep.subr.mxu1 %v8871_v55  ;;  %v6220_v12 = vld [vmem:[#allocation28 + $0x1b0] sm:$0xff] }
0x146d   :  { %7662 = vmatpush3.msra.mxu1 %v5791_v11  ;;  %7663 = vmatprep.mubr.msk.f32.mxu1 %vm8872_vm4, %v8871_v55 }
0x146e   :  { %7666 = vmatprep.subr.mxu1 %v8871_v55 }
0x1470   :  { %7664 = vmatmul.mubr.msk.f32.vlgmr.msra.gmra.mrb[136].mxu1 %vm4186_vm2, %v6790_v14  ;;  %v6223_v14 = vld [vmem:[#allocation28 + $0x1c8] sm:$0xff] }
0x1471   :  { %7667 = vmatpush3.msra.mxu1 %v5791_v11  ;;  %7668 = vmatprep.mubr.msk.f32.mxu1 %vm8872_vm4, %v8871_v55  ;;  %v6218_v11 = vld [vmem:[#allocation28 + $0x1a0] sm:$0xff]  ;;  %vm6351_vm4 = vcmask 1047556  }
0x1472   :  { %v8207_v15 = vpack.c.bf16 %v6220_v12, %v6218_v11 }
0x1474   :  { %7669 = vmatmul.mubr.msk.f32.vlgmr.msra.gmra.mrb[138].mxu1 %vm4186_vm2, %v6794_v51  ;;  %v6225_v51 = vld [vmem:[#allocation28 + $0x1d8] sm:$0xff] }
0x1475   :  { %v8209_v18 = vpack.c.bf16 %v6225_v51, %v6223_v14 }
0x153f   :  { %v5862_v16 = vpop.f32.mrb[134].mxu1 }
0x1540   :  { %v7660_v47 = vpop.f32.mrb[135].mxu1 }
0x1543   :  { %v5957_v33 = vpop.f32.mrb[136].mxu1 }
0x1544   :  { %6792 = vmatmul.mubr.msk.f32.vlgmr.msra.gmra.mrb[84].mxu0 %vm5461_vm1, %v5957_v33  ;;  %v7665_v36 = vpop.f32.mrb[137].mxu1 }
0x1545   :  { %8176 = vmatpush1.bf16.msra.mxu0 %v8175_v27  ;;  %6123 = vmatprep.mubr.f32.mxu0 %v8871_v55 }
0x1546   :  { %8178 = vmatprep.subr.bf16.mxu0 %v8177_v30 }
0x1547   :  { %v6201_v35 = vpop.f32.mrb[138].mxu1 }
0x1548   :  { %v7670_v46 = vpop.f32.mrb[139].mxu1 }
0x1549   :  { %8180 = vmatpush1.bf16.msra.mxu0 %v8179_v37 }
0x154a   :  { %8182 = vmatprep.subr.bf16.mxu0 %v8181_v39 }
0x154d   :  { %8184 = vmatpush1.bf16.msra.mxu0 %v8183_v49 }
0x154e   :  { %8186 = vmatprep.subr.bf16.mxu0 %v8185_v4 }
0x1551   :  { %8188 = vmatpush1.bf16.msra.mxu0 %v8187_v45 }
0x1552   :  { %8190 = vmatprep.subr.bf16.mxu0 %v8189_v6 }
0x1555   :  { %8192 = vmatpush1.bf16.msra.mxu0 %v8191_v13 }
0x1556   :  { %8194 = vmatprep.subr.bf16.mxu0 %v8193_v59 }
0x1558   :  { %6793 = vmatmul.mubr.msk.f32.vlgmr.msra.gmra.mrb[84].mxu0 %vm5461_vm1, %v5862_v16  ;;  %v6310_v16 = vsub.s32 1, %v9829_v50 }
0x1559   :  { %8196 = vmatpush1.bf16.msra.mxu0 %v8195_v63  ;;  %6293 = vmatprep.mubr.f32.mxu0 %v8871_v55  ;;  %v6222_v55 = vld [vmem:[#allocation28 + $0x1c0] sm:$0xff] }
0x155a   :  { %8198 = vmatprep.subr.bf16.mxu0 %v8197_v1  ;;  %v8211_v21 = vpack.c.bf16 %v6224_v19, %v6222_v55  ;;  %v6311_v25 = vrot.slane %v6302_v22, %v6310_v16 }
0x155d   :  { %8200 = vmatpush1.bf16.msra.mxu0 %v8199_v2 }
0x155e   :  { %8202 = vmatprep.subr.bf16.mxu0 %v8201_v26 }
0x1561   :  { %8204 = vmatpush1.bf16.msra.mxu0 %v8203_v8 }
0x1562   :  { %8206 = vmatprep.subr.bf16.mxu0 %v8205_v9 }
0x1565   :  { %8208 = vmatpush1.bf16.msra.mxu0 %v8207_v15 }
0x1566   :  { %8210 = vmatprep.subr.bf16.mxu0 %v8209_v18 }
0x1569   :  { %8212 = vmatpush1.bf16.msra.mxu0 %v8211_v21 }
0x156c   :  { %6796 = vmatmul.mubr.msk.f32.vlgmr.msra.gmra.mrb[84].mxu0 %vm5461_vm1, %v6201_v35 }
0x163f   :  { %v6295_v47 = vpop.f32.mrb[84].mxu0 }
0x1640   :  { %v6314_v27 = vadd.f32 %v6307_v24, %v6295_v47  ;;  %v6297_v30 = vpop.f32.mrb[85].mxu0 }
0x1641   :  { %v6315_v31 = vadd.f32 %v6311_v25, %v6297_v30 }
0x1642   :  { %v6317_v32 = vsel %vm6316_vm0, %v6314_v27, -inf  ;;  %v6352_v33 = vsel %vm6351_vm4, %v6314_v27, -inf }
0x1643   :  { %v6318_v28 = vrot.slane %v6317_v32, 4  ;;  %v6353_v34 = vrot.slane %v6352_v33, 4  ;;  %v6325_v46 = vsel %vm6324_vm5, %v6315_v31, -inf  ;;  %v6360_v49 = vsel %vm6359_vm3, %v6315_v31, -inf }
0x1644   :  { %v6326_v4 = vrot.slane %v6325_v46, 4  ;;  %v6361_v41 = vrot.slane %v6360_v49, 4 }
0x1645   :  { %v6319_v36 = vmax.f32 %v6317_v32, %v6318_v28  ;;  %v6354_v37 = vmax.f32 %v6352_v33, %v6353_v34 }
0x1646   :  { %v6327_v38 = vmax.f32 %v6325_v46, %v6326_v4  ;;  %v6362_v42 = vmax.f32 %v6360_v49, %v6361_v41 }
0x1647   :  { %v6320_v39 = vrot.slane %v6319_v36, 2  ;;  %v6355_v0 = vrot.slane %v6354_v37, 2 }
0x1648   :  { %v6328_v54 = vrot.slane %v6327_v38, 2  ;;  %v6363_v45 = vrot.slane %v6362_v42, 2 }
0x1649   :  { %v6321_v40 = vmax.f32 %v6319_v36, %v6320_v39  ;;  %v6356_v43 = vmax.f32 %v6354_v37, %v6355_v0 }
0x164a   :  { %v6329_v53 = vmax.f32 %v6327_v38, %v6328_v54  ;;  %v6364_v58 = vmax.f32 %v6362_v42, %v6363_v45 }
0x164b   :  { %v6322_v50 = vrot.slane %v6321_v40, 1  ;;  %v6357_v44 = vrot.slane %v6356_v43, 1 }
0x164c   :  { %v6365_v17 = vrot.slane %v6364_v58, 1  ;;  %v6330_v62 = vrot.slane %v6329_v53, 1 }
0x164d   :  { %v6323_v52 = vmax.f32 %v6321_v40, %v6322_v50  ;;  %v6358_v35 = vmax.f32 %v6356_v43, %v6357_v44 }
0x164e   :  { %v6366_v57 = vmax.f32 %v6364_v58, %v6365_v17  ;;  %v6331_v60 = vmax.f32 %v6329_v53, %v6330_v62 }
0x164f   :  { %6337 = vrot.lane.b32.xlu1 %v6323_v52, %s8874_s13  ;;  %6333 = vrot.lane.b32.xlu0 %v6323_v52, %s8875_s21 }
0x1653   :  { %6372 = vrot.lane.b32.xlu1 %v6358_v35, %s8874_s13  ;;  %6368 = vrot.lane.b32.xlu0 %v6358_v35, %s8875_s21 }
0x1657   :  { %6376 = vrot.lane.b32.xlu1 %v6358_v35, %s8876_s11  ;;  %6341 = vrot.lane.b32.xlu0 %v6323_v52, %s8876_s11 }
0x16c1   :  { %v6338_v6 = vpop.permute.xlu1 %6337  ;;  %v6334_v10 = vpop.permute.xlu0 %6333 }
0x16c2   :  { %v6336_v56 = vmax.f32 %v6323_v52, %v6334_v10 }
0x16c4   :  { %v6340_v63 = vmax.f32 %v6336_v56, %v6338_v6 }
0x16c5   :  { %v6373_v13 = vpop.permute.xlu1 %6372  ;;  %v6369_v59 = vpop.permute.xlu0 %6368 }
0x16c6   :  { %v6371_v61 = vmax.f32 %v6358_v35, %v6369_v59 }
0x16c8   :  { %v6375_v20 = vmax.f32 %v6371_v61, %v6373_v13 }
0x16c9   :  { %v6377_v1 = vpop.permute.xlu1 %6376  ;;  %v6342_v48 = vpop.permute.xlu0 %6341 }
0x16ca   :  { %v6379_v23 = vmax.f32 %v6375_v20, %v6377_v1  ;;  %v6344_v2 = vmax.f32 %v6340_v63, %v6342_v48 }
0x16cc   :  { %v6380_v26 = vmax.f32 %v6379_v23, %v6366_v57  ;;  %v6345_v3 = vmax.f32 %v6344_v2, %v6331_v60 }
0x16ce   :  { %vm6381_vm7 = vcmp.ge.f32.partialorder %v6380_v26, 0.0  ;;  %v6382_v29 = vmul.f32 0.2, %v6380_v26  ;;  %vm6346_vm9 = vcmp.ge.f32.partialorder %v6345_v3, 0.0  ;;  %v6347_v7 = vmul.f32 0.2, %v6345_v3 }
0x16d0   :  { %v6348_v5 = vsel %vm6346_vm9, %v6345_v3, %v6347_v7  ;;  %v6383_v8 = vsel %vm6381_vm7, %v6380_v26, %v6382_v29 }
0x16d1   :  { %6350 = vst.msk [vmem:[#allocation29] sm:$0x1] %vm6349_vm6, %v6348_v5  ;;  %6384 = vst.msk [vmem:[#allocation29 + $0x1] sm:$0x1] %vm6349_vm6, %v6383_v8 }
0x16d2   :  { %8786 = shalt.err (!%p8783_p0)
}
0x16d3   :  { %s8787_s29 = scalar_lea.hbm %s9046_s27, 32 }
0x16d4   :  { %p8788_p1 = scmp.ne.s32.totalorder %s9046_s27, %s8787_s29  ;;  %p8791_p2 = scmp.lt.u32.totalorder %s8787_s29, %s9046_s27 }
0x16d6   :  { %p8793_p3 = pnand %p8791_p2, %p8788_p1 }
0x16d8   :  { %8796 = shalt.err (!%p8793_p3)
}
0x16d9   :  { %6394 = dma.vmem_to_hbm [thread:$0]  %s6392_s5, 32, %s9046_s27, [#allocation4]  }
0x16da   :  { %8815 = dma.done.wait [#allocation4], 32  }
0x16db   :  { %8816 = vsyncadd [#allocation4], 4294967264 }
0x16dc   :  { %6398 = vsyncpa [#allocation3], 1 }
0x16dd   :  { %6399 = vsyncpa [#allocation6], 1 }
0x16de   :  { %6400 = vsyncpa [#allocation9], 1 }
0x16df   :  { %6401 = vsyncpa [#allocation12], 1 }
0x16e0   :  { %6402 = vsyncpa [#allocation15], 1 }
0x16e1   :  { %6403 = vsyncpa [#allocation18], 1 }
0x16e2   :  { %6404 = vsyncpa [#allocation21], 1 }
0x16e3   :  { %6405 = vsyncpa [#allocation24], 1 }
0x16e4   :  { %6406 = vsyncpa [#allocation27], 1 }
0x16e5   :  { %6407 = vsyncpa [#allocation4], 1 }

</bundles_post_ra>
